<compile_context>
chip_gen: v7x
topology: tpu7x:2x2x1
jax: 0.10.0
libtpu: 0.0.40
codegen_flags: <defaults>
</compile_context>

<pallas_src>
import jax
import jax.numpy as jnp
from jax.experimental import pallas as pl
from jax.experimental.pallas import tpu as pltpu


# ----------------------------------------------------------------------------
# Small helpers
# ----------------------------------------------------------------------------
def _vmem_limit_bytes():
    """Per-generation VMEM limit: ~100 MiB on 128 MiB parts, 48 MiB otherwise."""
    try:
        kind = jax.devices()[0].device_kind.lower()
    except Exception:  # pragma: no cover - defensive
        kind = ""
    if "v5" in kind or "v6" in kind:      # 128 MiB VMEM per TensorCore
        return 100 * 1024 * 1024
    return 48 * 1024 * 1024               # v7x: 64 MiB per TensorCore


def _lane_tile(s, target):
    """Largest divisor of s that is a multiple of 128 and <= target (fallback s)."""
    if s <= target:
        return s
    t = (target // 128) * 128
    while t >= 128:
        if s % t == 0:
            return t
        t -= 128
    return s


def _fold_bn(st, count, gamma, beta, eps=1e-5):
    """Reduce per-tile partial stats and fold BN into per-channel scale/shift."""
    c = st.shape[-2]
    tot = st.reshape(-1, c, 2).sum(axis=0)            # (C, 2) f32
    mean = tot[:, 0:1] / count
    var = tot[:, 1:2] / count - mean * mean            # biased var (training BN)
    scale = gamma.reshape(-1, 1) * jax.lax.rsqrt(var + eps)
    shift = beta.reshape(-1, 1) - mean * scale
    return scale.astype(jnp.float32), shift.astype(jnp.float32)   # (C, 1) each


# ----------------------------------------------------------------------------
# Kernels
# ----------------------------------------------------------------------------
def _conv1_stats_kernel(x_ref, w1t_ref, y1_ref, st_ref):
    """1x1x1 conv: (P, Cin) @ (Cin, S_tile) -> lane-dense (P, S_tile) + BN1 partial stats."""
    xb = x_ref[0].astype(jnp.bfloat16)                 # cast in-kernel (free VPU slot)
    y = jnp.dot(w1t_ref[...], xb, preferred_element_type=jnp.float32)
    y1_ref[0] = y.astype(y1_ref.dtype)
    st_ref[0, 0] = jnp.concatenate(
        [jnp.sum(y, axis=1, keepdims=True),
         jnp.sum(y * y, axis=1, keepdims=True)], axis=1)          # single store


def _make_conv2_kernel(D, H, W, P):
    """BN1(folded)+ReLU -> conv3x3x3 as ONE matmul (K = 27*P) + BN2 partial stats."""
    S = D * H * W
    pad = -(-(H * W + W + 1) // 128) * 128             # flat-halo, rounded to lane tile
    offsets = [(kd - 1) * H * W + (kh - 1) * W + (kw - 1)
               for kd in range(3) for kh in range(3) for kw in range(3)]

    def kernel(y1_ref, sc_ref, sh_ref, w2_ref, mask_ref, y2_ref, st_ref):
        z = jnp.maximum(
            y1_ref[0].astype(jnp.float32) * sc_ref[...] + sh_ref[...], 0.0)  # (P, S)
        zeros = jnp.zeros((P, pad), jnp.float32)
        zp = jnp.concatenate([zeros, z, zeros], axis=1)                       # (P, S+2*pad)
        # 27 lane-axis shifts (static slices) x boundary masks -> im2col patch.
        parts = [zp[:, pad + off: pad + off + S] * mask_ref[j:j + 1, :]
                 for j, off in enumerate(offsets)]                            # 27 x (P, S)
        patch = jnp.concatenate(parts, axis=0).astype(jnp.bfloat16)           # (27P, S)
        y2 = jnp.dot(w2_ref[...], patch, preferred_element_type=jnp.float32)  # (P, S)
        y2_ref[0] = y2.astype(y2_ref.dtype)
        st_ref[0] = jnp.concatenate(
            [jnp.sum(y2, axis=1, keepdims=True),
             jnp.sum(y2 * y2, axis=1, keepdims=True)], axis=1)

    return kernel


def _conv3_stats_kernel(y2_ref, sc_ref, sh_ref, w3t_ref, y3_ref, st_ref):
    """BN2(folded)+ReLU -> 1x1x1 conv (P -> Cout) + BN3 partial stats."""
    z = jnp.maximum(
        y2_ref[0].astype(jnp.float32) * sc_ref[...] + sh_ref[...], 0.0)       # (P, ts)
    y = jnp.dot(w3t_ref[...], z.astype(jnp.bfloat16),
                preferred_element_type=jnp.float32)                            # (Cout, ts)
    y3_ref[0] = y.astype(y3_ref.dtype)
    st_ref[0, 0] = jnp.concatenate(
        [jnp.sum(y, axis=1, keepdims=True),
         jnp.sum(y * y, axis=1, keepdims=True)], axis=1)


def _bn_add_relu_kernel(y3_ref, xres_ref, sc_ref, sh_ref, o_ref):
    """BN3(folded) + residual add + ReLU, lane-dense (Cout, S_tile) blocks."""
    o_ref[0] = jnp.maximum(
        y3_ref[0].astype(jnp.float32) * sc_ref[...] + sh_ref[...] + xres_ref[0], 0.0)


# ----------------------------------------------------------------------------
# Wrapper
# ----------------------------------------------------------------------------
def bottleneck_forward(x_ncdhw, params):
    f32, bf16 = jnp.float32, jnp.bfloat16
    x = x_ncdhw.astype(f32)
    N, Cin, D, H, W = x.shape
    P = params["w1"].shape[1]
    Cout = params["w3"].shape[1]
    assert Cin == Cout, "no-downsample Bottleneck requires in_planes == planes*4"

    S = D * H * W
    R = N * S                                     # BN population per channel
    x3 = x.reshape(N, Cin, S)                     # channels-first flat (free reshape)

    w1t = params["w1"].T.astype(bf16)                         # (P, Cin)
    w2m = params["w2"].reshape(27 * P, P).T.astype(bf16)      # (P, 27P) tap-major cols
    w3t = params["w3"].T.astype(bf16)                         # (Cout, P)

    # Zero-padding validity masks for the 27 taps (built once in XLA, tap-major).
    dd, hh, ww = jnp.arange(D), jnp.arange(H), jnp.arange(W)
    masks = []
    for kd in range(3):
        for kh in range(3):
            for kw in range(3):
                vd = (dd + kd - 1 >= 0) & (dd + kd - 1 < D)
                vh = (hh + kh - 1 >= 0) & (hh + kh - 1 < H)
                vw = (ww + kw - 1 >= 0) & (ww + kw - 1 < W)
                masks.append((vd[:, None, None] & vh[None, :, None]
                              & vw[None, None, :]).reshape(S))
    masks = jnp.stack(masks).astype(f32)                      # (27, S)

    vmem = _vmem_limit_bytes()

    def cp(n_axes):
        return pltpu.CompilerParams(vmem_limit_bytes=vmem,
                                    dimension_semantics=("parallel",) * n_axes)

    ts = _lane_tile(S, 8192)
    n_ts = S // ts

    # ---- stage 1: conv1 (1x1x1) + BN1 partial statistics --------------------
    y1, st1 = pl.pallas_call(
        _conv1_stats_kernel,
        grid=(N, n_ts),
        in_specs=[pl.BlockSpec((1, Cin, ts), lambda n, i: (n, 0, i)),
                  pl.BlockSpec((P, Cin), lambda n, i: (0, 0))],
        out_specs=[pl.BlockSpec((1, P, ts), lambda n, i: (n, 0, i)),
                   pl.BlockSpec((1, 1, P, 2), lambda n, i: (n, i, 0, 0))],
        out_shape=(jax.ShapeDtypeStruct((N, P, S), bf16),
                   jax.ShapeDtypeStruct((N, n_ts, P, 2), f32)),
        compiler_params=cp(2),
    )(x3, w1t)
    sc1, sh1 = _fold_bn(st1, R, params["g1"], params["b1"])

    # ---- stage 2: BN1+ReLU -> conv2 (3x3x3, one K=27P matmul) + BN2 stats ----
    y2, st2 = pl.pallas_call(
        _make_conv2_kernel(D, H, W, P),
        grid=(N,),
        in_specs=[pl.BlockSpec((1, P, S), lambda n: (n, 0, 0)),
                  pl.BlockSpec((P, 1), lambda n: (0, 0)),
                  pl.BlockSpec((P, 1), lambda n: (0, 0)),
                  pl.BlockSpec((P, 27 * P), lambda n: (0, 0)),
                  pl.BlockSpec((27, S), lambda n: (0, 0))],
        out_specs=[pl.BlockSpec((1, P, S), lambda n: (n, 0, 0)),
                   pl.BlockSpec((1, P, 2), lambda n: (n, 0, 0))],
        out_shape=(jax.ShapeDtypeStruct((N, P, S), bf16),
                   jax.ShapeDtypeStruct((N, P, 2), f32)),
        compiler_params=cp(1),
    )(y1, sc1, sh1, w2m, masks)
    sc2, sh2 = _fold_bn(st2, R, params["g2"], params["b2"])

    # ---- stage 3: BN2+ReLU -> conv3 (1x1x1) + BN3 partial statistics ---------
    y3, st3 = pl.pallas_call(
        _conv3_stats_kernel,
        grid=(N, n_ts),
        in_specs=[pl.BlockSpec((1, P, ts), lambda n, i: (n, 0, i)),
                  pl.BlockSpec((P, 1), lambda n, i: (0, 0)),
                  pl.BlockSpec((P, 1), lambda n, i: (0, 0)),
                  pl.BlockSpec((Cout, P), lambda n, i: (0, 0))],
        out_specs=[pl.BlockSpec((1, Cout, ts), lambda n, i: (n, 0, i)),
                   pl.BlockSpec((1, 1, Cout, 2), lambda n, i: (n, i, 0, 0))],
        out_shape=(jax.ShapeDtypeStruct((N, Cout, S), bf16),
                   jax.ShapeDtypeStruct((N, n_ts, Cout, 2), f32)),
        compiler_params=cp(2),
    )(y2, sc2, sh2, w3t)
    sc3, sh3 = _fold_bn(st3, R, params["g3"], params["b3"])

    # ---- stage 4: BN3 + residual + ReLU (lane-dense, fully parallel) ---------
    out = pl.pallas_call(
        _bn_add_relu_kernel,
        grid=(N, n_ts),
        in_specs=[pl.BlockSpec((1, Cout, ts), lambda n, i: (n, 0, i)),
                  pl.BlockSpec((1, Cout, ts), lambda n, i: (n, 0, i)),
                  pl.BlockSpec((Cout, 1), lambda n, i: (0, 0)),
                  pl.BlockSpec((Cout, 1), lambda n, i: (0, 0))],
        out_specs=pl.BlockSpec((1, Cout, ts), lambda n, i: (n, 0, i)),
        out_shape=jax.ShapeDtypeStruct((N, Cout, S), f32),
        compiler_params=cp(2),
    )(y3, x3, sc3, sh3)

    return out.reshape(N, Cout, D, H, W)          # already NCDHW, free reshape


# ----------------------------------------------------------------------------
# Pure-JAX reference (f32, HIGHEST precision) for correctness check only
# ----------------------------------------------------------------------------
def bottleneck_ref(x_ncdhw, params):
    x = jnp.transpose(x_ncdhw, (0, 2, 3, 4, 1)).astype(jnp.float32)
    dn = ("NDHWC", "DHWIO", "NDHWC")

    def conv(v, w, pad):
        return jax.lax.conv_general_dilated(
            v, w, (1, 1, 1), pad, dimension_numbers=dn,
            precision=jax.lax.Precision.HIGHEST)

    def bn(y, g, b):
        mu = jnp.mean(y, axis=(0, 1, 2, 3), keepdims=True)
        var = jnp.mean((y - mu) ** 2, axis=(0, 1, 2, 3), keepdims=True)
        return ((y - mu) * jax.lax.rsqrt(var + 1e-5)
                * g.reshape(1, 1, 1, 1, -1) + b.reshape(1, 1, 1, 1, -1))

    y = jax.nn.relu(bn(conv(x, params["w1"][None, None, None], "VALID"),
                       params["g1"], params["b1"]))
    y = jax.nn.relu(bn(conv(y, params["w2"], [(1, 1)] * 3),
                       params["g2"], params["b2"]))
    y = bn(conv(y, params["w3"][None, None, None], "VALID"),
           params["g3"], params["b3"])
    y = jax.nn.relu(y + x)
    return jnp.transpose(y, (0, 4, 1, 2, 3))


# ----------------------------------------------------------------------------
# Deterministic parameter construction + smoke test
# ----------------------------------------------------------------------------
def make_params(key, in_planes, planes):
    expansion = 4
    ks = jax.random.split(key, 9)
    f32 = jnp.float32
    return {
        "w1": jax.random.normal(ks[0], (in_planes, planes), f32) / jnp.sqrt(in_planes),
        "w2": jax.random.normal(ks[1], (3, 3, 3, planes, planes), f32) / jnp.sqrt(27.0 * planes),
        "w3": jax.random.normal(ks[2], (planes, planes * expansion), f32) / jnp.sqrt(planes),
        "g1": 1.0 + 0.1 * jax.random.normal(ks[3], (1, planes), f32),
        "b1": 0.1 * jax.random.normal(ks[4], (1, planes), f32),
        "g2": 1.0 + 0.1 * jax.random.normal(ks[5], (1, planes), f32),
        "b2": 0.1 * jax.random.normal(ks[6], (1, planes), f32),
        "g3": 1.0 + 0.1 * jax.random.normal(ks[7], (1, planes * expansion), f32),
        "b3": 0.1 * jax.random.normal(ks[8], (1, planes * expansion), f32),
    }


if __name__ == "__main__":
    # batch=2, in_planes=16, planes=4 (expansion 4 -> out=16), spatial D=H=W=8.
    N, in_planes, planes, D, H, W = 2, 16, 4, 8, 8, 8

    key = jax.random.PRNGKey(0)
    kx, kp = jax.random.split(key)
    x = jax.random.normal(kx, (N, in_planes, D, H, W), jnp.float32)   # NCDHW
    params = make_params(kp, in_planes, planes)

    fwd = jax.jit(bottleneck_forward)
    out = jax.block_until_ready(fwd(x, params))
    ref = jax.block_until_ready(bottleneck_ref(x, params))

    assert out.shape == (N, planes * 4, D, H, W), out.shape
    err_max = float(jnp.max(jnp.abs(out - ref)))
    err_rel = float(jnp.linalg.norm(out - ref) / jnp.linalg.norm(ref))
    # Tolerances sized for bf16 MXU inputs AND bf16 storage of the y1/y2/y3
    # intermediates vs an f32-HIGHEST reference (3 conv+BN layers).
    assert err_max < 8e-2 and err_rel < 2e-2, (err_max, err_rel)

    print("KERNEL_OK")
</pallas_src>

<mosaic_0001>
module attributes {stable_mosaic.version = 11 : i64} {
  func.func @_conv1_stats_kernel(%arg0: i32, %arg1: i32, %arg2: memref<1x16x512xf32, #tpu.memory_space<vmem>>, %arg3: memref<4x16xbf16, #tpu.memory_space<vmem>>, %arg4: memref<1x4x512xbf16, #tpu.memory_space<vmem>>, %arg5: memref<1x1x4x2xf32, #tpu.memory_space<vmem>>) attributes {dimension_semantics = [#tpu.dimension_semantics<parallel>, #tpu.dimension_semantics<parallel>], iteration_bounds = array<i64: 2, 1>, scalar_prefetch = 0 : i64, scratch_operands = 0 : i64, tpu.core_type = #tpu.core_type<tc>, window_params = [{transform_indices = @transform_0, window_bounds = array<i64: 1, 16, 512>}, {pipeline_mode = #tpu.pipeline_mode<synchronous>, transform_indices = @transform_1, window_bounds = array<i64: 4, 16>}, {transform_indices = @transform_2, window_bounds = array<i64: 1, 4, 512>}, {transform_indices = @transform_3, window_bounds = array<i64: 1, 1, 4, 2>}]} {
    %c0 = arith.constant 0 : index
    %c0_0 = arith.constant 0 : index
    %c0_1 = arith.constant 0 : index
    %0 = vector.load %arg2[%c0, %c0_0, %c0_1] : memref<1x16x512xf32, #tpu.memory_space<vmem>>, vector<1x16x512xf32>
    %1 = vector.shape_cast %0 : vector<1x16x512xf32> to vector<16x512xf32>
    %2 = arith.truncf %1 : vector<16x512xf32> to vector<16x512xbf16>
    %c0_2 = arith.constant 0 : index
    %c0_3 = arith.constant 0 : index
    %3 = vector.load %arg3[%c0_2, %c0_3] : memref<4x16xbf16, #tpu.memory_space<vmem>>, vector<4x16xbf16>
    %cst = arith.constant dense<0.000000e+00> : vector<4x512xf32>
    %4 = tpu.matmul %3, %2, %cst {dimension_numbers = #tpu.dot_dimension_numbers<[1], [0], [0], [1], [0, 0, 1, 1], [], []>} : vector<4x16xbf16>, vector<16x512xbf16>, vector<4x512xf32> -> vector<4x512xf32>
    %5 = arith.truncf %4 : vector<4x512xf32> to vector<4x512xbf16>
    %c0_4 = arith.constant 0 : index
    %c0_5 = arith.constant 0 : index
    %c0_6 = arith.constant 0 : index
    %6 = vector.load %arg4[%c0_4, %c0_5, %c0_6] : memref<1x4x512xbf16, #tpu.memory_space<vmem>>, vector<1x4x512xbf16>
    %7 = vector.shape_cast %6 : vector<1x4x512xbf16> to vector<4x512xbf16>
    %8 = vector.shape_cast %5 : vector<4x512xbf16> to vector<1x4x512xbf16>
    tpu.vector_store %arg4[%c0_4, %c0_5, %c0_6], %8 {strides = array<i32>} : memref<1x4x512xbf16, #tpu.memory_space<vmem>>, vector<1x4x512xbf16>,
    %cst_7 = arith.constant dense<0.000000e+00> : vector<4xf32>
    %9 = vector.multi_reduction <add>, %4, %cst_7 [1] : vector<4x512xf32> to vector<4xf32>
    %10 = vector.shape_cast %9 : vector<4xf32> to vector<4x1xf32>
    %11 = arith.mulf %4, %4 : vector<4x512xf32>
    %cst_8 = arith.constant dense<0.000000e+00> : vector<4xf32>
    %12 = vector.multi_reduction <add>, %11, %cst_8 [1] : vector<4x512xf32> to vector<4xf32>
    %13 = vector.shape_cast %12 : vector<4xf32> to vector<4x1xf32>
    %14 = tpu.concatenate %10, %13 in 1 : vector<4x1xf32>, vector<4x1xf32> -> vector<4x2xf32>
    %c0_9 = arith.constant 0 : index
    %c0_10 = arith.constant 0 : index
    %c0_11 = arith.constant 0 : index
    %c0_12 = arith.constant 0 : index
    %15 = vector.load %arg5[%c0_9, %c0_10, %c0_11, %c0_12] : memref<1x1x4x2xf32, #tpu.memory_space<vmem>>, vector<1x1x4x2xf32>
    %16 = vector.shape_cast %15 : vector<1x1x4x2xf32> to vector<4x2xf32>
    %17 = vector.shape_cast %14 : vector<4x2xf32> to vector<1x1x4x2xf32>
    tpu.vector_store %arg5[%c0_9, %c0_10, %c0_11, %c0_12], %17 {strides = array<i32>} : memref<1x1x4x2xf32, #tpu.memory_space<vmem>>, vector<1x1x4x2xf32>,
    return
  }
  func.func @transform_0(%arg0: i32, %arg1: i32) -> (i32, i32, i32) {
    %c0_i32 = arith.constant 0 : i32
    %c0_i32_0 = arith.constant 0 : i32
    return %arg0, %c0_i32, %arg1 : i32, i32, i32
  }
  func.func @transform_1(%arg0: i32, %arg1: i32) -> (i32, i32) {
    %c0_i32 = arith.constant 0 : i32
    %c0_i32_0 = arith.constant 0 : i32
    %c0_i32_1 = arith.constant 0 : i32
    return %c0_i32, %c0_i32_0 : i32, i32
  }
  func.func @transform_2(%arg0: i32, %arg1: i32) -> (i32, i32, i32) {
    %c0_i32 = arith.constant 0 : i32
    %c0_i32_0 = arith.constant 0 : i32
    return %arg0, %c0_i32, %arg1 : i32, i32, i32
  }
  func.func @transform_3(%arg0: i32, %arg1: i32) -> (i32, i32, i32, i32) {
    %c0_i32 = arith.constant 0 : i32
    %c0_i32_0 = arith.constant 0 : i32
    %c0_i32_1 = arith.constant 0 : i32
    return %arg0, %arg1, %c0_i32, %c0_i32_0 : i32, i32, i32, i32
  }
}

module attributes {stable_mosaic.version = 11 : i64} {
  func.func @kernel(%arg0: i32, %arg1: memref<1x4x512xbf16, #tpu.memory_space<vmem>>, %arg2: memref<4x1xf32, #tpu.memory_space<vmem>>, %arg3: memref<4x1xf32, #tpu.memory_space<vmem>>, %arg4: memref<4x108xbf16, #tpu.memory_space<vmem>>, %arg5: memref<27x512xf32, #tpu.memory_space<vmem>>, %arg6: memref<1x4x512xbf16, #tpu.memory_space<vmem>>, %arg7: memref<1x4x2xf32, #tpu.memory_space<vmem>>) attributes {dimension_semantics = [#tpu.dimension_semantics<parallel>], iteration_bounds = array<i64: 2>, scalar_prefetch = 0 : i64, scratch_operands = 0 : i64, tpu.core_type = #tpu.core_type<tc>, window_params = [{transform_indices = @transform_0, window_bounds = array<i64: 1, 4, 512>}, {pipeline_mode = #tpu.pipeline_mode<synchronous>, transform_indices = @transform_1, window_bounds = array<i64: 4, 1>}, {pipeline_mode = #tpu.pipeline_mode<synchronous>, transform_indices = @transform_2, window_bounds = array<i64: 4, 1>}, {pipeline_mode = #tpu.pipeline_mode<synchronous>, transform_indices = @transform_3, window_bounds = array<i64: 4, 108>}, {pipeline_mode = #tpu.pipeline_mode<synchronous>, transform_indices = @transform_4, window_bounds = array<i64: 27, 512>}, {transform_indices = @transform_5, window_bounds = array<i64: 1, 4, 512>}, {transform_indices = @transform_6, window_bounds = array<i64: 1, 4, 2>}]} {
    %c0 = arith.constant 0 : index
    %c0_0 = arith.constant 0 : index
    %c0_1 = arith.constant 0 : index
    %0 = vector.load %arg1[%c0, %c0_0, %c0_1] : memref<1x4x512xbf16, #tpu.memory_space<vmem>>, vector<1x4x512xbf16>
    %1 = vector.shape_cast %0 : vector<1x4x512xbf16> to vector<4x512xbf16>
    %2 = arith.extf %1 : vector<4x512xbf16> to vector<4x512xf32>
    %c0_2 = arith.constant 0 : index
    %c0_3 = arith.constant 0 : index
    %3 = vector.load %arg2[%c0_2, %c0_3] : memref<4x1xf32, #tpu.memory_space<vmem>>, vector<4x1xf32>
    %4 = vector.broadcast %3 : vector<4x1xf32> to vector<4x512xf32>
    %5 = arith.mulf %2, %4 : vector<4x512xf32>
    %c0_4 = arith.constant 0 : index
    %c0_5 = arith.constant 0 : index
    %6 = vector.load %arg3[%c0_4, %c0_5] : memref<4x1xf32, #tpu.memory_space<vmem>>, vector<4x1xf32>
    %7 = vector.broadcast %6 : vector<4x1xf32> to vector<4x512xf32>
    %8 = arith.addf %5, %7 : vector<4x512xf32>
    %cst = arith.constant 0.000000e+00 : f32
    %9 = vector.broadcast %cst : f32 to vector<4x512xf32>
    %10 = arith.maximumf %8, %9 : vector<4x512xf32>
    %cst_6 = arith.constant 0.000000e+00 : f32
    %11 = vector.broadcast %cst_6 : f32 to vector<4x128xf32>
    %12 = tpu.concatenate %11, %10, %11 in 1 : vector<4x128xf32>, vector<4x512xf32>, vector<4x128xf32> -> vector<4x768xf32>
    %13 = vector.extract_strided_slice %12 {offsets = [0, 55], sizes = [4, 512], strides = [1, 1]} : vector<4x768xf32> to vector<4x512xf32>
    %c0_7 = arith.constant 0 : index
    %c0_8 = arith.constant 0 : index
    %14 = vector.load %arg5[%c0_7, %c0_8] : memref<27x512xf32, #tpu.memory_space<vmem>>, vector<1x512xf32>
    %15 = vector.broadcast %14 : vector<1x512xf32> to vector<4x512xf32>
    %16 = arith.mulf %13, %15 : vector<4x512xf32>
    %17 = vector.extract_strided_slice %12 {offsets = [0, 56], sizes = [4, 512], strides = [1, 1]} : vector<4x768xf32> to vector<4x512xf32>
    %c1 = arith.constant 1 : index
    %c0_9 = arith.constant 0 : index
    %18 = vector.load %arg5[%c1, %c0_9] : memref<27x512xf32, #tpu.memory_space<vmem>>, vector<1x512xf32>
    %19 = vector.broadcast %18 : vector<1x512xf32> to vector<4x512xf32>
    %20 = arith.mulf %17, %19 : vector<4x512xf32>
    %21 = vector.extract_strided_slice %12 {offsets = [0, 57], sizes = [4, 512], strides = [1, 1]} : vector<4x768xf32> to vector<4x512xf32>
    %c2 = arith.constant 2 : index
    %c0_10 = arith.constant 0 : index
    %22 = vector.load %arg5[%c2, %c0_10] : memref<27x512xf32, #tpu.memory_space<vmem>>, vector<1x512xf32>
    %23 = vector.broadcast %22 : vector<1x512xf32> to vector<4x512xf32>
    %24 = arith.mulf %21, %23 : vector<4x512xf32>
    %25 = vector.extract_strided_slice %12 {offsets = [0, 63], sizes = [4, 512], strides = [1, 1]} : vector<4x768xf32> to vector<4x512xf32>
    %c3 = arith.constant 3 : index
    %c0_11 = arith.constant 0 : index
    %26 = vector.load %arg5[%c3, %c0_11] : memref<27x512xf32, #tpu.memory_space<vmem>>, vector<1x512xf32>
    %27 = vector.broadcast %26 : vector<1x512xf32> to vector<4x512xf32>
    %28 = arith.mulf %25, %27 : vector<4x512xf32>
    %29 = vector.extract_strided_slice %12 {offsets = [0, 64], sizes = [4, 512], strides = [1, 1]} : vector<4x768xf32> to vector<4x512xf32>
    %c4 = arith.constant 4 : index
    %c0_12 = arith.constant 0 : index
    %30 = vector.load %arg5[%c4, %c0_12] : memref<27x512xf32, #tpu.memory_space<vmem>>, vector<1x512xf32>
    %31 = vector.broadcast %30 : vector<1x512xf32> to vector<4x512xf32>
    %32 = arith.mulf %29, %31 : vector<4x512xf32>
    %33 = vector.extract_strided_slice %12 {offsets = [0, 65], sizes = [4, 512], strides = [1, 1]} : vector<4x768xf32> to vector<4x512xf32>
    %c5 = arith.constant 5 : index
    %c0_13 = arith.constant 0 : index
    %34 = vector.load %arg5[%c5, %c0_13] : memref<27x512xf32, #tpu.memory_space<vmem>>, vector<1x512xf32>
    %35 = vector.broadcast %34 : vector<1x512xf32> to vector<4x512xf32>
    %36 = arith.mulf %33, %35 : vector<4x512xf32>
    %37 = vector.extract_strided_slice %12 {offsets = [0, 71], sizes = [4, 512], strides = [1, 1]} : vector<4x768xf32> to vector<4x512xf32>
    %c6 = arith.constant 6 : index
    %c0_14 = arith.constant 0 : index
    %38 = vector.load %arg5[%c6, %c0_14] : memref<27x512xf32, #tpu.memory_space<vmem>>, vector<1x512xf32>
    %39 = vector.broadcast %38 : vector<1x512xf32> to vector<4x512xf32>
    %40 = arith.mulf %37, %39 : vector<4x512xf32>
    %41 = vector.extract_strided_slice %12 {offsets = [0, 72], sizes = [4, 512], strides = [1, 1]} : vector<4x768xf32> to vector<4x512xf32>
    %c7 = arith.constant 7 : index
    %c0_15 = arith.constant 0 : index
    %42 = vector.load %arg5[%c7, %c0_15] : memref<27x512xf32, #tpu.memory_space<vmem>>, vector<1x512xf32>
    %43 = vector.broadcast %42 : vector<1x512xf32> to vector<4x512xf32>
    %44 = arith.mulf %41, %43 : vector<4x512xf32>
    %45 = vector.extract_strided_slice %12 {offsets = [0, 73], sizes = [4, 512], strides = [1, 1]} : vector<4x768xf32> to vector<4x512xf32>
    %c8 = arith.constant 8 : index
    %c0_16 = arith.constant 0 : index
    %46 = vector.load %arg5[%c8, %c0_16] : memref<27x512xf32, #tpu.memory_space<vmem>>, vector<1x512xf32>
    %47 = vector.broadcast %46 : vector<1x512xf32> to vector<4x512xf32>
    %48 = arith.mulf %45, %47 : vector<4x512xf32>
    %49 = vector.extract_strided_slice %12 {offsets = [0, 119], sizes = [4, 512], strides = [1, 1]} : vector<4x768xf32> to vector<4x512xf32>
    %c9 = arith.constant 9 : index
    %c0_17 = arith.constant 0 : index
    %50 = vector.load %arg5[%c9, %c0_17] : memref<27x512xf32, #tpu.memory_space<vmem>>, vector<1x512xf32>
    %51 = vector.broadcast %50 : vector<1x512xf32> to vector<4x512xf32>
    %52 = arith.mulf %49, %51 : vector<4x512xf32>
    %53 = vector.extract_strided_slice %12 {offsets = [0, 120], sizes = [4, 512], strides = [1, 1]} : vector<4x768xf32> to vector<4x512xf32>
    %c10 = arith.constant 10 : index
    %c0_18 = arith.constant 0 : index
    %54 = vector.load %arg5[%c10, %c0_18] : memref<27x512xf32, #tpu.memory_space<vmem>>, vector<1x512xf32>
    %55 = vector.broadcast %54 : vector<1x512xf32> to vector<4x512xf32>
    %56 = arith.mulf %53, %55 : vector<4x512xf32>
    %57 = vector.extract_strided_slice %12 {offsets = [0, 121], sizes = [4, 512], strides = [1, 1]} : vector<4x768xf32> to vector<4x512xf32>
    %c11 = arith.constant 11 : index
    %c0_19 = arith.constant 0 : index
    %58 = vector.load %arg5[%c11, %c0_19] : memref<27x512xf32, #tpu.memory_space<vmem>>, vector<1x512xf32>
    %59 = vector.broadcast %58 : vector<1x512xf32> to vector<4x512xf32>
    %60 = arith.mulf %57, %59 : vector<4x512xf32>
    %61 = vector.extract_strided_slice %12 {offsets = [0, 127], sizes = [4, 512], strides = [1, 1]} : vector<4x768xf32> to vector<4x512xf32>
    %c12 = arith.constant 12 : index
    %c0_20 = arith.constant 0 : index
    %62 = vector.load %arg5[%c12, %c0_20] : memref<27x512xf32, #tpu.memory_space<vmem>>, vector<1x512xf32>
    %63 = vector.broadcast %62 : vector<1x512xf32> to vector<4x512xf32>
    %64 = arith.mulf %61, %63 : vector<4x512xf32>
    %65 = vector.extract_strided_slice %12 {offsets = [0, 128], sizes = [4, 512], strides = [1, 1]} : vector<4x768xf32> to vector<4x512xf32>
    %c13 = arith.constant 13 : index
    %c0_21 = arith.constant 0 : index
    %66 = vector.load %arg5[%c13, %c0_21] : memref<27x512xf32, #tpu.memory_space<vmem>>, vector<1x512xf32>
    %67 = vector.broadcast %66 : vector<1x512xf32> to vector<4x512xf32>
    %68 = arith.mulf %65, %67 : vector<4x512xf32>
    %69 = vector.extract_strided_slice %12 {offsets = [0, 129], sizes = [4, 512], strides = [1, 1]} : vector<4x768xf32> to vector<4x512xf32>
    %c14 = arith.constant 14 : index
    %c0_22 = arith.constant 0 : index
    %70 = vector.load %arg5[%c14, %c0_22] : memref<27x512xf32, #tpu.memory_space<vmem>>, vector<1x512xf32>
    %71 = vector.broadcast %70 : vector<1x512xf32> to vector<4x512xf32>
    %72 = arith.mulf %69, %71 : vector<4x512xf32>
    %73 = vector.extract_strided_slice %12 {offsets = [0, 135], sizes = [4, 512], strides = [1, 1]} : vector<4x768xf32> to vector<4x512xf32>
    %c15 = arith.constant 15 : index
    %c0_23 = arith.constant 0 : index
    %74 = vector.load %arg5[%c15, %c0_23] : memref<27x512xf32, #tpu.memory_space<vmem>>, vector<1x512xf32>
    %75 = vector.broadcast %74 : vector<1x512xf32> to vector<4x512xf32>
    %76 = arith.mulf %73, %75 : vector<4x512xf32>
    %77 = vector.extract_strided_slice %12 {offsets = [0, 136], sizes = [4, 512], strides = [1, 1]} : vector<4x768xf32> to vector<4x512xf32>
    %c16 = arith.constant 16 : index
    %c0_24 = arith.constant 0 : index
    %78 = vector.load %arg5[%c16, %c0_24] : memref<27x512xf32, #tpu.memory_space<vmem>>, vector<1x512xf32>
    %79 = vector.broadcast %78 : vector<1x512xf32> to vector<4x512xf32>
    %80 = arith.mulf %77, %79 : vector<4x512xf32>
    %81 = vector.extract_strided_slice %12 {offsets = [0, 137], sizes = [4, 512], strides = [1, 1]} : vector<4x768xf32> to vector<4x512xf32>
    %c17 = arith.constant 17 : index
    %c0_25 = arith.constant 0 : index
    %82 = vector.load %arg5[%c17, %c0_25] : memref<27x512xf32, #tpu.memory_space<vmem>>, vector<1x512xf32>
    %83 = vector.broadcast %82 : vector<1x512xf32> to vector<4x512xf32>
    %84 = arith.mulf %81, %83 : vector<4x512xf32>
    %85 = vector.extract_strided_slice %12 {offsets = [0, 183], sizes = [4, 512], strides = [1, 1]} : vector<4x768xf32> to vector<4x512xf32>
    %c18 = arith.constant 18 : index
    %c0_26 = arith.constant 0 : index
    %86 = vector.load %arg5[%c18, %c0_26] : memref<27x512xf32, #tpu.memory_space<vmem>>, vector<1x512xf32>
    %87 = vector.broadcast %86 : vector<1x512xf32> to vector<4x512xf32>
    %88 = arith.mulf %85, %87 : vector<4x512xf32>
    %89 = vector.extract_strided_slice %12 {offsets = [0, 184], sizes = [4, 512], strides = [1, 1]} : vector<4x768xf32> to vector<4x512xf32>
    %c19 = arith.constant 19 : index
    %c0_27 = arith.constant 0 : index
    %90 = vector.load %arg5[%c19, %c0_27] : memref<27x512xf32, #tpu.memory_space<vmem>>, vector<1x512xf32>
    %91 = vector.broadcast %90 : vector<1x512xf32> to vector<4x512xf32>
    %92 = arith.mulf %89, %91 : vector<4x512xf32>
    %93 = vector.extract_strided_slice %12 {offsets = [0, 185], sizes = [4, 512], strides = [1, 1]} : vector<4x768xf32> to vector<4x512xf32>
    %c20 = arith.constant 20 : index
    %c0_28 = arith.constant 0 : index
    %94 = vector.load %arg5[%c20, %c0_28] : memref<27x512xf32, #tpu.memory_space<vmem>>, vector<1x512xf32>
    %95 = vector.broadcast %94 : vector<1x512xf32> to vector<4x512xf32>
    %96 = arith.mulf %93, %95 : vector<4x512xf32>
    %97 = vector.extract_strided_slice %12 {offsets = [0, 191], sizes = [4, 512], strides = [1, 1]} : vector<4x768xf32> to vector<4x512xf32>
    %c21 = arith.constant 21 : index
    %c0_29 = arith.constant 0 : index
    %98 = vector.load %arg5[%c21, %c0_29] : memref<27x512xf32, #tpu.memory_space<vmem>>, vector<1x512xf32>
    %99 = vector.broadcast %98 : vector<1x512xf32> to vector<4x512xf32>
    %100 = arith.mulf %97, %99 : vector<4x512xf32>
    %101 = vector.extract_strided_slice %12 {offsets = [0, 192], sizes = [4, 512], strides = [1, 1]} : vector<4x768xf32> to vector<4x512xf32>
    %c22 = arith.constant 22 : index
    %c0_30 = arith.constant 0 : index
    %102 = vector.load %arg5[%c22, %c0_30] : memref<27x512xf32, #tpu.memory_space<vmem>>, vector<1x512xf32>
    %103 = vector.broadcast %102 : vector<1x512xf32> to vector<4x512xf32>
    %104 = arith.mulf %101, %103 : vector<4x512xf32>
    %105 = vector.extract_strided_slice %12 {offsets = [0, 193], sizes = [4, 512], strides = [1, 1]} : vector<4x768xf32> to vector<4x512xf32>
    %c23 = arith.constant 23 : index
    %c0_31 = arith.constant 0 : index
    %106 = vector.load %arg5[%c23, %c0_31] : memref<27x512xf32, #tpu.memory_space<vmem>>, vector<1x512xf32>
    %107 = vector.broadcast %106 : vector<1x512xf32> to vector<4x512xf32>
    %108 = arith.mulf %105, %107 : vector<4x512xf32>
    %109 = vector.extract_strided_slice %12 {offsets = [0, 199], sizes = [4, 512], strides = [1, 1]} : vector<4x768xf32> to vector<4x512xf32>
    %c24 = arith.constant 24 : index
    %c0_32 = arith.constant 0 : index
    %110 = vector.load %arg5[%c24, %c0_32] : memref<27x512xf32, #tpu.memory_space<vmem>>, vector<1x512xf32>
    %111 = vector.broadcast %110 : vector<1x512xf32> to vector<4x512xf32>
    %112 = arith.mulf %109, %111 : vector<4x512xf32>
    %113 = vector.extract_strided_slice %12 {offsets = [0, 200], sizes = [4, 512], strides = [1, 1]} : vector<4x768xf32> to vector<4x512xf32>
    %c25 = arith.constant 25 : index
    %c0_33 = arith.constant 0 : index
    %114 = vector.load %arg5[%c25, %c0_33] : memref<27x512xf32, #tpu.memory_space<vmem>>, vector<1x512xf32>
    %115 = vector.broadcast %114 : vector<1x512xf32> to vector<4x512xf32>
    %116 = arith.mulf %113, %115 : vector<4x512xf32>
    %117 = vector.extract_strided_slice %12 {offsets = [0, 201], sizes = [4, 512], strides = [1, 1]} : vector<4x768xf32> to vector<4x512xf32>
    %c26 = arith.constant 26 : index
    %c0_34 = arith.constant 0 : index
    %118 = vector.load %arg5[%c26, %c0_34] : memref<27x512xf32, #tpu.memory_space<vmem>>, vector<1x512xf32>
    %119 = vector.broadcast %118 : vector<1x512xf32> to vector<4x512xf32>
    %120 = arith.mulf %117, %119 : vector<4x512xf32>
    %121 = tpu.concatenate %16, %20, %24, %28, %32, %36, %40, %44, %48, %52, %56, %60, %64, %68, %72, %76 in 0 : vector<4x512xf32>, vector<4x512xf32>, vector<4x512xf32>, vector<4x512xf32>, vector<4x512xf32>, vector<4x512xf32>, vector<4x512xf32>, vector<4x512xf32>, vector<4x512xf32>, vector<4x512xf32>, vector<4x512xf32>, vector<4x512xf32>, vector<4x512xf32>, vector<4x512xf32>, vector<4x512xf32>, vector<4x512xf32> -> vector<64x512xf32>
    %122 = tpu.concatenate %80, %84, %88, %92, %96, %100, %104, %108, %112, %116, %120 in 0 : vector<4x512xf32>, vector<4x512xf32>, vector<4x512xf32>, vector<4x512xf32>, vector<4x512xf32>, vector<4x512xf32>, vector<4x512xf32>, vector<4x512xf32>, vector<4x512xf32>, vector<4x512xf32>, vector<4x512xf32> -> vector<44x512xf32>
    %123 = tpu.concatenate %121, %122 in 0 : vector<64x512xf32>, vector<44x512xf32> -> vector<108x512xf32>
    %124 = arith.truncf %123 : vector<108x512xf32> to vector<108x512xbf16>
    %c0_35 = arith.constant 0 : index
    %c0_36 = arith.constant 0 : index
    %125 = vector.load %arg4[%c0_35, %c0_36] : memref<4x108xbf16, #tpu.memory_space<vmem>>, vector<4x108xbf16>
    %cst_37 = arith.constant dense<0.000000e+00> : vector<4x512xf32>
    %126 = tpu.matmul %125, %124, %cst_37 {dimension_numbers = #tpu.dot_dimension_numbers<[1], [0], [0], [1], [0, 0, 1, 1], [], []>} : vector<4x108xbf16>, vector<108x512xbf16>, vector<4x512xf32> -> vector<4x512xf32>
    %127 = arith.truncf %126 : vector<4x512xf32> to vector<4x512xbf16>
    %c0_38 = arith.constant 0 : index
    %c0_39 = arith.constant 0 : index
    %c0_40 = arith.constant 0 : index
    %128 = vector.load %arg6[%c0_38, %c0_39, %c0_40] : memref<1x4x512xbf16, #tpu.memory_space<vmem>>, vector<1x4x512xbf16>
    %129 = vector.shape_cast %128 : vector<1x4x512xbf16> to vector<4x512xbf16>
    %130 = vector.shape_cast %127 : vector<4x512xbf16> to vector<1x4x512xbf16>
    tpu.vector_store %arg6[%c0_38, %c0_39, %c0_40], %130 {strides = array<i32>} : memref<1x4x512xbf16, #tpu.memory_space<vmem>>, vector<1x4x512xbf16>,
    %cst_41 = arith.constant dense<0.000000e+00> : vector<4xf32>
    %131 = vector.multi_reduction <add>, %126, %cst_41 [1] : vector<4x512xf32> to vector<4xf32>
    %132 = vector.shape_cast %131 : vector<4xf32> to vector<4x1xf32>
    %133 = arith.mulf %126, %126 : vector<4x512xf32>
    %cst_42 = arith.constant dense<0.000000e+00> : vector<4xf32>
    %134 = vector.multi_reduction <add>, %133, %cst_42 [1] : vector<4x512xf32> to vector<4xf32>
    %135 = vector.shape_cast %134 : vector<4xf32> to vector<4x1xf32>
    %136 = tpu.concatenate %132, %135 in 1 : vector<4x1xf32>, vector<4x1xf32> -> vector<4x2xf32>
    %c0_43 = arith.constant 0 : index
    %c0_44 = arith.constant 0 : index
    %c0_45 = arith.constant 0 : index
    %137 = vector.load %arg7[%c0_43, %c0_44, %c0_45] : memref<1x4x2xf32, #tpu.memory_space<vmem>>, vector<1x4x2xf32>
    %138 = vector.shape_cast %137 : vector<1x4x2xf32> to vector<4x2xf32>
    %139 = vector.shape_cast %136 : vector<4x2xf32> to vector<1x4x2xf32>
    tpu.vector_store %arg7[%c0_43, %c0_44, %c0_45], %139 {strides = array<i32>} : memref<1x4x2xf32, #tpu.memory_space<vmem>>, vector<1x4x2xf32>,
    return
  }
  func.func @transform_0(%arg0: i32) -> (i32, i32, i32) {
    %c0_i32 = arith.constant 0 : i32
    %c0_i32_0 = arith.constant 0 : i32
    %c0_i32_1 = arith.constant 0 : i32
    return %arg0, %c0_i32, %c0_i32_0 : i32, i32, i32
  }
  func.func @transform_1(%arg0: i32) -> (i32, i32) {
    %c0_i32 = arith.constant 0 : i32
    %c0_i32_0 = arith.constant 0 : i32
    %c0_i32_1 = arith.constant 0 : i32
    return %c0_i32, %c0_i32_0 : i32, i32
  }
  func.func @transform_2(%arg0: i32) -> (i32, i32) {
    %c0_i32 = arith.constant 0 : i32
    %c0_i32_0 = arith.constant 0 : i32
    %c0_i32_1 = arith.constant 0 : i32
    return %c0_i32, %c0_i32_0 : i32, i32
  }
  func.func @transform_3(%arg0: i32) -> (i32, i32) {
    %c0_i32 = arith.constant 0 : i32
    %c0_i32_0 = arith.constant 0 : i32
    %c0_i32_1 = arith.constant 0 : i32
    return %c0_i32, %c0_i32_0 : i32, i32
  }
  func.func @transform_4(%arg0: i32) -> (i32, i32) {
    %c0_i32 = arith.constant 0 : i32
    %c0_i32_0 = arith.constant 0 : i32
    %c0_i32_1 = arith.constant 0 : i32
    return %c0_i32, %c0_i32_0 : i32, i32
  }
  func.func @transform_5(%arg0: i32) -> (i32, i32, i32) {
    %c0_i32 = arith.constant 0 : i32
    %c0_i32_0 = arith.constant 0 : i32
    %c0_i32_1 = arith.constant 0 : i32
    return %arg0, %c0_i32, %c0_i32_0 : i32, i32, i32
  }
  func.func @transform_6(%arg0: i32) -> (i32, i32, i32) {
    %c0_i32 = arith.constant 0 : i32
    %c0_i32_0 = arith.constant 0 : i32
    %c0_i32_1 = arith.constant 0 : i32
    return %arg0, %c0_i32, %c0_i32_0 : i32, i32, i32
  }
}

module attributes {stable_mosaic.version = 11 : i64} {
  func.func @_conv3_stats_kernel(%arg0: i32, %arg1: i32, %arg2: memref<1x4x512xbf16, #tpu.memory_space<vmem>>, %arg3: memref<4x1xf32, #tpu.memory_space<vmem>>, %arg4: memref<4x1xf32, #tpu.memory_space<vmem>>, %arg5: memref<16x4xbf16, #tpu.memory_space<vmem>>, %arg6: memref<1x16x512xbf16, #tpu.memory_space<vmem>>, %arg7: memref<1x1x16x2xf32, #tpu.memory_space<vmem>>) attributes {dimension_semantics = [#tpu.dimension_semantics<parallel>, #tpu.dimension_semantics<parallel>], iteration_bounds = array<i64: 2, 1>, scalar_prefetch = 0 : i64, scratch_operands = 0 : i64, tpu.core_type = #tpu.core_type<tc>, window_params = [{transform_indices = @transform_0, window_bounds = array<i64: 1, 4, 512>}, {pipeline_mode = #tpu.pipeline_mode<synchronous>, transform_indices = @transform_1, window_bounds = array<i64: 4, 1>}, {pipeline_mode = #tpu.pipeline_mode<synchronous>, transform_indices = @transform_2, window_bounds = array<i64: 4, 1>}, {pipeline_mode = #tpu.pipeline_mode<synchronous>, transform_indices = @transform_3, window_bounds = array<i64: 16, 4>}, {transform_indices = @transform_4, window_bounds = array<i64: 1, 16, 512>}, {transform_indices = @transform_5, window_bounds = array<i64: 1, 1, 16, 2>}]} {
    %c0 = arith.constant 0 : index
    %c0_0 = arith.constant 0 : index
    %c0_1 = arith.constant 0 : index
    %0 = vector.load %arg2[%c0, %c0_0, %c0_1] : memref<1x4x512xbf16, #tpu.memory_space<vmem>>, vector<1x4x512xbf16>
    %1 = vector.shape_cast %0 : vector<1x4x512xbf16> to vector<4x512xbf16>
    %2 = arith.extf %1 : vector<4x512xbf16> to vector<4x512xf32>
    %c0_2 = arith.constant 0 : index
    %c0_3 = arith.constant 0 : index
    %3 = vector.load %arg3[%c0_2, %c0_3] : memref<4x1xf32, #tpu.memory_space<vmem>>, vector<4x1xf32>
    %4 = vector.broadcast %3 : vector<4x1xf32> to vector<4x512xf32>
    %5 = arith.mulf %2, %4 : vector<4x512xf32>
    %c0_4 = arith.constant 0 : index
    %c0_5 = arith.constant 0 : index
    %6 = vector.load %arg4[%c0_4, %c0_5] : memref<4x1xf32, #tpu.memory_space<vmem>>, vector<4x1xf32>
    %7 = vector.broadcast %6 : vector<4x1xf32> to vector<4x512xf32>
    %8 = arith.addf %5, %7 : vector<4x512xf32>
    %cst = arith.constant 0.000000e+00 : f32
    %9 = vector.broadcast %cst : f32 to vector<4x512xf32>
    %10 = arith.maximumf %8, %9 : vector<4x512xf32>
    %c0_6 = arith.constant 0 : index
    %c0_7 = arith.constant 0 : index
    %11 = vector.load %arg5[%c0_6, %c0_7] : memref<16x4xbf16, #tpu.memory_space<vmem>>, vector<16x4xbf16>
    %12 = arith.truncf %10 : vector<4x512xf32> to vector<4x512xbf16>
    %cst_8 = arith.constant dense<0.000000e+00> : vector<16x512xf32>
    %13 = tpu.matmul %11, %12, %cst_8 {dimension_numbers = #tpu.dot_dimension_numbers<[1], [0], [0], [1], [0, 0, 1, 1], [], []>} : vector<16x4xbf16>, vector<4x512xbf16>, vector<16x512xf32> -> vector<16x512xf32>
    %14 = arith.truncf %13 : vector<16x512xf32> to vector<16x512xbf16>
    %c0_9 = arith.constant 0 : index
    %c0_10 = arith.constant 0 : index
    %c0_11 = arith.constant 0 : index
    %15 = vector.load %arg6[%c0_9, %c0_10, %c0_11] : memref<1x16x512xbf16, #tpu.memory_space<vmem>>, vector<1x16x512xbf16>
    %16 = vector.shape_cast %15 : vector<1x16x512xbf16> to vector<16x512xbf16>
    %17 = vector.shape_cast %14 : vector<16x512xbf16> to vector<1x16x512xbf16>
    tpu.vector_store %arg6[%c0_9, %c0_10, %c0_11], %17 {strides = array<i32>} : memref<1x16x512xbf16, #tpu.memory_space<vmem>>, vector<1x16x512xbf16>,
    %cst_12 = arith.constant dense<0.000000e+00> : vector<16xf32>
    %18 = vector.multi_reduction <add>, %13, %cst_12 [1] : vector<16x512xf32> to vector<16xf32>
    %19 = vector.shape_cast %18 : vector<16xf32> to vector<16x1xf32>
    %20 = arith.mulf %13, %13 : vector<16x512xf32>
    %cst_13 = arith.constant dense<0.000000e+00> : vector<16xf32>
    %21 = vector.multi_reduction <add>, %20, %cst_13 [1] : vector<16x512xf32> to vector<16xf32>
    %22 = vector.shape_cast %21 : vector<16xf32> to vector<16x1xf32>
    %23 = tpu.concatenate %19, %22 in 1 : vector<16x1xf32>, vector<16x1xf32> -> vector<16x2xf32>
    %c0_14 = arith.constant 0 : index
    %c0_15 = arith.constant 0 : index
    %c0_16 = arith.constant 0 : index
    %c0_17 = arith.constant 0 : index
    %24 = vector.load %arg7[%c0_14, %c0_15, %c0_16, %c0_17] : memref<1x1x16x2xf32, #tpu.memory_space<vmem>>, vector<1x1x16x2xf32>
    %25 = vector.shape_cast %24 : vector<1x1x16x2xf32> to vector<16x2xf32>
    %26 = vector.shape_cast %23 : vector<16x2xf32> to vector<1x1x16x2xf32>
    tpu.vector_store %arg7[%c0_14, %c0_15, %c0_16, %c0_17], %26 {strides = array<i32>} : memref<1x1x16x2xf32, #tpu.memory_space<vmem>>, vector<1x1x16x2xf32>,
    return
  }
  func.func @transform_0(%arg0: i32, %arg1: i32) -> (i32, i32, i32) {
    %c0_i32 = arith.constant 0 : i32
    %c0_i32_0 = arith.constant 0 : i32
    return %arg0, %c0_i32, %arg1 : i32, i32, i32
  }
  func.func @transform_1(%arg0: i32, %arg1: i32) -> (i32, i32) {
    %c0_i32 = arith.constant 0 : i32
    %c0_i32_0 = arith.constant 0 : i32
    %c0_i32_1 = arith.constant 0 : i32
    return %c0_i32, %c0_i32_0 : i32, i32
  }
  func.func @transform_2(%arg0: i32, %arg1: i32) -> (i32, i32) {
    %c0_i32 = arith.constant 0 : i32
    %c0_i32_0 = arith.constant 0 : i32
    %c0_i32_1 = arith.constant 0 : i32
    return %c0_i32, %c0_i32_0 : i32, i32
  }
  func.func @transform_3(%arg0: i32, %arg1: i32) -> (i32, i32) {
    %c0_i32 = arith.constant 0 : i32
    %c0_i32_0 = arith.constant 0 : i32
    %c0_i32_1 = arith.constant 0 : i32
    return %c0_i32, %c0_i32_0 : i32, i32
  }
  func.func @transform_4(%arg0: i32, %arg1: i32) -> (i32, i32, i32) {
    %c0_i32 = arith.constant 0 : i32
    %c0_i32_0 = arith.constant 0 : i32
    return %arg0, %c0_i32, %arg1 : i32, i32, i32
  }
  func.func @transform_5(%arg0: i32, %arg1: i32) -> (i32, i32, i32, i32) {
    %c0_i32 = arith.constant 0 : i32
    %c0_i32_0 = arith.constant 0 : i32
    %c0_i32_1 = arith.constant 0 : i32
    return %arg0, %arg1, %c0_i32, %c0_i32_0 : i32, i32, i32, i32
  }
}

module attributes {stable_mosaic.version = 11 : i64} {
  func.func @_bn_add_relu_kernel(%arg0: i32, %arg1: i32, %arg2: memref<1x16x512xbf16, #tpu.memory_space<vmem>>, %arg3: memref<1x16x512xf32, #tpu.memory_space<vmem>>, %arg4: memref<16x1xf32, #tpu.memory_space<vmem>>, %arg5: memref<16x1xf32, #tpu.memory_space<vmem>>, %arg6: memref<1x16x512xf32, #tpu.memory_space<vmem>>) attributes {dimension_semantics = [#tpu.dimension_semantics<parallel>, #tpu.dimension_semantics<parallel>], iteration_bounds = array<i64: 2, 1>, scalar_prefetch = 0 : i64, scratch_operands = 0 : i64, tpu.core_type = #tpu.core_type<tc>, window_params = [{transform_indices = @transform_0, window_bounds = array<i64: 1, 16, 512>}, {transform_indices = @transform_1, window_bounds = array<i64: 1, 16, 512>}, {pipeline_mode = #tpu.pipeline_mode<synchronous>, transform_indices = @transform_2, window_bounds = array<i64: 16, 1>}, {pipeline_mode = #tpu.pipeline_mode<synchronous>, transform_indices = @transform_3, window_bounds = array<i64: 16, 1>}, {transform_indices = @transform_4, window_bounds = array<i64: 1, 16, 512>}]} {
    %c0 = arith.constant 0 : index
    %c0_0 = arith.constant 0 : index
    %c0_1 = arith.constant 0 : index
    %0 = vector.load %arg2[%c0, %c0_0, %c0_1] : memref<1x16x512xbf16, #tpu.memory_space<vmem>>, vector<1x16x512xbf16>
    %1 = vector.shape_cast %0 : vector<1x16x512xbf16> to vector<16x512xbf16>
    %2 = arith.extf %1 : vector<16x512xbf16> to vector<16x512xf32>
    %c0_2 = arith.constant 0 : index
    %c0_3 = arith.constant 0 : index
    %3 = vector.load %arg4[%c0_2, %c0_3] : memref<16x1xf32, #tpu.memory_space<vmem>>, vector<16x1xf32>
    %4 = vector.broadcast %3 : vector<16x1xf32> to vector<16x512xf32>
    %5 = arith.mulf %2, %4 : vector<16x512xf32>
    %c0_4 = arith.constant 0 : index
    %c0_5 = arith.constant 0 : index
    %6 = vector.load %arg5[%c0_4, %c0_5] : memref<16x1xf32, #tpu.memory_space<vmem>>, vector<16x1xf32>
    %7 = vector.broadcast %6 : vector<16x1xf32> to vector<16x512xf32>
    %8 = arith.addf %5, %7 : vector<16x512xf32>
    %c0_6 = arith.constant 0 : index
    %c0_7 = arith.constant 0 : index
    %c0_8 = arith.constant 0 : index
    %9 = vector.load %arg3[%c0_6, %c0_7, %c0_8] : memref<1x16x512xf32, #tpu.memory_space<vmem>>, vector<1x16x512xf32>
    %10 = vector.shape_cast %9 : vector<1x16x512xf32> to vector<16x512xf32>
    %11 = arith.addf %8, %10 : vector<16x512xf32>
    %cst = arith.constant 0.000000e+00 : f32
    %12 = vector.broadcast %cst : f32 to vector<16x512xf32>
    %13 = arith.maximumf %11, %12 : vector<16x512xf32>
    %c0_9 = arith.constant 0 : index
    %c0_10 = arith.constant 0 : index
    %c0_11 = arith.constant 0 : index
    %14 = vector.load %arg6[%c0_9, %c0_10, %c0_11] : memref<1x16x512xf32, #tpu.memory_space<vmem>>, vector<1x16x512xf32>
    %15 = vector.shape_cast %14 : vector<1x16x512xf32> to vector<16x512xf32>
    %16 = vector.shape_cast %13 : vector<16x512xf32> to vector<1x16x512xf32>
    tpu.vector_store %arg6[%c0_9, %c0_10, %c0_11], %16 {strides = array<i32>} : memref<1x16x512xf32, #tpu.memory_space<vmem>>, vector<1x16x512xf32>,
    return
  }
  func.func @transform_0(%arg0: i32, %arg1: i32) -> (i32, i32, i32) {
    %c0_i32 = arith.constant 0 : i32
    %c0_i32_0 = arith.constant 0 : i32
    return %arg0, %c0_i32, %arg1 : i32, i32, i32
  }
  func.func @transform_1(%arg0: i32, %arg1: i32) -> (i32, i32, i32) {
    %c0_i32 = arith.constant 0 : i32
    %c0_i32_0 = arith.constant 0 : i32
    return %arg0, %c0_i32, %arg1 : i32, i32, i32
  }
  func.func @transform_2(%arg0: i32, %arg1: i32) -> (i32, i32) {
    %c0_i32 = arith.constant 0 : i32
    %c0_i32_0 = arith.constant 0 : i32
    %c0_i32_1 = arith.constant 0 : i32
    return %c0_i32, %c0_i32_0 : i32, i32
  }
  func.func @transform_3(%arg0: i32, %arg1: i32) -> (i32, i32) {
    %c0_i32 = arith.constant 0 : i32
    %c0_i32_0 = arith.constant 0 : i32
    %c0_i32_1 = arith.constant 0 : i32
    return %c0_i32, %c0_i32_0 : i32, i32
  }
  func.func @transform_4(%arg0: i32, %arg1: i32) -> (i32, i32, i32) {
    %c0_i32 = arith.constant 0 : i32
    %c0_i32_0 = arith.constant 0 : i32
    return %arg0, %c0_i32, %arg1 : i32, i32, i32
  }
}

</mosaic_0001>

<bundles_post_ra>
// kernel: bottleneck_forward.4
= control target key start
LH: loop header
LB: loop body
LE: loop exit
PB: predicated region body
PF: predicated region fallthrough
CT: control target
= control target key end

     0   :  { %s601_s12 = smov 0   ;;  %s603_s13 = smov 0   ;;  %s653_s0 = inlined_call_operand.vmem [shape: f32[2,16,512], index: 0, kind: input, shape index: {}]   ;;  %s654_s1 = inlined_call_operand.vmem [shape: bf16[4,16], index: 1, kind: input, shape index: {}]   ;;  %s655_s2 = inlined_call_operand.vmem [shape: bf16[2,4,512], index: 2, kind: output, shape index: {0}]   ;;  %s656_s3 = inlined_call_operand.vmem [shape: f32[2,1,4,2], index: 3, kind: output, shape index: {1}]  }
   0x1   :  { %s605_s14 = smov 0  }
   0x2 LB: > { %s26_s15 = sadd.s32 1, %s573_s13  ;;  %p515_p0 = scmp.ge.s32.totalorder %s577_s14, 1  ;;  %s577_s14 = sphi %s605_s14, %s14_s14   ;;  %s573_s13 = sphi %s603_s13, %s658_s13   ;;  %s569_s12 = sphi %s601_s12, %s657_s12  }
   0x3   : > { %p28_p1 = scmp.ge.s32.totalorder %s26_s15, 2  ;;  %p163_p2 = scmp.lt.s32.totalorder %s577_s14, 3 }
   0x5   : > { %s660_s15 = smov (%p28_p1, %s26_s15), 0  ;;  %p164_p3 = pnand %p515_p0, %p163_p2 }
   0x6   : > { %p203_p4 = scmp.lt.s32.totalorder (!%p164_p3), %s569_s12, 1  ;;  %v579_v0 = vmov (!%p164_p3), 0   ;;  %v242_v13 = vld [vmem:[%s654_s1] sm:$0x3] (!%p164_p3)  ;;  %vm243_vm0 = vcmask (!%p164_p3), 130048   ;;  %v342_v16 = vlaneseq (!%p164_p3)  ;;  %vm356_vm1 = vcmask (!%p164_p3), 1043456  }
   0x7   : > { %167 = sbr.rel (%p164_p3) target bundleno = 393 (0x189), region = 28  ;;  %279 = vmatprep.mubr.bf16.mxu0 (!%p164_p3), %v579_v0  ;;  %320 = vmatprep.mubr.bf16.mxu1 (!%p164_p3), %v579_v0  ;;  %v580_v14 = vmov (!%p164_p3), 1983009808   ;;  %vm379_vm2 = vcmask (!%p164_p3), 7168   ;;  %vm381_vm3 = vcmask (!%p164_p3), 11264  }
   0x8   : > { %v340_v15 = vunpack.c.l.s4 (!%p164_p3), %v580_v14  ;;  %v343_v18 = vshrl.u32 (!%p164_p3), %v342_v16, 7 }
   0xa   : > { %v341_v17 = vunpack.c.0.s8 (!%p164_p3), %v340_v15 }
   0xc   : > { %v344_v20 = vsub.s32 (!%p164_p3), %v341_v17, %v343_v18 }
   0xe   : > { %s662_s12 = smov (!%p203_p4, %s569_s12), 1 }
   0xf   : > { %s527_s16 = sshll.u32 %s662_s12, 6  ;;  %s528_s22 = sshll.u32 %s662_s12, 3 }
  0x10   : > { %s210_s19 = scalar_lea.vmem %s653_s0, %s527_s16  ;;  %s220_s25 = scalar_lea.vmem %s655_s2, %s528_s22 }
  0x11   : > { %v231_v1 = vld [vmem:[%s210_s19 + $0x8] sm:$0xff]  ;;  %v233_v3 = vld [vmem:[%s210_s19 + $0x18] sm:$0xff]  ;;  %v230_v6 = vld [vmem:[%s210_s19] sm:$0xff]  ;;  %s520_s26 = sshll.u32 %s662_s12, 2 }
  0x12   : > { %v235_v2 = vld [vmem:[%s210_s19 + $0x28] sm:$0xff]  ;;  %v237_v5 = vld [vmem:[%s210_s19 + $0x38] sm:$0xff]  ;;  %v234_v7 = vld [vmem:[%s210_s19 + $0x20] sm:$0xff]  ;;  %s228_s29 = scalar_lea.vmem %s656_s3, %s520_s26 }
  0x13   : > { %v239_v4 = vpack.c.bf16 %v235_v2, %v231_v1  ;;  %v241_v8 = vpack.c.bf16 %v237_v5, %v233_v3  ;;  %v238_v9 = vpack.c.bf16 %v234_v7, %v230_v6  ;;  %v232_v10 = vld [vmem:[%s210_s19 + $0x10] sm:$0xff] }
  0x14   : > { %v236_v11 = vld [vmem:[%s210_s19 + $0x30] sm:$0xff] }
  0x15   : > { %247 = vmatprep.subr.bf16.mxu0 %v239_v4  ;;  %v240_v12 = vpack.c.bf16 %v236_v11, %v232_v10  ;;  %288 = vmatprep.subr.bf16.mxu1 %v241_v8 }
  0x16   : > { %248 = vmatpush1.bf16.msra.mxu0 %v238_v9 }
  0x17   : > { %289 = vmatpush1.bf16.msra.mxu1 %v240_v12 }
  0x19   : > { %521 = vmatmul.mubr.msk.bf16.vlgmr.msra.gmra.mrb[0].mxu0 %vm243_vm0, %v242_v13 }
  0x1a   : > { %522 = vmatmul.mubr.msk.bf16.vlgmr.msra.gmra.mrb[0].mxu1 %vm243_vm0, %v242_v13 }
  0xec   : > { %v281_v19 = vpop.f32.mrb[0].mxu0 }
  0xed   : > { %v357_v21 = vsel %vm356_vm1, %v281_v19, 0.0  ;;  %v366_v22 = vmul.f32 %v281_v19, %v281_v19  ;;  %v322_v23 = vpop.f32.mrb[0].mxu1  ;;  %v283_v24 = vpop.f32.mrb[1].mxu0 }
  0xee   : > { %v368_v25 = vmul.f32 %v322_v23, %v322_v23  ;;  %v523_v26 = vpack.c.bf16 %v283_v24, %v281_v19  ;;  %v358_v27 = vsel %vm356_vm1, %v283_v24, 0.0  ;;  %v367_v28 = vmul.f32 %v283_v24, %v283_v24  ;;  %v324_v29 = vpop.f32.mrb[1].mxu1  ;;  %v285_v30 = vpop.f32.mrb[2].mxu0 }
  0xef   : > { %v370_v31 = vsel %vm356_vm1, %v366_v22, 0.0  ;;  %v524_v32 = vpack.c.bf16 %v324_v29, %v322_v23  ;;  %v326_v33 = vpop.f32.mrb[2].mxu1  ;;  %v286_v34 = vpop.f32.mrb[3].mxu0  ;;  %v359_v35 = vadd.f32 %v358_v27, %v357_v21  ;;  %v369_v38 = vmul.f32 %v324_v29, %v324_v29 }
  0xf0   : > { %v345_v36 = vrot.slane %v523_v26, %v344_v20  ;;  %v371_v37 = vsel %vm356_vm1, %v367_v28, 0.0  ;;  %v327_v39 = vpop.f32.mrb[3].mxu1  ;;  %v360_v40 = vsel %vm356_vm1, %v322_v23, 0.0  ;;  %v373_v44 = vsel %vm356_vm1, %v368_v25, 0.0 }
  0xf1   : > { %v352_v41 = vrot.slane %v524_v32, %v344_v20  ;;  %v361_v42 = vadd.f32 %v360_v40, %v359_v35  ;;  %v372_v43 = vadd.f32 %v371_v37, %v370_v31  ;;  %v362_v45 = vsel %vm356_vm1, %v324_v29, 0.0 }
  0xf2   : > { %v375_v49 = vsel %vm356_vm1, %v369_v38, 0.0 }
  0xf3   : > { %v353_v46 = vcombine.low %v345_v36, %v352_v41  ;;  %v363_v47 = vadd.f32 %v362_v45, %v361_v42  ;;  %v374_v48 = vadd.f32 %v373_v44, %v372_v43 }
  0xf5   : > { %355 = vst [vmem:[%s220_s25] sm:$0xff] %v353_v46  ;;  %364 = vadd.xlane.f32.xlu0 %v363_v47  ;;  %v376_v50 = vadd.f32 %v375_v49, %v374_v48 }
  0xf9   : > { %377 = vadd.xlane.f32.xlu0 %v376_v50 }
 0x182   : > { %v365_v51 = vpop.xlane.xlu0 %364 }
 0x186   : > { %v378_v52 = vpop.xlane.xlu0 %377 }
 0x187   : > { %v380_v53 = vsel %vm379_vm2, %v365_v51, %v378_v52 }
 0x188   : > { %382 = vst.msk [vmem:[%s228_s29] sm:$0xf] %vm381_vm3, %v380_v53 }
 0x189 PF: > { %s14_s14 = sadd.s32 1, %s577_s14   ;;  %s657_s12 = smov %s573_s13 }
 0x18a   : > { %p11_p5 = scmp.ge.s32.totalorder %s14_s14, 4   ;;  %s658_s13 = smov %s660_s15 }
 0x18c   :  { %13 = sbr.rel (!%p11_p5) target bundleno = 2 (0x2), region = 70 }

// kernel: bottleneck_forward.7
= control target key start
LH: loop header
LB: loop body
LE: loop exit
PB: predicated region body
PF: predicated region fallthrough
CT: control target
= control target key end

     0   :  { %s555_s15 = smov 0   ;;  %s557_s16 = smov 0   ;;  %s631_s0 = inlined_call_operand.vmem [shape: bf16[2,16,512], index: 0, kind: input, shape index: {}]   ;;  %s632_s1 = inlined_call_operand.vmem [shape: f32[2,16,512], index: 1, kind: input, shape index: {}]   ;;  %s633_s2 = inlined_call_operand.vmem [shape: f32[16,1], index: 2, kind: input, shape index: {}]   ;;  %s634_s3 = inlined_call_operand.vmem [shape: f32[16,1], index: 3, kind: input, shape index: {}]   ;;  %s635_s4 = inlined_call_operand.vmem [shape: f32[2,16,512], index: 4, kind: output, shape index: {}]  }
   0x1   :  { %s559_s17 = smov 0  }
   0x2 LB: > { %s26_s18 = sadd.s32 1, %s523_s16  ;;  %p466_p0 = scmp.ge.s32.totalorder %s527_s17, 1  ;;  %s527_s17 = sphi %s559_s17, %s14_s17   ;;  %s523_s16 = sphi %s557_s16, %s637_s16   ;;  %s519_s15 = sphi %s555_s15, %s636_s15  }
   0x3   : > { %p28_p1 = scmp.ge.s32.totalorder %s26_s18, 2  ;;  %p200_p2 = scmp.lt.s32.totalorder %s527_s17, 3 }
   0x5   : > { %s639_s18 = smov (%p28_p1, %s26_s18), 0  ;;  %p201_p3 = pnand %p466_p0, %p200_p2 }
   0x6   : > { %v305_v0 = vld [vmem:[%s634_s3] sm:$0xff] (!%p201_p3)  ;;  %v529_v2 = vmov (!%p201_p3), 0   ;;  %v306_v3 = vld [vmem:[%s634_s3 + $0x8] sm:$0xff] (!%p201_p3)  ;;  %p244_p4 = scmp.lt.s32.totalorder (!%p201_p3), %s519_s15, 1 }
   0x7   : > { %204 = sbr.rel (%p201_p3) target bundleno = 151 (0x97), region = 36  ;;  %v285_v1 = vld [vmem:[%s633_s2] sm:$0xff] (!%p201_p3)  ;;  %504 = vset.pattern.permute.xlu1 (!%p201_p3), %v529_v2  ;;  %503 = vset.pattern.permute.xlu0 (!%p201_p3), %v529_v2  ;;  %v286_v4 = vld [vmem:[%s633_s2 + $0x8] sm:$0xff] (!%p201_p3) }
   0x8   : > { %309 = vperm.xlu1 (!%p201_p3), %504, %v305_v0   ;;  %289 = vperm.xlu0 (!%p201_p3), %503, %v285_v1  }
   0xc   : > { %314 = vperm.xlu1 (!%p201_p3), %504, %v306_v3   ;;  %294 = vperm.xlu0 (!%p201_p3), %503, %v286_v4  }
   0xe   : > { %s641_s15 = smov (!%p244_p4, %s519_s15), 1 }
   0xf   : > { %s475_s27 = sshll.u32 %s641_s15, 5  ;;  %s476_s5 = sshll.u32 %s641_s15, 6 }
  0x10   : > { %s251_s30 = scalar_lea.vmem %s631_s0, %s475_s27  ;;  %s597_s8 = scalar_lea.vmem %s632_s1, %s476_s5 }
  0x11   : > { %v273_v5 = vld [vmem:[%s251_s30] sm:$0xff]  ;;  %v274_v6 = vld [vmem:[%s251_s30 + $0x8] sm:$0xff]  ;;  %v275_v11 = vld [vmem:[%s251_s30 + $0x10] sm:$0xff]  ;;  %s608_s11 = scalar_lea.vmem %s635_s4, %s476_s5 }
  0x12   : > { %v277_v7 = vunpack.c.l.bf16 %v273_v5  ;;  %v278_v8 = vunpack.c.h.bf16 %v273_v5  ;;  %v279_v9 = vunpack.c.l.bf16 %v274_v6  ;;  %v280_v10 = vunpack.c.h.bf16 %v274_v6  ;;  %v276_v12 = vld [vmem:[%s251_s30 + $0x18] sm:$0xff]  ;;  %v325_v19 = vld [vmem:[%s597_s8] sm:$0xff]  ;;  %v326_v20 = vld [vmem:[%s597_s8 + $0x8] sm:$0xff] }
  0x13   : > { %v327_v21 = vld [vmem:[%s597_s8 + $0x10] sm:$0xff]  ;;  %v328_v22 = vld [vmem:[%s597_s8 + $0x18] sm:$0xff]  ;;  %v281_v23 = vunpack.c.l.bf16 %v275_v11  ;;  %v282_v24 = vunpack.c.h.bf16 %v275_v11  ;;  %v283_v25 = vunpack.c.l.bf16 %v276_v12  ;;  %v284_v26 = vunpack.c.h.bf16 %v276_v12  ;;  %v329_v40 = vld [vmem:[%s597_s8 + $0x20] sm:$0xff] }
  0x14   : > { %v330_v41 = vld [vmem:[%s597_s8 + $0x28] sm:$0xff]  ;;  %v331_v47 = vld [vmem:[%s597_s8 + $0x30] sm:$0xff]  ;;  %v332_v48 = vld [vmem:[%s597_s8 + $0x38] sm:$0xff] }
  0x87   : > { %v290_v13 = vpop.permute.xlu0 %289  ;;  %v310_v14 = vpop.permute.xlu1 %309 }
  0x88   : > { %v297_v15 = vmul.f32 %v290_v13, %v277_v7  ;;  %v298_v16 = vmul.f32 %v290_v13, %v278_v8  ;;  %v299_v17 = vmul.f32 %v290_v13, %v279_v9  ;;  %v300_v18 = vmul.f32 %v290_v13, %v280_v10 }
  0x8a   : > { %v317_v27 = vadd.f32 %v310_v14, %v297_v15  ;;  %v318_v28 = vadd.f32 %v310_v14, %v298_v16  ;;  %v319_v29 = vadd.f32 %v310_v14, %v299_v17  ;;  %v320_v30 = vadd.f32 %v310_v14, %v300_v18 }
  0x8b   : > { %v295_v31 = vpop.permute.xlu0 %294  ;;  %v315_v46 = vpop.permute.xlu1 %314 }
  0x8c   : > { %v333_v32 = vadd.f32 %v325_v19, %v317_v27  ;;  %v334_v33 = vadd.f32 %v326_v20, %v318_v28  ;;  %v335_v34 = vadd.f32 %v327_v21, %v319_v29  ;;  %v336_v35 = vadd.f32 %v328_v22, %v320_v30 }
  0x8d   : > { %v301_v36 = vmul.f32 %v295_v31, %v281_v23  ;;  %v302_v37 = vmul.f32 %v295_v31, %v282_v24  ;;  %v303_v38 = vmul.f32 %v295_v31, %v283_v25  ;;  %v304_v39 = vmul.f32 %v295_v31, %v284_v26 }
  0x8e   : > { %v341_v42 = vmax.f32 %v333_v32, 0.0  ;;  %v342_v43 = vmax.f32 %v334_v33, 0.0  ;;  %v343_v44 = vmax.f32 %v335_v34, 0.0  ;;  %v344_v45 = vmax.f32 %v336_v35, 0.0 }
  0x8f   : > { %v321_v49 = vadd.f32 %v315_v46, %v301_v36  ;;  %v322_v50 = vadd.f32 %v315_v46, %v302_v37  ;;  %v323_v51 = vadd.f32 %v315_v46, %v303_v38  ;;  %v324_v52 = vadd.f32 %v315_v46, %v304_v39 }
  0x90   : > { %349 = vst [vmem:[%s608_s11] sm:$0xff] %v341_v42  ;;  %350 = vst [vmem:[%s608_s11 + $0x8] sm:$0xff] %v342_v43 }
  0x91   : > { %351 = vst [vmem:[%s608_s11 + $0x10] sm:$0xff] %v343_v44  ;;  %352 = vst [vmem:[%s608_s11 + $0x18] sm:$0xff] %v344_v45  ;;  %v337_v53 = vadd.f32 %v329_v40, %v321_v49  ;;  %v338_v54 = vadd.f32 %v330_v41, %v322_v50  ;;  %v339_v55 = vadd.f32 %v331_v47, %v323_v51 }
  0x92   : > { %v340_v56 = vadd.f32 %v332_v48, %v324_v52 }
  0x93   : > { %v345_v57 = vmax.f32 %v337_v53, 0.0  ;;  %v346_v58 = vmax.f32 %v338_v54, 0.0  ;;  %v347_v59 = vmax.f32 %v339_v55, 0.0 }
  0x94   : > { %v348_v60 = vmax.f32 %v340_v56, 0.0 }
  0x95   : > { %353 = vst [vmem:[%s608_s11 + $0x20] sm:$0xff] %v345_v57  ;;  %354 = vst [vmem:[%s608_s11 + $0x28] sm:$0xff] %v346_v58 }
  0x96   : > { %355 = vst [vmem:[%s608_s11 + $0x30] sm:$0xff] %v347_v59  ;;  %356 = vst [vmem:[%s608_s11 + $0x38] sm:$0xff] %v348_v60 }
  0x97 PF: > { %s14_s17 = sadd.s32 1, %s527_s17   ;;  %s636_s15 = smov %s523_s16 }
  0x98   : > { %p11_p5 = scmp.ge.s32.totalorder %s14_s17, 4   ;;  %s637_s16 = smov %s639_s18 }
  0x9a   :  { %13 = sbr.rel (!%p11_p5) target bundleno = 2 (0x2), region = 69 }

// kernel: bottleneck_forward.6
= control target key start
LH: loop header
LB: loop body
LE: loop exit
PB: predicated region body
PF: predicated region fallthrough
CT: control target
= control target key end

     0   :  { %s758_s18 = smov 0   ;;  %s760_s19 = smov 0   ;;  %s808_s0 = inlined_call_operand.vmem [shape: bf16[2,4,512], index: 0, kind: input, shape index: {}]   ;;  %s809_s1 = inlined_call_operand.vmem [shape: f32[4,1], index: 1, kind: input, shape index: {}]   ;;  %s810_s2 = inlined_call_operand.vmem [shape: f32[4,1], index: 2, kind: input, shape index: {}]   ;;  %s811_s3 = inlined_call_operand.vmem [shape: bf16[16,4], index: 3, kind: input, shape index: {}]   ;;  %s812_s4 = inlined_call_operand.vmem [shape: bf16[2,16,512], index: 4, kind: output, shape index: {0}]   ;;  %s813_s5 = inlined_call_operand.vmem [shape: f32[2,1,16,2], index: 5, kind: output, shape index: {1}]  }
   0x1   :  { %s762_s20 = smov 0  }
   0x2 LB: > { %s28_s21 = sadd.s32 1, %s720_s19  ;;  %p649_p0 = scmp.ge.s32.totalorder %s724_s20, 1  ;;  %s724_s20 = sphi %s762_s20, %s16_s20   ;;  %s720_s19 = sphi %s760_s19, %s815_s19   ;;  %s716_s18 = sphi %s758_s18, %s814_s18  }
   0x3   : > { %p30_p1 = scmp.ge.s32.totalorder %s28_s21, 2  ;;  %p213_p2 = scmp.lt.s32.totalorder %s724_s20, 3 }
   0x5   : > { %s817_s21 = smov (%p30_p1, %s28_s21), 0  ;;  %p214_p3 = pnand %p649_p0, %p213_p2 }
   0x6   : > { %v291_v0 = vld [vmem:[%s809_s1] sm:$0xf] (!%p214_p3)  ;;  %v726_v1 = vmov (!%p214_p3), 0   ;;  %p259_p4 = scmp.lt.s32.totalorder (!%p214_p3), %s716_s18, 1  ;;  %v727_v3 = vmov (!%p214_p3), 839922192   ;;  %v299_v5 = vlaneseq (!%p214_p3) }
   0x7   : > { %217 = sbr.rel (%p214_p3) target bundleno = 526 (0x20e), region = 36  ;;  %700 = vset.pattern.permute.xlu0 (!%p214_p3), %v726_v1  ;;  %389 = vmatprep.mubr.bf16.mxu0 (!%p214_p3), %v726_v1  ;;  %v306_v2 = vld [vmem:[%s810_s2] sm:$0xf] (!%p214_p3)  ;;  %v297_v4 = vunpack.c.l.s4 (!%p214_p3), %v727_v3  ;;  %vm344_vm0 = vcmask (!%p214_p3), 1041408   ;;  %vm340_vm1 = vcmask (!%p214_p3), 31744   ;;  %vm499_vm2 = vcmask (!%p214_p3), 7168  }
   0x8   : > { %294 = vperm.xlu0 (!%p214_p3), %700, %v291_v0   ;;  %432 = vmatprep.mubr.bf16.mxu1 (!%p214_p3), %v726_v1  ;;  %v300_v7 = vshrl.u32 (!%p214_p3), %v299_v5, 7  ;;  %v701_v30 = vld [vmem:[%s811_s3] sm:$0xff] (!%p214_p3)   ;;  %vm502_vm3 = vcmask (!%p214_p3), 15360  }
   0x9   : > { %v298_v6 = vunpack.c.0.s8 (!%p214_p3), %v297_v4 }
   0xb   : > { %v301_v8 = vsub.s32 (!%p214_p3), %v298_v6, %v300_v7 }
   0xc   : > { %309 = vperm.xlu0 (!%p214_p3), %700, %v306_v2  }
   0xe   : > { %s819_s18 = smov (!%p259_p4, %s716_s18), 1 }
   0xf   : > { %s667_s26 = sshll.u32 %s819_s18, 3  ;;  %s668_s7 = sshll.u32 %s819_s18, 5 }
  0x10   : > { %s266_s29 = scalar_lea.vmem %s808_s0, %s667_s26  ;;  %s276_s10 = scalar_lea.vmem %s812_s4, %s668_s7 }
  0x11   : > { %v288_v9 = vld [vmem:[%s266_s29] sm:$0xff]  ;;  %s669_s11 = sshll.u32 %s819_s18, 4 }
  0x12   : > { %v289_v11 = vunpack.c.l.bf16 %v288_v9  ;;  %v290_v12 = vunpack.c.h.bf16 %v288_v9  ;;  %s286_s14 = scalar_lea.vmem %s813_s5, %s669_s11 }
  0x87   : > { %v295_v10 = vpop.permute.xlu0 %294 }
  0x88   : > { %v302_v13 = vrot.slane %v295_v10, %v301_v8 }
  0x8a   : > { %v304_v15 = vmul.f32 %v302_v13, %v289_v11  ;;  %v305_v16 = vmul.f32 %v302_v13, %v290_v12 }
  0x8b   : > { %v310_v14 = vpop.permute.xlu0 %309 }
  0x8c   : > { %v317_v17 = vrot.slane %v310_v14, %v301_v8 }
  0x8e   : > { %v319_v18 = vadd.f32 %v317_v17, %v304_v15  ;;  %v320_v19 = vadd.f32 %v317_v17, %v305_v16 }
  0x90   : > { %v321_v20 = vmax.f32 %v319_v18, 0.0  ;;  %v322_v21 = vmax.f32 %v320_v19, 0.0 }
  0x92   : > { %v327_v22 = vcombine.high %v321_v20, %v321_v20  ;;  %v328_v23 = vcombine.high %v322_v21, %v322_v21  ;;  %v331_v24 = vpack.c.bf16 %v321_v20, %v321_v20  ;;  %v333_v25 = vpack.c.bf16 %v322_v21, %v322_v21 }
  0x94   : > { %v332_v26 = vpack.c.bf16 %v327_v22, %v327_v22  ;;  %v334_v27 = vpack.c.bf16 %v328_v23, %v328_v23  ;;  %v346_v28 = vsel %vm344_vm0, %v331_v24, 0  ;;  %v352_v29 = vsel %vm344_vm0, %v333_v25, 0 }
  0x96   : > { %657 = vmatprep.subr.msk.bf16.mxu0 %vm344_vm0, %v332_v26  ;;  %659 = vmatprep.subr.msk.bf16.mxu1 %vm344_vm0, %v334_v27 }
  0x97   : > { %358 = vmatpush1.bf16.msra.mxu0 %v346_v28  ;;  %401 = vmatpush1.bf16.msra.mxu1 %v352_v29 }
  0x9a   : > { %658 = vmatmul.mubr.msk.bf16.vlgmr.msra.gmra.mrb[0].mxu0 %vm340_vm1, %v701_v30  ;;  %660 = vmatmul.mubr.msk.bf16.vlgmr.msra.gmra.mrb[0].mxu1 %vm340_vm1, %v701_v30 }
 0x16d   : > { %v391_v31 = vpop.f32.mrb[0].mxu0  ;;  %v434_v32 = vpop.f32.mrb[0].mxu1 }
 0x16e   : > { %v481_v33 = vmul.f32 %v391_v31, %v391_v31  ;;  %v393_v34 = vpop.f32.mrb[1].mxu0  ;;  %v436_v35 = vpop.f32.mrb[1].mxu1  ;;  %v483_v42 = vmul.f32 %v434_v32, %v434_v32 }
 0x16f   : > { %v670_v36 = vpack.c.bf16 %v393_v34, %v391_v31  ;;  %v471_v37 = vadd.f32 %v393_v34, %v391_v31  ;;  %v482_v38 = vmul.f32 %v393_v34, %v393_v34  ;;  %v671_v39 = vpack.c.bf16 %v436_v35, %v434_v32  ;;  %v395_v40 = vpop.f32.mrb[2].mxu0  ;;  %v438_v41 = vpop.f32.mrb[2].mxu1 }
 0x170   : > { %v485_v43 = vmul.f32 %v395_v40, %v395_v40  ;;  %v397_v44 = vpop.f32.mrb[3].mxu0  ;;  %v440_v45 = vpop.f32.mrb[3].mxu1  ;;  %v487_v52 = vmul.f32 %v438_v41, %v438_v41  ;;  %v484_v56 = vmul.f32 %v436_v35, %v436_v35 }
 0x171   : > { %467 = vst [vmem:[%s276_s10] sm:$0xff] %v670_v36  ;;  %468 = vst [vmem:[%s276_s10 + $0x8] sm:$0xff] %v671_v39  ;;  %v672_v46 = vpack.c.bf16 %v397_v44, %v395_v40  ;;  %v476_v47 = vadd.f32 %v397_v44, %v395_v40  ;;  %v486_v48 = vmul.f32 %v397_v44, %v397_v44 }
 0x172   : > { %v673_v49 = vpack.c.bf16 %v440_v45, %v438_v41  ;;  %v472_v50 = vadd.f32 %v471_v37, %v434_v32  ;;  %v489_v51 = vadd.f32 %v482_v38, %v481_v33  ;;  %v488_v58 = vmul.f32 %v440_v45, %v440_v45 }
 0x173   : > { %469 = vst [vmem:[%s276_s10 + $0x10] sm:$0xff] %v672_v46  ;;  %v494_v53 = vadd.f32 %v486_v48, %v485_v43  ;;  %v477_v54 = vadd.f32 %v476_v47, %v438_v41 }
 0x174   : > { %470 = vst [vmem:[%s276_s10 + $0x18] sm:$0xff] %v673_v49  ;;  %v473_v55 = vadd.f32 %v472_v50, %v436_v35  ;;  %v490_v57 = vadd.f32 %v489_v51, %v483_v42 }
 0x175   : > { %v478_v59 = vadd.f32 %v477_v54, %v440_v45  ;;  %v495_v60 = vadd.f32 %v494_v53, %v487_v52 }
 0x176   : > { %474 = vadd.xlane.f32.xlu1 %v473_v55  ;;  %v491_v61 = vadd.f32 %v490_v57, %v484_v56 }
 0x177   : > { %v496_v62 = vadd.f32 %v495_v60, %v488_v58 }
 0x178   : > { %492 = vadd.xlane.f32.xlu0 %v491_v61 }
 0x17a   : > { %479 = vadd.xlane.f32.xlu1 %v478_v59 }
 0x17e   : > { %497 = vadd.xlane.f32.xlu1 %v496_v62 }
 0x203   : > { %v475_v63 = vpop.xlane.xlu1 %474 }
 0x205   : > { %v493_v0 = vpop.xlane.xlu0 %492 }
 0x206   : > { %v500_v1 = vsel %vm499_vm2, %v475_v63, %v493_v0 }
 0x207   : > { %503 = vst.msk [vmem:[%s286_s14] sm:$0xff] %vm502_vm3, %v500_v1  ;;  %v480_v2 = vpop.xlane.xlu1 %479 }
 0x20b   : > { %v498_v3 = vpop.xlane.xlu1 %497 }
 0x20c   : > { %v501_v4 = vsel %vm499_vm2, %v480_v2, %v498_v3 }
 0x20d   : > { %504 = vst.msk [vmem:[%s286_s14 + $0x8] sm:$0xff] %vm502_vm3, %v501_v4 }
 0x20e PF: > { %s16_s20 = sadd.s32 1, %s724_s20   ;;  %s814_s18 = smov %s720_s19 }
 0x20f   : > { %p13_p5 = scmp.ge.s32.totalorder %s16_s20, 4   ;;  %s815_s19 = smov %s817_s21 }
 0x211   :  { %15 = sbr.rel (!%p13_p5) target bundleno = 2 (0x2), region = 78 }

// kernel: bottleneck_forward.5
= control target key start
LH: loop header
LB: loop body
LE: loop exit
PB: predicated region body
PF: predicated region fallthrough
CT: control target
= control target key end

     0   :  { %s3193_s21 = smov 0   ;;  %s4630_s0 = inlined_call_operand.vmem [shape: bf16[2,4,512], index: 0, kind: input, shape index: {}]   ;;  %s4631_s1 = inlined_call_operand.vmem [shape: f32[4,1], index: 1, kind: input, shape index: {}]   ;;  %s4632_s2 = inlined_call_operand.vmem [shape: f32[4,1], index: 2, kind: input, shape index: {}]   ;;  %s4633_s3 = inlined_call_operand.vmem [shape: bf16[4,108], index: 3, kind: input, shape index: {}]   ;;  %s4634_s4 = inlined_call_operand.vmem [shape: f32[27,512], index: 4, kind: input, shape index: {}]   ;;  %s4635_s5 = inlined_call_operand.vmem [shape: bf16[2,4,512], index: 5, kind: output, shape index: {0}]   ;;  %s4636_s6 = inlined_call_operand.vmem [shape: f32[2,4,2], index: 6, kind: output, shape index: {1}]  }
   0x1 LB: > { %s2691_s22 = sadd.s32 4294967295, %s3124_s21   ;;  %p2695_p0 = scmp.ge.s32.totalorder %s3124_s21, 1  ;;  %s3124_s21 = sphi %s3193_s21, %s17_s21  }
   0x2   : > { %p215_p1 = scmp.lt.s32.totalorder %s3124_s21, 3 }
   0x4   : > { %p216_p2 = pnand %p2695_p0, %p215_p1 }
   0x6   : > { %219 = sbr.rel (%p216_p2) target bundleno = 1043 (0x413), region = 40 }
   0xd   : > { %v267_v0 = vld [vmem:[%s4631_s1] sm:$0xf]  ;;  %v275_v1 = vlaneseq  ;;  %v3126_v2 = vmov 0   ;;  %s3127_s7 = smov 55   ;;  %s3128_s8 = smov 56   ;;  %vm1014_vm0 = vcmask 72704  }
   0xe   : > { %2777 = vset.pattern.permute.xlu0 %v3126_v2  ;;  %2503 = vmatprep.mubr.bf16.mxu0 %v3126_v2  ;;  %v282_v4 = vld [vmem:[%s4632_s2] sm:$0xf]  ;;  %s3129_s11 = smov 57   ;;  %s3130_s14 = smov 63   ;;  %vm4641_vm1 = vcmask 457728   ;;  %vm331_vm2 = vcmask 449536  }
   0xf   : > { %270 = vperm.xlu0 %2777, %v267_v0   ;;  %v3204_v3 = vshrl.u32 %v275_v1, 7  ;;  %2544 = vmatprep.mubr.bf16.mxu1 %v3126_v2  ;;  %v305_v5 = vld [vmem:[%s4634_s4] ss:$8 sm:$0xf]  ;;  %s3131_s17 = smov 64   ;;  %s3132_s20 = smov 65  }
  0x10   : > { %v2701_v11 = vld [vmem:[%s4634_s4 + $0x1] ss:$8 sm:$0xf]  ;;  %v2702_v17 = vld [vmem:[%s4634_s4 + $0x2] ss:$8 sm:$0xf] }
  0x11   : > { %4642 = vst [vmem:[#allocation2_spill] sm:$0xff] %v3204_v3  ;;  %v3213_v6 = vsub.s32 0, %v3204_v3  ;;  %v3216_v7 = vsub.s32 2, %v3204_v3  ;;  %v3219_v8 = vsub.s32 1, %v3204_v3  ;;  %v3229_v13 = vsub.s32 3, %v3204_v3  ;;  %s3133_s25 = smov 71  }
  0x12   : > { %v2703_v22 = vld [vmem:[%s4634_s4 + $0x3] ss:$8 sm:$0xf]  ;;  %v2704_v27 = vld [vmem:[%s4634_s4 + $0x4] ss:$8 sm:$0xf] }
  0x13   : > { %285 = vperm.xlu0 %2777, %v282_v4   ;;  %v310_v9 = vrot.slane %v305_v5, %v3213_v6  ;;  %v318_v10 = vrot.slane %v305_v5, %v3216_v7  ;;  %v314_v12 = vrot.slane %v305_v5, %v3219_v8  ;;  %v351_v14 = vrot.slane %v2701_v11, %v3213_v6  ;;  %v2705_v32 = vld [vmem:[%s4634_s4 + $0x5] ss:$8 sm:$0xf]  ;;  %v3284_v37 = vld [vmem:[%s4634_s4 + $0x6] ss:$8 sm:$0xf] }
  0x14   : > { %v322_v15 = vrot.slane %v305_v5, %v3229_v13  ;;  %v359_v16 = vrot.slane %v2701_v11, %v3216_v7  ;;  %v355_v18 = vrot.slane %v2701_v11, %v3219_v8  ;;  %v392_v19 = vrot.slane %v2702_v17, %v3213_v6  ;;  %v2717_v42 = vld [vmem:[%s4634_s4 + $0x41] ss:$8 sm:$0xf]  ;;  %s3134_s28 = smov 9   ;;  %s3136_s10 = smov 73  }
  0x15   : > { %323 = vrot.lane.b32.xlu1 %v310_v9, %s3127_s7  ;;  %v363_v20 = vrot.slane %v2701_v11, %v3229_v13  ;;  %v400_v21 = vrot.slane %v2702_v17, %v3216_v7  ;;  %v396_v23 = vrot.slane %v2702_v17, %v3219_v8  ;;  %v433_v24 = vrot.slane %v2703_v22, %v3213_v6  ;;  %v2719_v47 = vld [vmem:[%s4634_s4 + $0x43] ss:$8 sm:$0xf]  ;;  %v2718_v52 = vld [vmem:[%s4634_s4 + $0x42] ss:$8 sm:$0xf] }
  0x16   : > { %v404_v25 = vrot.slane %v2702_v17, %v3229_v13  ;;  %v441_v26 = vrot.slane %v2703_v22, %v3216_v7  ;;  %v437_v28 = vrot.slane %v2703_v22, %v3219_v8  ;;  %v474_v29 = vrot.slane %v2704_v27, %v3213_v6  ;;  %v2721_v57 = vld [vmem:[%s4634_s4 + $0x45] ss:$8 sm:$0xf]  ;;  %v2723_v62 = vld [vmem:[%s4634_s4 + $0x47] ss:$8 sm:$0xf] }
  0x17   : > { %327 = vrot.lane.b32.xlu0 %v318_v10, %s3127_s7  ;;  %v445_v30 = vrot.slane %v2703_v22, %v3229_v13  ;;  %v482_v31 = vrot.slane %v2704_v27, %v3216_v7  ;;  %v478_v33 = vrot.slane %v2704_v27, %v3219_v8  ;;  %v515_v34 = vrot.slane %v2705_v32, %v3213_v6  ;;  %v2720_v4 = vld [vmem:[%s4634_s4 + $0x44] ss:$8 sm:$0xf]  ;;  %s3137_s18 = smov 119   ;;  %s3138_s24 = smov 121  }
  0x18   : > { %v486_v35 = vrot.slane %v2704_v27, %v3229_v13  ;;  %v523_v36 = vrot.slane %v2705_v32, %v3216_v7  ;;  %v519_v38 = vrot.slane %v2705_v32, %v3219_v8  ;;  %v556_v39 = vrot.slane %v3284_v37, %v3213_v6  ;;  %p249_p3 = scmp.lt.s32.totalorder %s2691_s22, 1  ;;  %s3139_s30 = smov 120  }
  0x19   : > { %325 = vrot.lane.b32.xlu1 %v314_v12, %s3127_s7  ;;  %v527_v40 = vrot.slane %v2705_v32, %v3229_v13  ;;  %v564_v41 = vrot.slane %v3284_v37, %v3216_v7  ;;  %v560_v43 = vrot.slane %v3284_v37, %v3219_v8  ;;  %v997_v44 = vrot.slane %v2717_v42, %v3219_v8  ;;  %v2722_v12 = vld [vmem:[%s4634_s4 + $0x46] ss:$8 sm:$0xf]  ;;  %s3141_s23 = smov 7   ;;  %s3142_s27 = smov 127  }
  0x1a   : > { %v993_v45 = vrot.slane %v2717_v42, %v3213_v6  ;;  %v1005_v46 = vrot.slane %v2717_v42, %v3229_v13  ;;  %v1001_v48 = vrot.slane %v2717_v42, %v3216_v7  ;;  %v1078_v49 = vrot.slane %v2719_v47, %v3219_v8  ;;  %s4655_s22 = smov (!%p249_p3, %s2691_s22), 1  ;;  %s3143_s9 = smov 1  }
  0x1b   : > { %364 = vrot.lane.b32.xlu0 %v351_v14, %s3128_s8  ;;  %v1074_v50 = vrot.slane %v2719_v47, %v3213_v6  ;;  %v1086_v51 = vrot.slane %v2719_v47, %v3229_v13  ;;  %v1082_v53 = vrot.slane %v2719_v47, %v3216_v7  ;;  %v1038_v54 = vrot.slane %v2718_v52, %v3219_v8  ;;  %s2735_s13 = sshll.u32 %s4655_s22, 3  ;;  %s3144_s16 = smov 8  }
  0x1c   : > { %v1034_v55 = vrot.slane %v2718_v52, %v3213_v6  ;;  %v1046_v56 = vrot.slane %v2718_v52, %v3229_v13  ;;  %v1042_v58 = vrot.slane %v2718_v52, %v3216_v7  ;;  %v1158_v59 = vrot.slane %v2721_v57, %v3219_v8  ;;  %s253_s19 = scalar_lea.vmem %s4630_s0, %s2735_s13  ;;  %s3151_s26 = smov 111  }
  0x1d   : > { %329 = vrot.lane.b32.xlu1 %v322_v15, %s3127_s7  ;;  %v1154_v60 = vrot.slane %v2721_v57, %v3213_v6  ;;  %v1166_v61 = vrot.slane %v2721_v57, %v3229_v13  ;;  %v1162_v63 = vrot.slane %v2721_v57, %v3216_v7  ;;  %v1238_v0 = vrot.slane %v2723_v62, %v3219_v8  ;;  %s3155_s29 = smov 48   ;;  %s258_s12 = scalar_lea.vmem %s4635_s5, %s2735_s13 }
  0x1e   : > { %v1234_v1 = vrot.slane %v2723_v62, %v3213_v6  ;;  %v1246_v2 = vrot.slane %v2723_v62, %v3229_v13  ;;  %v1242_v5 = vrot.slane %v2723_v62, %v3216_v7  ;;  %v1118_v9 = vrot.slane %v2720_v4, %v3219_v8  ;;  %s2700_s15 = sshll.u32 %s4655_s22, 2 }
  0x1f   : > { %368 = vrot.lane.b32.xlu0 %v359_v16, %s3128_s8  ;;  %v1114_v10 = vrot.slane %v2720_v4, %v3213_v6  ;;  %v1126_v11 = vrot.slane %v2720_v4, %v3229_v13  ;;  %v1122_v14 = vrot.slane %v2720_v4, %v3216_v7  ;;  %v1198_v15 = vrot.slane %v2722_v12, %v3219_v8 }
  0x20   : > { %v1194_v16 = vrot.slane %v2722_v12, %v3213_v6  ;;  %v1206_v17 = vrot.slane %v2722_v12, %v3229_v13  ;;  %vm454_vm3 = vcmask 515072   ;;  %vm413_vm4 = vcmask 465920  }
  0x21   : > { %366 = vrot.lane.b32.xlu1 %v355_v18, %s3128_s8  ;;  %v2725_v18 = vld [vmem:[%s4634_s4 + $0x61] ss:$8 sm:$0xf]  ;;  %vm536_vm5 = vcmask 531456   ;;  %vm495_vm6 = vcmask 523264   ;;  %vm618_vm7 = vcmask 588800  }
  0x22   : > { %v1326_v22 = vrot.slane %v2725_v18, %v3229_v13  ;;  %vm577_vm8 = vcmask 580608   ;;  %vm659_vm9 = vcmask 596992   ;;  %vm700_vm10 = vcmask 973824  }
  0x23   : > { %405 = vrot.lane.b32.xlu0 %v392_v19, %s3129_s11  ;;  %v1202_v19 = vrot.slane %v2722_v12, %v3216_v7  ;;  %vm741_vm11 = vcmask 982016   ;;  %vm782_vm12 = vcmask 990208   ;;  %vm823_vm13 = vcmask 1039360  }
  0x24   : > { %vm932_vm14 = vcmask 56320   ;;  %vm891_vm15 = vcmask 7168  }
  0x25   : > { %370 = vrot.lane.b32.xlu1 %v363_v20, %s3128_s8  ;;  %v1318_v20 = vrot.slane %v2725_v18, %v3219_v8 }
  0x27   : > { %409 = vrot.lane.b32.xlu0 %v400_v21, %s3129_s11  ;;  %v1314_v21 = vrot.slane %v2725_v18, %v3213_v6 }
  0x29   : > { %407 = vrot.lane.b32.xlu1 %v396_v23, %s3129_s11  ;;  %v2724_v23 = vld [vmem:[%s4634_s4 + $0x60] ss:$8 sm:$0xf] }
  0x2a   : > { %v1274_v27 = vrot.slane %v2724_v23, %v3213_v6 }
  0x2b   : > { %446 = vrot.lane.b32.xlu0 %v433_v24, %s3130_s14  ;;  %v1322_v24 = vrot.slane %v2725_v18, %v3216_v7 }
  0x2d   : > { %411 = vrot.lane.b32.xlu1 %v404_v25, %s3129_s11 }
  0x2f   : > { %450 = vrot.lane.b32.xlu0 %v441_v26, %s3130_s14  ;;  %v1278_v26 = vrot.slane %v2724_v23, %v3219_v8 }
  0x31   : > { %448 = vrot.lane.b32.xlu1 %v437_v28, %s3130_s14 }
  0x33   : > { %487 = vrot.lane.b32.xlu0 %v474_v29, %s3131_s17  ;;  %v1286_v29 = vrot.slane %v2724_v23, %v3229_v13 }
  0x35   : > { %452 = vrot.lane.b32.xlu1 %v445_v30, %s3130_s14  ;;  %v2726_v30 = vld [vmem:[%s4634_s4 + $0x62] ss:$8 sm:$0xf] }
  0x37   : > { %491 = vrot.lane.b32.xlu0 %v482_v31, %s3131_s17  ;;  %v1282_v31 = vrot.slane %v2724_v23, %v3216_v7 }
  0x39   : > { %489 = vrot.lane.b32.xlu1 %v478_v33, %s3131_s17 }
  0x3b   : > { %528 = vrot.lane.b32.xlu0 %v515_v34, %s3132_s20  ;;  %v1358_v34 = vrot.slane %v2726_v30, %v3219_v8 }
  0x3d   : > { %493 = vrot.lane.b32.xlu1 %v486_v35, %s3131_s17  ;;  %v1354_v35 = vrot.slane %v2726_v30, %v3213_v6 }
  0x3f   : > { %532 = vrot.lane.b32.xlu0 %v523_v36, %s3132_s20 }
  0x41   : > { %530 = vrot.lane.b32.xlu1 %v519_v38, %s3132_s20 }
  0x43   : > { %569 = vrot.lane.b32.xlu0 %v556_v39, %s3133_s25  ;;  %v1366_v39 = vrot.slane %v2726_v30, %v3229_v13 }
  0x45   : > { %534 = vrot.lane.b32.xlu1 %v527_v40, %s3132_s20  ;;  %v2707_v40 = vld [vmem:[%s4634_s4 + $0x7] ss:$8 sm:$0xf] }
  0x47   : > { %573 = vrot.lane.b32.xlu0 %v564_v41, %s3133_s25  ;;  %v1362_v41 = vrot.slane %v2726_v30, %v3216_v7 }
  0x49   : > { %571 = vrot.lane.b32.xlu1 %v560_v43, %s3133_s25 }
  0x4b   : > { %1008 = vrot.lane.b32.xlu0 %v997_v44, %s3134_s28  ;;  %v601_v44 = vrot.slane %v2707_v40, %v3219_v8 }
  0x4d   : > { %1006 = vrot.lane.b32.xlu1 %v993_v45, %s3134_s28  ;;  %v597_v45 = vrot.slane %v2707_v40, %v3213_v6 }
  0x4f   : > { %1012 = vrot.lane.b32.xlu0 %v1005_v46, %s3134_s28 }
  0x51   : > { %1010 = vrot.lane.b32.xlu1 %v1001_v48, %s3134_s28  ;;  %v609_v48 = vrot.slane %v2707_v40, %v3229_v13 }
  0x53   : > { %1089 = vrot.lane.b32.xlu0 %v1078_v49, %s3128_s8  ;;  %v2709_v49 = vld [vmem:[%s4634_s4 + $0x21] ss:$8 sm:$0xf] }
  0x54   : > { %v687_v57 = vrot.slane %v2709_v49, %v3216_v7  ;;  %v691_v62 = vrot.slane %v2709_v49, %v3229_v13 }
  0x55   : > { %1087 = vrot.lane.b32.xlu1 %v1074_v50, %s3128_s8  ;;  %v605_v50 = vrot.slane %v2707_v40, %v3216_v7 }
  0x57   : > { %1093 = vrot.lane.b32.xlu0 %v1086_v51, %s3128_s8 }
  0x59   : > { %1091 = vrot.lane.b32.xlu1 %v1082_v53, %s3128_s8  ;;  %v679_v53 = vrot.slane %v2709_v49, %v3213_v6 }
  0x5b   : > { %1049 = vrot.lane.b32.xlu0 %v1038_v54, %s3127_s7  ;;  %v568_v54 = vrot.slane %v3284_v37, %v3229_v13 }
  0x5d   : > { %1047 = vrot.lane.b32.xlu1 %v1034_v55, %s3127_s7 }
  0x5f   : > { %1053 = vrot.lane.b32.xlu0 %v1046_v56, %s3127_s7 }
  0x61   : > { %1051 = vrot.lane.b32.xlu1 %v1042_v58, %s3127_s7  ;;  %v2711_v58 = vld [vmem:[%s4634_s4 + $0x23] ss:$8 sm:$0xf] }
  0x62   : > { %v765_v4 = vrot.slane %v2711_v58, %v3219_v8 }
  0x63   : > { %1169 = vrot.lane.b32.xlu0 %v1158_v59, %s3130_s14  ;;  %v683_v59 = vrot.slane %v2709_v49, %v3219_v8 }
  0x65   : > { %1167 = vrot.lane.b32.xlu1 %v1154_v60, %s3130_s14 }
  0x67   : > { %1173 = vrot.lane.b32.xlu0 %v1166_v61, %s3130_s14  ;;  %v761_v61 = vrot.slane %v2711_v58, %v3213_v6 }
  0x69   : > { %1171 = vrot.lane.b32.xlu1 %v1162_v63, %s3130_s14 }
  0x6b   : > { %1249 = vrot.lane.b32.xlu0 %v1238_v0, %s3132_s20 }
  0x6d   : > { %1247 = vrot.lane.b32.xlu1 %v1234_v1, %s3132_s20  ;;  %v769_v1 = vrot.slane %v2711_v58, %v3216_v7 }
  0x6f   : > { %1253 = vrot.lane.b32.xlu0 %v1246_v2, %s3132_s20  ;;  %v2708_v2 = vld [vmem:[%s4634_s4 + $0x20] ss:$8 sm:$0xf] }
  0x71   : > { %1251 = vrot.lane.b32.xlu1 %v1242_v5, %s3132_s20 }
  0x73   : > { %1129 = vrot.lane.b32.xlu0 %v1118_v9, %s3129_s11 }
  0x75   : > { %1127 = vrot.lane.b32.xlu1 %v1114_v10, %s3129_s11  ;;  %v638_v10 = vrot.slane %v2708_v2, %v3213_v6 }
  0x77   : > { %1133 = vrot.lane.b32.xlu0 %v1126_v11, %s3129_s11  ;;  %v773_v11 = vrot.slane %v2711_v58, %v3229_v13 }
  0x79   : > { %1131 = vrot.lane.b32.xlu1 %v1122_v14, %s3129_s11  ;;  %s3135_s11 = smov 72  }
  0x7b   : > { %1209 = vrot.lane.b32.xlu0 %v1198_v15, %s3131_s17  ;;  %v646_v15 = vrot.slane %v2708_v2, %v3216_v7 }
  0x7d   : > { %1207 = vrot.lane.b32.xlu1 %v1194_v16, %s3131_s17  ;;  %v2710_v16 = vld [vmem:[%s4634_s4 + $0x22] ss:$8 sm:$0xf] }
  0x7e   : > { %v724_v30 = vrot.slane %v2710_v16, %v3219_v8  ;;  %v732_v40 = vrot.slane %v2710_v16, %v3229_v13 }
  0x7f   : > { %1213 = vrot.lane.b32.xlu0 %v1206_v17, %s3131_s17  ;;  %v642_v17 = vrot.slane %v2708_v2, %v3219_v8 }
  0x81   : > { %1211 = vrot.lane.b32.xlu1 %v1202_v19, %s3131_s17 }
  0x83   : > { %1329 = vrot.lane.b32.xlu0 %v1318_v20, %s3135_s11  ;;  %v720_v20 = vrot.slane %v2710_v16, %v3213_v6 }
  0x85   : > { %1327 = vrot.lane.b32.xlu1 %v1314_v21, %s3135_s11  ;;  %v650_v21 = vrot.slane %v2708_v2, %v3229_v13 }
  0x87   : > { %v3386_v25 = vpop.permute.xlu1 %323  ;;  %1333 = vrot.lane.b32.xlu0 %v1326_v22, %s3135_s11 }
  0x88   : > { %4643 = vst [vmem:[#allocation3_spill] sm:$0xff] %v3386_v25 }
  0x89   : > { %1331 = vrot.lane.b32.xlu1 %v1322_v24, %s3135_s11  ;;  %v728_v24 = vrot.slane %v2710_v16, %v3216_v7 }
  0x8b   : > { %v3392_v28 = vpop.permute.xlu1 %325  ;;  %1289 = vrot.lane.b32.xlu0 %v1278_v26, %s3133_s25  ;;  %v3516_v26 = vld [vmem:[%s4634_s4 + $0x27] ss:$8 sm:$0xf] }
  0x8c   : > { %4644 = vst [vmem:[#allocation4_spill] sm:$0xff] %v3392_v28 }
  0x8d   : > { %1287 = vrot.lane.b32.xlu1 %v1274_v27, %s3133_s25  ;;  %v3140_v27 = vmov 839922192  }
  0x8e   : > { %v3401_v32 = vpop.permute.xlu0 %270 }
  0x8f   : > { %v3403_v33 = vpop.permute.xlu1 %329  ;;  %1293 = vrot.lane.b32.xlu0 %v1286_v29, %s3133_s25  ;;  %v273_v29 = vunpack.c.l.s4 %v3140_v27 }
  0x91   : > { %1291 = vrot.lane.b32.xlu1 %v1282_v31, %s3133_s25 }
  0x92   : > { %v3409_v36 = vpop.permute.xlu0 %285 }
  0x93   : > { %v3411_v38 = vpop.permute.xlu1 %366  ;;  %1369 = vrot.lane.b32.xlu0 %v1358_v34, %s3136_s10 }
  0x95   : > { %1367 = vrot.lane.b32.xlu1 %v1354_v35, %s3136_s10  ;;  %v911_v35 = vrot.slane %v3516_v26, %v3213_v6 }
  0x96   : > { %v3420_v42 = vpop.permute.xlu0 %327 }
  0x97   : > { %4645 = vst [vmem:[#allocation5_spill] sm:$0xff] %v3420_v42  ;;  %v3422_v43 = vpop.permute.xlu1 %370  ;;  %1373 = vrot.lane.b32.xlu0 %v1366_v39, %s3136_s10  ;;  %v274_v39 = vunpack.c.0.s8 %v273_v29 }
  0x99   : > { %1371 = vrot.lane.b32.xlu1 %v1362_v41, %s3136_s10  ;;  %v277_v49 = vsub.s32 %v274_v39, %v3204_v3 }
  0x9a   : > { %v3428_v46 = vpop.permute.xlu0 %364 }
  0x9b   : > { %v3430_v47 = vpop.permute.xlu1 %407  ;;  %612 = vrot.lane.b32.xlu0 %v601_v44, %s3135_s11 }
  0x9d   : > { %610 = vrot.lane.b32.xlu1 %v597_v45, %s3135_s11  ;;  %v919_v45 = vrot.slane %v3516_v26, %v3216_v7 }
  0x9e   : > { %v3439_v51 = vpop.permute.xlu0 %368 }
  0x9f   : > { %v3441_v52 = vpop.permute.xlu1 %411  ;;  %616 = vrot.lane.b32.xlu0 %v609_v48, %s3135_s11  ;;  %v2712_v48 = vld [vmem:[%s4634_s4 + $0x24] ss:$8 sm:$0xf] }
  0xa0   : > { %v806_v58 = vrot.slane %v2712_v48, %v3219_v8  ;;  %v810_v16 = vrot.slane %v2712_v48, %v3216_v7 }
  0xa1   : > { %614 = vrot.lane.b32.xlu1 %v605_v50, %s3135_s11  ;;  %v915_v50 = vrot.slane %v3516_v26, %v3219_v8 }
  0xa2   : > { %v3448_v55 = vpop.permute.xlu0 %405 }
  0xa3   : > { %v3450_v56 = vpop.permute.xlu1 %448  ;;  %692 = vrot.lane.b32.xlu0 %v679_v53, %s3137_s18  ;;  %v264_v53 = vld [vmem:[%s253_s19] sm:$0xff]  ;;  %s3145_s19 = smov 81  }
  0xa5   : > { %575 = vrot.lane.b32.xlu1 %v568_v54, %s3133_s25 }
  0xa6   : > { %v3459_v60 = vpop.permute.xlu0 %409 }
  0xa7   : > { %v3461_v37 = vpop.permute.xlu1 %452  ;;  %696 = vrot.lane.b32.xlu0 %v687_v57, %s3137_s18 }
  0xa9   : > { %694 = vrot.lane.b32.xlu1 %v683_v59, %s3137_s18  ;;  %v266_v59 = vunpack.c.h.bf16 %v264_v53 }
  0xaa   : > { %v3467_v63 = vpop.permute.xlu0 %446 }
  0xab   : > { %v3469_v0 = vpop.permute.xlu1 %489  ;;  %774 = vrot.lane.b32.xlu0 %v761_v61, %s3138_s24  ;;  %v278_v61 = vrot.slane %v3401_v32, %v277_v49 }
  0xad   : > { %698 = vrot.lane.b32.xlu1 %v691_v62, %s3137_s18  ;;  %v802_v62 = vrot.slane %v2712_v48, %v3213_v6  ;;  %v281_v32 = vmul.f32 %v278_v61, %v266_v59 }
  0xae   : > { %v3477_v5 = vpop.permute.xlu0 %450 }
  0xaf   : > { %v3479_v9 = vpop.permute.xlu1 %493  ;;  %778 = vrot.lane.b32.xlu0 %v769_v1, %s3138_s24  ;;  %v265_v1 = vunpack.c.l.bf16 %v264_v53 }
  0xb1   : > { %776 = vrot.lane.b32.xlu1 %v765_v4, %s3138_s24  ;;  %v293_v4 = vrot.slane %v3409_v36, %v277_v49 }
  0xb2   : > { %v3483_v12 = vpop.permute.xlu0 %487 }
  0xb3   : > { %v3485_v14 = vpop.permute.xlu1 %530  ;;  %651 = vrot.lane.b32.xlu0 %v638_v10, %s3136_s10  ;;  %v296_v36 = vadd.f32 %v293_v4, %v281_v32 }
  0xb5   : > { %780 = vrot.lane.b32.xlu1 %v773_v11, %s3138_s24  ;;  %v814_v11 = vrot.slane %v2712_v48, %v3229_v13  ;;  %v3583_v48 = vld [vmem:[%s4634_s4 + $0x40] ss:$8 sm:$0xf]  ;;  %s3147_s24 = smov 79  }
  0xb6   : > { %v3493_v18 = vpop.permute.xlu0 %491 }
  0xb7   : > { %v3495_v19 = vpop.permute.xlu1 %534  ;;  %655 = vrot.lane.b32.xlu0 %v646_v15, %s3136_s10  ;;  %v2714_v15 = vld [vmem:[%s4634_s4 + $0x26] ss:$8 sm:$0xf] }
  0xb8   : > { %v870_v29 = vrot.slane %v2714_v15, %v3213_v6  ;;  %v878_v49 = vrot.slane %v2714_v15, %v3216_v7 }
  0xb9   : > { %653 = vrot.lane.b32.xlu1 %v642_v17, %s3136_s10  ;;  %v280_v17 = vmul.f32 %v278_v61, %v265_v1  ;;  %v952_v61 = vrot.slane %v3583_v48, %v3213_v6 }
  0xba   : > { %v3503_v22 = vpop.permute.xlu0 %528 }
  0xbb   : > { %v3505_v23 = vpop.permute.xlu1 %571  ;;  %733 = vrot.lane.b32.xlu0 %v720_v20, %s3139_s30  ;;  %v295_v27 = vadd.f32 %v293_v4, %v280_v17 }
  0xbd   : > { %657 = vrot.lane.b32.xlu1 %v650_v21, %s3136_s10 }
  0xbe   : > { %v3520_v31 = vpop.permute.xlu0 %532 }
  0xbf   : > { %v3522_v34 = vpop.permute.xlu1 %1006  ;;  %737 = vrot.lane.b32.xlu0 %v728_v24, %s3139_s30  ;;  %v874_v24 = vrot.slane %v2714_v15, %v3219_v8 }
  0xc1   : > { %735 = vrot.lane.b32.xlu1 %v724_v30, %s3139_s30 }
  0xc2   : > { %v3530_v41 = vpop.permute.xlu0 %569 }
  0xc3   : > { %v1011_v44 = vpop.permute.xlu1 %1010  ;;  %924 = vrot.lane.b32.xlu0 %v911_v35, %s3141_s23  ;;  %v3574_v35 = vmax.f32 %v296_v36, 0.0 }
  0xc5   : > { %739 = vrot.lane.b32.xlu1 %v732_v40, %s3139_s30  ;;  %v923_v40 = vrot.slane %v3516_v26, %v3229_v13 }
  0xc6   : > { %v3547_v54 = vpop.permute.xlu0 %573 }
  0xc7   : > { %v3549_v57 = vpop.permute.xlu1 %1087  ;;  %928 = vrot.lane.b32.xlu0 %v919_v45, %s3141_s23  ;;  %v3578_v45 = vmax.f32 %v295_v27, 0.0 }
  0xc9   : > { %926 = vrot.lane.b32.xlu1 %v915_v50, %s3141_s23  ;;  %v1023_v17 = vmul.f32 %v3522_v34, %v3578_v45 }
  0xca   : > { %v1009_v2 = vpop.permute.xlu0 %1008 }
  0xcb   : > { %v3557_v10 = vpop.permute.xlu1 %1091  ;;  %817 = vrot.lane.b32.xlu0 %v806_v58, %s3142_s27  ;;  %v3591_v58 = vcombine.high %v3574_v35, %v3574_v35  ;;  %v1015_v26 = vsel %vm1014_vm0, %v3522_v34, %v1009_v2  ;;  %v1016_v1 = vsel %vm1014_vm0, %v1009_v2, %v1011_v44 }
  0xcc   : > { %v1025_v36 = vmul.f32 %v1016_v1, %v3574_v35 }
  0xcd   : > { %815 = vrot.lane.b32.xlu1 %v802_v62, %s3142_s27  ;;  %v3601_v62 = vcombine.high %v3578_v45, %v3578_v45 }
  0xce   : > { %v3566_v20 = vpop.permute.xlu0 %1012 }
  0xcf   : > { %v3568_v21 = vpop.permute.xlu1 %1047  ;;  %821 = vrot.lane.b32.xlu0 %v814_v11, %s3142_s27  ;;  %v1017_v50 = vsel %vm1014_vm0, %v1011_v44, %v3566_v20  ;;  %v882_v11 = vrot.slane %v2714_v15, %v3229_v13  ;;  %v1024_v32 = vmul.f32 %v1015_v26, %v3601_v62  ;;  %v960_v44 = vrot.slane %v3583_v48, %v3216_v7 }
  0xd0   : > { %v1026_v4 = vmul.f32 %v1017_v50, %v3591_v58  ;;  %v956_v15 = vrot.slane %v3583_v48, %v3219_v8  ;;  %vm973_vm0 = vcmask 64512  }
  0xd1   : > { %819 = vrot.lane.b32.xlu1 %v810_v16, %s3142_s27  ;;  %v1838_v27 = vrot.slane %v1024_v32, 4 }
  0xd2   : > { %v1090_v30 = vpop.permute.xlu0 %1089  ;;  %v1840_v2 = vrot.slane %v1026_v4, 4 }
  0xd3   : > { %v1052_v39 = vpop.permute.xlu1 %1051  ;;  %885 = vrot.lane.b32.xlu0 %v874_v24, %s3143_s9  ;;  %v1096_v1 = vsel %vm4641_vm1, %v1090_v30, %v3557_v10 }
  0xd4   : > { %v1105_v25 = vmul.f32 %v1096_v1, %v3574_v35 }
  0xd5   : > { %883 = vrot.lane.b32.xlu1 %v870_v29, %s3143_s9 }
  0xd6   : > { %v3587_v53 = vpop.permute.xlu0 %1093 }
  0xd7   : > { %v3594_v59 = vpop.permute.xlu1 %1167  ;;  %930 = vrot.lane.b32.xlu0 %v923_v40, %s3141_s23  ;;  %v1097_v34 = vsel %vm4641_vm1, %v3557_v10, %v3587_v53  ;;  %v1837_v40 = vrot.slane %v1023_v17, 4  ;;  %s3146_s23 = smov 80  }
  0xd8   : > { %v1106_v17 = vmul.f32 %v1097_v34, %v3591_v58 }
  0xd9   : > { %887 = vrot.lane.b32.xlu1 %v878_v49, %s3143_s9  ;;  %v1839_v49 = vrot.slane %v1025_v36, 4  ;;  %v2778_v3 = vpack.i.bf16 %v1838_v27, %v1837_v40 }
  0xda   : > { %v1050_v16 = vpop.permute.xlu0 %1049  ;;  %v1894_v27 = vrot.slane %v1106_v17, 4 }
  0xdb   : > { %v3609_v24 = vpop.permute.xlu1 %1171  ;;  %965 = vrot.lane.b32.xlu0 %v952_v61, %s3144_s16  ;;  %v1095_v61 = vsel %vm4641_vm1, %v3549_v57, %v1090_v30  ;;  %v1055_v4 = vsel %vm331_vm2, %v3568_v21, %v1050_v16  ;;  %v2783_v32 = vpack.i.bf16 %v1840_v2, %v1839_v49  ;;  %v1027_v2 = vmul.f32 0.0, %v3566_v20 }
  0xdc   : > { %v1104_v28 = vmul.f32 %v1095_v61, %v3601_v62  ;;  %v1064_v10 = vmul.f32 %v1055_v4, %v3601_v62  ;;  %v1893_v61 = vrot.slane %v1105_v25, 4  ;;  %v964_v25 = vrot.slane %v3583_v48, %v3229_v13 }
  0xdd   : > { %889 = vrot.lane.b32.xlu1 %v882_v11, %s3143_s9  ;;  %v1056_v11 = vsel %vm331_vm2, %v1050_v16, %v1052_v39  ;;  %v1103_v16 = vmul.f32 %v3549_v57, %v3578_v45  ;;  %v1841_v20 = vrot.slane %v1027_v2, 4 }
  0xde   : > { %v1054_v29 = vpop.permute.xlu0 %1053  ;;  %v1065_v30 = vmul.f32 %v1056_v11, %v3574_v35  ;;  %v2803_v11 = vpack.i.bf16 %v1894_v27, %v1893_v61  ;;  %v1183_v61 = vmul.f32 %v3594_v59, %v3578_v45 }
  0xdf   : > { %v1057_v50 = vsel %vm331_vm2, %v1052_v39, %v1054_v29  ;;  %v3620_v26 = vpop.permute.xlu1 %1247  ;;  %969 = vrot.lane.b32.xlu0 %v960_v44, %s3144_s16  ;;  %v373_v39 = vsel %vm4641_vm1, %v3428_v46, %v3411_v38  ;;  %v1891_v57 = vrot.slane %v1103_v16, 4 }
  0xe0   : > { %v1066_v36 = vmul.f32 %v1057_v50, %v3591_v58  ;;  %v382_v49 = vmul.f32 %v373_v39, %v3578_v45  ;;  %v1892_v50 = vrot.slane %v1104_v28, 4  ;;  %v1107_v28 = vmul.f32 0.0, %v3587_v53 }
  0xe1   : > { %967 = vrot.lane.b32.xlu1 %v956_v15, %s3144_s16  ;;  %v1063_v15 = vmul.f32 %v3568_v21, %v3578_v45 }
  0xe2   : > { %v1170_v44 = vpop.permute.xlu0 %1169  ;;  %v2793_v34 = vpack.i.bf16 %v1066_v36, %v1065_v30  ;;  %v2798_v17 = vpack.i.bf16 %v1892_v50, %v1891_v57  ;;  %v1895_v16 = vrot.slane %v1107_v28, 4  ;;  %v1946_v28 = vrot.slane %v1183_v61, 4 }
  0xe3   : > { %v3637_v42 = vpop.permute.xlu1 %1251  ;;  %2784 = vrot.lane.b32.xlu0 %v2783_v32, %s3142_s27  ;;  %v2788_v1 = vpack.i.bf16 %v1064_v10, %v1063_v15  ;;  %v1394_v32 = vrot.slane %v382_v49, 4  ;;  %v1175_v39 = vsel %vm454_vm3, %v3594_v59, %v1170_v44  ;;  %v1067_v15 = vmul.f32 0.0, %v1054_v29 }
  0xe4   : > { %v1184_v53 = vmul.f32 %v1175_v39, %v3601_v62  ;;  %v1176_v29 = vsel %vm454_vm3, %v1170_v44, %v3609_v24  ;;  %v1263_v61 = vmul.f32 %v3620_v26, %v3578_v45 }
  0xe5   : > { %2779 = vrot.lane.b32.xlu1 %v2778_v3, %s3142_s27  ;;  %v2808_v36 = vpack.i.bf16 %v1394_v32, %v1841_v20 }
  0xe6   : > { %v3649_v40 = vpop.permute.xlu0 %1173  ;;  %v1947_v32 = vrot.slane %v1184_v53, 4 }
  0xe7   : > { %v1128_v4 = vpop.permute.xlu1 %1127  ;;  %2794 = vrot.lane.b32.xlu0 %v2793_v34, %s3145_s19  ;;  %v1177_v48 = vsel %vm454_vm3, %v3609_v24, %v3649_v40 }
  0xe8   : > { %v1143_v49 = vmul.f32 %v1128_v4, %v3578_v45  ;;  %v1186_v57 = vmul.f32 %v1177_v48, %v3591_v58 }
  0xe9   : > { %2789 = vrot.lane.b32.xlu1 %v2788_v1, %s3145_s19 }
  0xea   : > { %v1250_v21 = vpop.permute.xlu0 %1249 }
  0xeb   : > { %v1132_v3 = vpop.permute.xlu1 %1131  ;;  %2804 = vrot.lane.b32.xlu0 %v2803_v11, %s3146_s23  ;;  %v1255_v59 = vsel %vm536_vm5, %v3620_v26, %v1250_v21 }
  0xed   : > { %2799 = vrot.lane.b32.xlu1 %v2798_v17, %s3146_s23 }
  0xee   : > { %v3657_v10 = vpop.permute.xlu0 %1253 }
  0xef   : > { %v1208_v30 = vpop.permute.xlu1 %1207  ;;  %2809 = vrot.lane.b32.xlu0 %v2808_v36, %s3142_s27  ;;  %v1185_v36 = vmul.f32 %v1176_v29, %v3574_v35  ;;  %v1256_v29 = vsel %vm536_vm5, %v1250_v21, %v3637_v42 }
  0xf1   : > { %971 = vrot.lane.b32.xlu1 %v964_v25, %s3144_s16  ;;  %v1949_v25 = vrot.slane %v1186_v57, 4 }
  0xf2   : > { %v1130_v2 = vpop.permute.xlu0 %1129 }
  0xf3   : > { %v1135_v27 = vsel %vm413_vm4, %v1128_v4, %v1130_v2  ;;  %v1212_v34 = vpop.permute.xlu1 %1211  ;;  %1904 = vrot.lane.b32.xlu0 %v1895_v16, %s3146_s23  ;;  %v1136_v1 = vsel %vm413_vm4, %v1130_v2, %v1132_v3  ;;  %v1264_v2 = vmul.f32 %v1255_v59, %v3601_v62  ;;  %s262_s23 = scalar_lea.vmem %s4636_s6, %s2700_s15 }
  0xf4   : > { %v1144_v50 = vmul.f32 %v1135_v27, %v3601_v62  ;;  %v1145_v24 = vmul.f32 %v1136_v1, %v3574_v35  ;;  %v1948_v27 = vrot.slane %v1185_v36, 4 }
  0xf5   : > { %1874 = vrot.lane.b32.xlu1 %v1067_v15, %s3145_s19  ;;  %v1257_v15 = vsel %vm536_vm5, %v3637_v42, %v3657_v10  ;;  %v1999_v42 = vrot.slane %v1263_v61, 4  ;;  %v1267_v61 = vmul.f32 0.0, %v3657_v10 }
  0xf6   : > { %v2813_v20 = vpack.i.bf16 %v1144_v50, %v1143_v49  ;;  %v1134_v11 = vpop.permute.xlu0 %1133  ;;  %v1223_v49 = vmul.f32 %v1208_v30, %v3578_v45  ;;  %v2828_v57 = vpack.i.bf16 %v1949_v25, %v1948_v27 }
  0xf7   : > { %v1137_v4 = vsel %vm413_vm4, %v1132_v3, %v1134_v11  ;;  %v3678_v17 = vpop.permute.xlu1 %1327  ;;  %v2823_v3 = vpack.i.bf16 %v1947_v32, %v1946_v28 }
  0xf8   : > { %v1146_v44 = vmul.f32 %v1137_v4, %v3591_v58 }
  0xf9   : > { %2814 = vrot.lane.b32.xlu1 %v2813_v20, %s3147_s24  ;;  %v1266_v20 = vmul.f32 %v1257_v15, %v3591_v58 }
  0xfa   : > { %v2818_v39 = vpack.i.bf16 %v1146_v44, %v1145_v24  ;;  %v1210_v16 = vpop.permute.xlu0 %1209  ;;  %v1265_v24 = vmul.f32 %v1256_v29, %v3574_v35 }
  0xfb   : > { %v1215_v53 = vsel %vm495_vm6, %v1208_v30, %v1210_v16  ;;  %v1332_v48 = vpop.permute.xlu1 %1331  ;;  %v1216_v1 = vsel %vm495_vm6, %v1210_v16, %v1212_v34  ;;  %v2000_v30 = vrot.slane %v1264_v2, 4  ;;  %v2002_v21 = vrot.slane %v1266_v20, 4 }
  0xfc   : > { %v1224_v50 = vmul.f32 %v1215_v53, %v3601_v62  ;;  %2819 = vrot.lane.b32.xlu0 %v2818_v39, %s3147_s24  ;;  %v1225_v26 = vmul.f32 %v1216_v1, %v3574_v35  ;;  %v1147_v53 = vmul.f32 0.0, %v1134_v11 }
  0xfd   : > { %2824 = vrot.lane.b32.xlu1 %v2823_v3, %s3136_s10  ;;  %v2843_v39 = vpack.i.bf16 %v2000_v30, %v1999_v42  ;;  %v2001_v3 = vrot.slane %v1265_v24, 4  ;;  %v2003_v24 = vrot.slane %v1267_v61, 4 }
  0xfe   : > { %v2833_v32 = vpack.i.bf16 %v1224_v50, %v1223_v49  ;;  %v1214_v4 = vpop.permute.xlu0 %1213 }
  0xff   : > { %v1217_v36 = vsel %vm495_vm6, %v1212_v34, %v1214_v4  ;;  %v1288_v59 = vpop.permute.xlu1 %1287  ;;  %v1187_v34 = vmul.f32 0.0, %v3649_v40  ;;  %v2848_v2 = vpack.i.bf16 %v2002_v21, %v2001_v3  ;;  %v1227_v1 = vmul.f32 0.0, %v1214_v4 }
 0x100   : > { %v1226_v44 = vmul.f32 %v1217_v36, %v3591_v58  ;;  %2829 = vrot.lane.b32.xlu0 %v2828_v57, %s3136_s10  ;;  %v1343_v36 = vmul.f32 %v3678_v17, %v3578_v45 }
 0x101   : > { %2834 = vrot.lane.b32.xlu1 %v2833_v32, %s3135_s11  ;;  %v1950_v50 = vrot.slane %v1187_v34, 4  ;;  %v1303_v32 = vmul.f32 %v1288_v59, %v3578_v45 }
 0x102   : > { %v2838_v28 = vpack.i.bf16 %v1226_v44, %v1225_v26  ;;  %v1330_v25 = vpop.permute.xlu0 %1329 }
 0x103   : > { %v1292_v16 = vpop.permute.xlu1 %1291  ;;  %v1335_v49 = vsel %vm618_vm7, %v3678_v17, %v1330_v25  ;;  %v1336_v10 = vsel %vm618_vm7, %v1330_v25, %v1332_v48  ;;  %v2052_v25 = vrot.slane %v1343_v36, 4 }
 0x104   : > { %2839 = vrot.lane.b32.xlu0 %v2838_v28, %s3135_s11  ;;  %v1344_v40 = vmul.f32 %v1335_v49, %v3601_v62 }
 0x105   : > { %2844 = vrot.lane.b32.xlu1 %v2843_v39, %s3133_s25  ;;  %v1345_v39 = vmul.f32 %v1336_v10, %v3574_v35 }
 0x106   : > { %v3710_v15 = vpop.permute.xlu0 %1333  ;;  %v2053_v21 = vrot.slane %v1344_v40, 4 }
 0x107   : > { %v1368_v27 = vpop.permute.xlu1 %1367  ;;  %v1337_v57 = vsel %vm618_vm7, %v1332_v48, %v3710_v15 }
 0x108   : > { %2849 = vrot.lane.b32.xlu0 %v2848_v2, %s3133_s25  ;;  %v1346_v26 = vmul.f32 %v1337_v57, %v3591_v58  ;;  %v1383_v61 = vmul.f32 %v1368_v27, %v3578_v45 }
 0x109   : > { %1929 = vrot.lane.b32.xlu1 %v1147_v53, %s3147_s24  ;;  %v2863_v53 = vpack.i.bf16 %v2053_v21, %v2052_v25  ;;  %v374_v21 = vsel %vm4641_vm1, %v3411_v38, %v3439_v51 }
 0x10a   : > { %v1290_v29 = vpop.permute.xlu0 %1289  ;;  %v2055_v3 = vrot.slane %v1346_v26, 4  ;;  %v383_v25 = vmul.f32 %v374_v21, %v3601_v62 }
 0x10b   : > { %v1295_v11 = vsel %vm577_vm8, %v1288_v59, %v1290_v29  ;;  %v1372_v20 = vpop.permute.xlu1 %1371  ;;  %v1296_v4 = vsel %vm577_vm8, %v1290_v29, %v1292_v16 }
 0x10c   : > { %v1304_v30 = vmul.f32 %v1295_v11, %v3601_v62  ;;  %1959 = vrot.lane.b32.xlu0 %v1950_v50, %s3136_s10  ;;  %v1305_v17 = vmul.f32 %v1296_v4, %v3574_v35  ;;  %v2054_v50 = vrot.slane %v1345_v39, 4 }
 0x10d   : > { %1983 = vrot.lane.b32.xlu1 %v1227_v1, %s3135_s11  ;;  %s3150_s11 = smov 112  }
 0x10e   : > { %v2853_v44 = vpack.i.bf16 %v1304_v30, %v1303_v32  ;;  %v1294_v42 = vpop.permute.xlu0 %1293  ;;  %v2868_v40 = vpack.i.bf16 %v2055_v3, %v2054_v50 }
 0x10f   : > { %v1297_v59 = vsel %vm577_vm8, %v1292_v16, %v1294_v42  ;;  %v3731_v28 = vpop.permute.xlu1 %610 }
 0x110   : > { %v1306_v48 = vmul.f32 %v1297_v59, %v3591_v58  ;;  %2012 = vrot.lane.b32.xlu0 %v2003_v24, %s3133_s25  ;;  %v1307_v24 = vmul.f32 0.0, %v1294_v42  ;;  %v375_v59 = vsel %vm4641_vm1, %v3439_v51, %v3422_v43  ;;  %v1347_v42 = vmul.f32 0.0, %v3710_v15  ;;  %s3149_s25 = smov 118  }
 0x111   : > { %2854 = vrot.lane.b32.xlu1 %v2853_v44, %s3132_s20  ;;  %v384_v3 = vmul.f32 %v375_v59, %v3574_v35  ;;  %v1395_v15 = vrot.slane %v383_v25, 4  ;;  %vm1876_vm1 = vcmask 662528  }
 0x112   : > { %v2858_v34 = vpack.i.bf16 %v1306_v48, %v1305_v17  ;;  %v1370_v2 = vpop.permute.xlu0 %1369 }
 0x113   : > { %v1375_v16 = vsel %vm659_vm9, %v1368_v27, %v1370_v2  ;;  %v3739_v49 = vpop.permute.xlu1 %614  ;;  %v1376_v1 = vsel %vm659_vm9, %v1370_v2, %v1372_v20 }
 0x114   : > { %v1384_v29 = vmul.f32 %v1375_v16, %v3601_v62  ;;  %2859 = vrot.lane.b32.xlu0 %v2858_v34, %s3132_s20  ;;  %v1385_v36 = vmul.f32 %v1376_v1, %v3574_v35  ;;  %v2056_v34 = vrot.slane %v1347_v42, 4  ;;  %v1396_v16 = vrot.slane %v384_v3, 4 }
 0x115   : > { %2864 = vrot.lane.b32.xlu1 %v2863_v53, %s3131_s17 }
 0x116   : > { %v2873_v57 = vpack.i.bf16 %v1384_v29, %v1383_v61  ;;  %v3746_v11 = vpop.permute.xlu0 %1373  ;;  %v416_v61 = vsel %vm413_vm4, %v3459_v60, %v3441_v52  ;;  %v457_v29 = vsel %vm454_vm3, %v3477_v5, %v3461_v37 }
 0x117   : > { %v1377_v32 = vsel %vm659_vm9, %v1372_v20, %v3746_v11  ;;  %v3750_v30 = vpop.permute.xlu1 %575 }
 0x118   : > { %v1386_v27 = vmul.f32 %v1377_v32, %v3591_v58  ;;  %2869 = vrot.lane.b32.xlu0 %v2868_v40, %s3131_s17  ;;  %v425_v32 = vmul.f32 %v416_v61, %v3574_v35 }
 0x119   : > { %2874 = vrot.lane.b32.xlu1 %v2873_v57, %s3130_s14  ;;  %v2893_v57 = vpack.i.bf16 %v1396_v16, %v1395_v15  ;;  %v496_v16 = vsel %vm495_vm6, %v3483_v12, %v3469_v0 }
 0x11a   : > { %v2878_v10 = vpack.i.bf16 %v1386_v27, %v1385_v36  ;;  %v3756_v4 = vpop.permute.xlu0 %612  ;;  %v466_v36 = vmul.f32 %v457_v29, %v3574_v35  ;;  %v422_v27 = vmul.f32 0.0, %v3448_v55  ;;  %v426_v29 = vmul.f32 %v3441_v52, %v3591_v58 }
 0x11b   : > { %v3758_v26 = vpop.permute.xlu1 %694  ;;  %v415_v52 = vsel %vm413_vm4, %v3430_v47, %v3459_v60  ;;  %v579_v60 = vsel %vm577_vm8, %v3505_v23, %v3547_v54 }
 0x11c   : > { %2879 = vrot.lane.b32.xlu0 %v2878_v10, %s3130_s14  ;;  %v463_v10 = vmul.f32 0.0, %v3467_v63  ;;  %v2903_v59 = vpack.i.bf16 %v422_v27, %v425_v32  ;;  %v1450_v42 = vrot.slane %v466_v36, 4  ;;  %v414_v36 = vsel %vm413_vm4, %v3448_v55, %v3430_v47 }
 0x11d   : > { %2036 = vrot.lane.b32.xlu1 %v1307_v24, %s3132_s20  ;;  %s3148_s20 = smov 126   ;;  %v456_v55 = vsel %vm454_vm3, %v3450_v56, %v3477_v5  ;;  %v424_v5 = vmul.f32 %v415_v52, %v3601_v62  ;;  %v588_v52 = vmul.f32 %v579_v60, %v3601_v62  ;;  %vm1906_vm4 = vcmask 654336  }
 0x11e   : > { %v3762_v20 = vpop.permute.xlu0 %616 }
 0x11f   : > { %v3764_v44 = vpop.permute.xlu1 %698 }
 0x122   : > { %v3773_v39 = vpop.permute.xlu0 %692 }
 0x123   : > { %v701_v17 = vsel %vm700_vm10, %v3773_v39, %v3758_v26  ;;  %v3778_v48 = vpop.permute.xlu1 %776 }
 0x124   : > { %v710_v38 = vmul.f32 %v701_v17, %v3578_v45  ;;  %v1447_v17 = vrot.slane %v463_v10, 4 }
 0x126   : > { %v1611_v2 = vrot.slane %v710_v38, 4  ;;  %v3783_v53 = vpop.permute.xlu0 %696  ;;  %v2913_v38 = vpack.i.bf16 %v1447_v17, %v1450_v42 }
 0x127   : > { %v3785_v51 = vpop.permute.xlu1 %780 }
 0x128   : > { %v2883_v50 = vpack.i.bf16 %v1611_v2, %v2056_v34  ;;  %v497_v34 = vsel %vm495_vm6, %v3469_v0, %v3493_v18  ;;  %v538_v2 = vsel %vm536_vm5, %v3485_v14, %v3520_v31  ;;  %v505_v0 = vmul.f32 %v496_v16, %v3578_v45 }
 0x129   : > { %v547_v32 = vmul.f32 %v538_v2, %v3601_v62  ;;  %v465_v2 = vmul.f32 %v456_v55, %v3601_v62 }
 0x12a   : > { %v3793_v1 = vpop.permute.xlu0 %774  ;;  %2884 = vrot.lane.b32.xlu0 %v2883_v50, %s3131_s17  ;;  %v537_v50 = vsel %vm536_vm5, %v3503_v22, %v3485_v14  ;;  %v455_v14 = vsel %vm454_vm3, %v3467_v63, %v3450_v56  ;;  %v619_v56 = vsel %vm618_vm7, %v3731_v28, %v3756_v4  ;;  %v620_v63 = vsel %vm618_vm7, %v3756_v4, %v3739_v49 }
 0x12b   : > { %v3796_v40 = vpop.permute.xlu1 %653  ;;  %v546_v27 = vmul.f32 %v537_v50, %v3578_v45  ;;  %v629_v55 = vmul.f32 %v620_v63, %v3601_v62 }
 0x12d   : > { %v1501_v16 = vrot.slane %v546_v27, 4  ;;  %v628_v27 = vmul.f32 %v619_v56, %v3578_v45  ;;  %v1557_v63 = vrot.slane %v629_v55, 4  ;;  %v508_v55 = vmul.f32 %v3479_v9, %v3591_v58 }
 0x12e   : > { %v3802_v24 = vpop.permute.xlu0 %778  ;;  %2894 = vrot.lane.b32.xlu0 %v2893_v57, %s3142_s27  ;;  %v506_v57 = vmul.f32 %v497_v34, %v3601_v62  ;;  %v1387_v34 = vmul.f32 0.0, %v3746_v11 }
 0x12f   : > { %v3805_v21 = vpop.permute.xlu1 %657  ;;  %v1556_v56 = vrot.slane %v628_v27, 4 }
 0x130   : > { %v2923_v17 = vpack.i.bf16 %v506_v57, %v505_v0  ;;  %v464_v57 = vmul.f32 %v455_v14, %v3578_v45  ;;  %v381_v14 = vmul.f32 0.0, %v3428_v46 }
 0x132   : > { %v3807_v25 = vpop.permute.xlu0 %651  ;;  %2904 = vrot.lane.b32.xlu0 %v2903_v59, %s3148_s20 }
 0x133   : > { %v3810_v3 = vpop.permute.xlu1 %735 }
 0x136   : > { %v3818_v15 = vpop.permute.xlu0 %655  ;;  %2914 = vrot.lane.b32.xlu0 %v2913_v38, %s3139_s30  ;;  %v1502_v38 = vrot.slane %v547_v32, 4  ;;  %v578_v32 = vsel %vm577_vm8, %v3530_v41, %v3505_v23 }
 0x137   : > { %v3827_v61 = vpop.permute.xlu1 %739  ;;  %v587_v23 = vmul.f32 %v578_v32, %v3578_v45 }
 0x138   : > { %v2933_v4 = vpack.i.bf16 %v1502_v38, %v1501_v16  ;;  %v1393_v16 = vrot.slane %v381_v14, 4 }
 0x139   : > { %v2943_v60 = vpack.i.bf16 %v588_v52, %v587_v23  ;;  %v539_v52 = vsel %vm536_vm5, %v3520_v31, %v3495_v19 }
 0x13a   : > { %v3838_v10 = vpop.permute.xlu0 %733  ;;  %1430 = vrot.lane.b32.xlu0 %v426_v29, %s3148_s20  ;;  %v423_v29 = vmul.f32 %v414_v36, %v3578_v45  ;;  %v385_v36 = vmul.f32 %v3422_v43, %v3591_v58 }
 0x13b   : > { %v742_v59 = vsel %vm741_vm11, %v3838_v10, %v3810_v3  ;;  %v3853_v42 = vpop.permute.xlu1 %926 }
 0x13c   : > { %v751_v47 = vmul.f32 %v742_v59, %v3578_v45  ;;  %v2898_v59 = vpack.i.bf16 %v424_v5, %v423_v29  ;;  %v1397_v43 = vrot.slane %v385_v36, 4  ;;  %v703_v36 = vsel %vm700_vm10, %v3783_v53, %v3764_v44 }
 0x13e   : > { %v2888_v11 = vpack.i.bf16 %v751_v47, %v1387_v34  ;;  %v3868_v50 = vpop.permute.xlu0 %737  ;;  %2924 = vrot.lane.b32.xlu0 %v2923_v17, %s3137_s18  ;;  %v1449_v17 = vrot.slane %v465_v2, 4  ;;  %v1448_v47 = vrot.slane %v464_v57, 4  ;;  %v2918_v29 = vpack.i.bf16 %v1397_v43, %v1393_v16 }
 0x13f   : > { %v3876_v0 = vpop.permute.xlu1 %815  ;;  %v467_v57 = vmul.f32 %v3461_v37, %v3591_v58  ;;  %v702_v37 = vsel %vm700_vm10, %v3758_v26, %v3783_v53  ;;  %v545_v26 = vmul.f32 0.0, %v3503_v22  ;;  %v660_v53 = vsel %vm659_vm9, %v3807_v25, %v3796_v40 }
 0x140   : > { %2889 = vrot.lane.b32.xlu1 %v2888_v11, %s3130_s14  ;;  %v2908_v46 = vpack.i.bf16 %v1449_v17, %v1448_v47  ;;  %v2953_v11 = vpack.i.bf16 %v1557_v63, %v1556_v56  ;;  %v504_v17 = vmul.f32 0.0, %v3483_v12  ;;  %v590_v47 = vmul.f32 %v3750_v30, %v3591_v58 }
 0x141   : > { %v1451_v31 = vrot.slane %v467_v57, 4  ;;  %v712_v56 = vmul.f32 %v703_v36, %v3574_v35  ;;  %v784_v12 = vsel %vm782_vm12, %v3778_v48, %v3802_v24  ;;  %v783_v57 = vsel %vm782_vm12, %v3793_v1, %v3778_v48 }
 0x142   : > { %v3886_v34 = vpop.permute.xlu0 %924  ;;  %2934 = vrot.lane.b32.xlu0 %v2933_v4, %s3149_s25  ;;  %v498_v4 = vsel %vm495_vm6, %v3493_v18, %v3479_v9  ;;  %v661_v18 = vsel %vm659_vm9, %v3796_v40, %v3818_v15  ;;  %v669_v40 = vmul.f32 %v660_v53, %v3578_v45  ;;  %v586_v48 = vmul.f32 0.0, %v3530_v41 }
 0x143   : > { %v3889_v38 = vpop.permute.xlu1 %819  ;;  %v507_v14 = vmul.f32 %v498_v4, %v3574_v35  ;;  %v670_v63 = vmul.f32 %v661_v18, %v3601_v62 }
 0x144   : > { %2899 = vrot.lane.b32.xlu1 %v2898_v59, %s3148_s20  ;;  %v548_v59 = vmul.f32 %v539_v52, %v3574_v35 }
 0x145   : > { %v2928_v22 = vpack.i.bf16 %v504_v17, %v507_v14  ;;  %v2963_v36 = vpack.i.bf16 %v670_v63, %v669_v40  ;;  %v709_v17 = vmul.f32 0.0, %v3773_v39  ;;  %v549_v39 = vmul.f32 %v3495_v19, %v3591_v58 }
 0x146   : > { %v3892_v5 = vpop.permute.xlu0 %928  ;;  %2944 = vrot.lane.b32.xlu0 %v2943_v60, %s3150_s11  ;;  %v711_v60 = vmul.f32 %v702_v37, %v3601_v62  ;;  %v1503_v43 = vrot.slane %v548_v59, 4  ;;  %v793_v37 = vmul.f32 %v784_v12, %v3601_v62  ;;  %v627_v59 = vmul.f32 0.0, %v3731_v28 }
 0x147   : > { %v3895_v2 = vpop.permute.xlu1 %883  ;;  %v1610_v28 = vrot.slane %v709_v17, 4 }
 0x148   : > { %2909 = vrot.lane.b32.xlu1 %v2908_v46, %s3139_s30  ;;  %v1500_v46 = vrot.slane %v545_v26, 4  ;;  %v1612_v52 = vrot.slane %v711_v60, 4  ;;  %v1665_v53 = vrot.slane %v793_v37, 4 }
 0x14a   : > { %v3900_v32 = vpop.permute.xlu0 %817  ;;  %2954 = vrot.lane.b32.xlu0 %v2953_v11, %s3151_s26  ;;  %v580_v11 = vsel %vm577_vm8, %v3547_v54, %v3750_v30  ;;  %v2938_v18 = vpack.i.bf16 %v1500_v46, %v1503_v43 }
 0x14b   : > { %v3909_v27 = vpop.permute.xlu1 %887  ;;  %v589_v54 = vmul.f32 %v580_v11, %v3574_v35  ;;  %v824_v19 = vsel %vm823_vm13, %v3876_v0, %v3900_v32 }
 0x14c   : > { %2919 = vrot.lane.b32.xlu1 %v2918_v29, %s3142_s27  ;;  %v621_v29 = vsel %vm618_vm7, %v3739_v49, %v3762_v20  ;;  %v792_v49 = vmul.f32 %v783_v57, %v3578_v45 }
 0x14d   : > { %v630_v30 = vmul.f32 %v621_v29, %v3574_v35 }
 0x14e   : > { %v3925_v9 = vpop.permute.xlu0 %821  ;;  %1484 = vrot.lane.b32.xlu0 %v508_v55, %s3137_s18  ;;  %v1613_v55 = vrot.slane %v712_v56, 4  ;;  %v713_v56 = vmul.f32 %v3764_v44, %v3591_v58  ;;  %v1664_v63 = vrot.slane %v792_v49, 4  ;;  %v3989_v44 = vld [vmem:[%s4634_s4 + $0x25] ss:$8 sm:$0xf] }
 0x14f   : > { %v3933_v23 = vpop.permute.xlu1 %889  ;;  %v1558_v60 = vrot.slane %v630_v30, 4  ;;  %v847_v57 = vrot.slane %v3989_v44, %v3219_v8  ;;  %v843_v37 = vrot.slane %v3989_v44, %v3213_v6  ;;  %v662_v8 = vsel %vm659_vm9, %v3818_v15, %v3805_v21 }
 0x150   : > { %1460 = vrot.lane.b32.xlu1 %v1451_v31, %s3139_s30  ;;  %s3152_s30 = smov 110   ;;  %v2973_v26 = vpack.i.bf16 %v1613_v55, %v1612_v52  ;;  %v2983_v43 = vpack.i.bf16 %v1665_v53, %v1664_v63  ;;  %v1614_v46 = vrot.slane %v713_v56, 4  ;;  %v825_v55 = vsel %vm823_vm13, %v3900_v32, %v3889_v38 }
 0x151   : > { %v861_v49 = vmul.f32 %v847_v57, %v3601_v62  ;;  %v672_v32 = vmul.f32 %v3805_v21, %v3591_v58  ;;  %v833_v6 = vmul.f32 %v824_v19, %v3578_v45  ;;  %v671_v17 = vmul.f32 %v662_v8, %v3574_v35 }
 0x152   : > { %v3945_v16 = vpop.permute.xlu0 %885  ;;  %1538 = vrot.lane.b32.xlu0 %v590_v47, %s3150_s11  ;;  %v2948_v47 = vpack.i.bf16 %v586_v48, %v589_v54  ;;  %v2993_v52 = vpack.i.bf16 %v1614_v46, %v1610_v28  ;;  %v834_v48 = vmul.f32 %v825_v55, %v3601_v62  ;;  %v785_v21 = vsel %vm782_vm12, %v3802_v24, %v3785_v51 }
 0x153   : > { %v3957_v4 = vpop.permute.xlu1 %967  ;;  %v744_v53 = vsel %vm741_vm11, %v3868_v50, %v3827_v61  ;;  %v668_v56 = vmul.f32 0.0, %v3807_v25  ;;  %v933_v24 = vsel %vm932_vm14, %v3886_v34, %v3853_v42  ;;  %v855_v57 = vrot.slane %v3989_v44, %v3229_v13 }
 0x154   : > { %2929 = vrot.lane.b32.xlu1 %v2928_v22, %s3137_s18  ;;  %v1555_v22 = vrot.slane %v627_v59, 4  ;;  %s3153_s18 = smov 62   ;;  %v3003_v63 = vpack.i.bf16 %v834_v48, %v833_v6  ;;  %v753_v25 = vmul.f32 %v744_v53, %v3574_v35  ;;  %v941_v19 = vmul.f32 %v3886_v34, %v3578_v45 }
 0x155   : > { %v2968_v28 = vpack.i.bf16 %v668_v56, %v671_v17  ;;  %v942_v55 = vmul.f32 %v933_v24, %v3601_v62  ;;  %v863_v34 = vmul.f32 %v855_v57, %v3591_v58  ;;  %vm1791_vm12 = vcmask 1043456  }
 0x156   : > { %v3964_v31 = vpop.permute.xlu0 %930  ;;  %2964 = vrot.lane.b32.xlu0 %v2963_v36, %s3152_s30  ;;  %v2958_v40 = vpack.i.bf16 %v1555_v22, %v1558_v60  ;;  %v1504_v36 = vrot.slane %v549_v39, 4  ;;  %v1717_v60 = vrot.slane %v861_v49, 4  ;;  %v900_v49 = vmul.f32 %v3895_v2, %v3578_v45 }
 0x157   : > { %v3968_v14 = vpop.permute.xlu1 %2779  ;;  %v1766_v6 = vrot.slane %v941_v19, 4  ;;  %v1767_v48 = vrot.slane %v942_v55, 4 }
 0x158   : > { %2939 = vrot.lane.b32.xlu1 %v2938_v18, %s3149_s25  ;;  %v631_v18 = vmul.f32 %v3762_v20, %v3591_v58  ;;  %v860_v20 = vmul.f32 %v843_v37, %v3578_v45 }
 0x159   : > { %v3033_v53 = vpack.i.bf16 %v1767_v48, %v1766_v6 }
 0x15a   : > { %v3975_v12 = vpop.permute.xlu0 %965  ;;  %2974 = vrot.lane.b32.xlu0 %v2973_v26, %s3131_s17  ;;  %v1559_v59 = vrot.slane %v631_v18, 4  ;;  %v743_v26 = vsel %vm741_vm11, %v3810_v3, %v3868_v50  ;;  %v892_v3 = vsel %vm891_vm15, %v3895_v2, %v3945_v16  ;;  %v1716_v22 = vrot.slane %v860_v20, 4 }
 0x15b   : > { %v3978_v41 = vpop.permute.xlu1 %2789  ;;  %v794_v50 = vmul.f32 %v785_v21, %v3574_v35  ;;  %v901_v37 = vmul.f32 %v892_v3, %v3601_v62  ;;  %v1719_v21 = vrot.slane %v863_v34, 4 }
 0x15c   : > { %2949 = vrot.lane.b32.xlu1 %v2948_v47, %s3150_s11  ;;  %v3013_v46 = vpack.i.bf16 %v1717_v60, %v1716_v22  ;;  %v795_v60 = vmul.f32 %v3785_v51, %v3591_v58  ;;  %v2792_v19 = vunpack.i.h.bf16 %v3978_v41  ;;  %v2791_v55 = vunpack.i.l.bf16 %v3978_v41 }
 0x15d   : > { %v1666_v18 = vrot.slane %v794_v50, 4  ;;  %v3023_v20 = vpack.i.bf16 %v901_v37, %v900_v49  ;;  %v934_v49 = vsel %vm932_vm14, %v3853_v42, %v3892_v5  ;;  %v935_v42 = vsel %vm932_vm14, %v3892_v5, %v3964_v31 }
 0x15e   : > { %v3983_v11 = vpop.permute.xlu0 %969  ;;  %2984 = vrot.lane.b32.xlu0 %v2983_v43, %s3153_s18  ;;  %v752_v43 = vmul.f32 %v743_v26, %v3601_v62  ;;  %v754_v26 = vmul.f32 %v3827_v61, %v3591_v58  ;;  %v836_v61 = vmul.f32 %v3925_v9, %v3591_v58  ;;  %vm1931_vm14 = vcmask 646144  }
 0x15f   : > { %v3991_v29 = vpop.permute.xlu1 %2799 }
 0x160   : > { %2959 = vrot.lane.b32.xlu1 %v2958_v40, %s3151_s26  ;;  %v2978_v8 = vpack.i.bf16 %v753_v25, %v752_v43  ;;  %v2802_v43 = vunpack.i.h.bf16 %v3991_v29  ;;  %v2801_v25 = vunpack.i.l.bf16 %v3991_v29 }
 0x162   : > { %v4006_v54 = vpop.permute.xlu0 %2784  ;;  %2994 = vrot.lane.b32.xlu0 %v2993_v52, %s3131_s17  ;;  %v791_v52 = vmul.f32 0.0, %v3793_v1  ;;  %s3154_s17 = smov 54   ;;  %v1907_v6 = vsel %vm1906_vm4, %v2801_v25, %v2802_v43 }
 0x163   : > { %v4012_v30 = vpop.permute.xlu1 %971  ;;  %v2787_v24 = vunpack.i.h.bf16 %v4006_v54  ;;  %v2786_v3 = vunpack.i.l.bf16 %v4006_v54 }
 0x164   : > { %1513 = vrot.lane.b32.xlu1 %v1504_v36, %s3149_s25  ;;  %v851_v36 = vrot.slane %v3989_v44, %v3216_v7 }
 0x165   : > { %v1854_v37 = vsel %vm823_vm13, %v2786_v3, %v2787_v24 }
 0x166   : > { %v4022_v15 = vpop.permute.xlu0 %2794  ;;  %1593 = vrot.lane.b32.xlu0 %v672_v32, %s3152_s30  ;;  %v1663_v32 = vrot.slane %v791_v52, 4  ;;  %v862_v7 = vmul.f32 %v851_v36, %v3574_v35  ;;  %v1667_v52 = vrot.slane %v795_v60, 4 }
 0x167   : > { %v4034_v47 = vpop.permute.xlu1 %1874 }
 0x168   : > { %1568 = vrot.lane.b32.xlu1 %v1559_v59, %s3151_s26  ;;  %v2988_v44 = vpack.i.bf16 %v1663_v32, %v1666_v18  ;;  %v750_v59 = vmul.f32 0.0, %v3838_v10  ;;  %v1718_v56 = vrot.slane %v862_v7, 4  ;;  %v826_v10 = vsel %vm823_vm13, %v3889_v38, %v3925_v9 }
 0x169   : > { %v975_v38 = vsel %vm973_vm0, %v3957_v4, %v3983_v11  ;;  %v835_v9 = vmul.f32 %v826_v10, %v3574_v35  ;;  %v976_v18 = vsel %vm973_vm0, %v3983_v11, %v4012_v30  ;;  %v986_v32 = vmul.f32 0.0, %v4012_v30 }
 0x16a   : > { %v4047_v39 = vpop.permute.xlu0 %2804  ;;  %3004 = vrot.lane.b32.xlu0 %v3003_v63, %s3128_s8  ;;  %v2998_v63 = vpack.i.bf16 %v754_v26, %v750_v59  ;;  %v4095_v50 = vpack.i.bf16 %v1719_v21, %v1718_v56  ;;  %v893_v11 = vsel %vm891_vm15, %v3945_v16, %v3909_v27  ;;  %v985_v30 = vmul.f32 %v976_v18, %v3591_v58 }
 0x16b   : > { %v4050_v40 = vpop.permute.xlu1 %2814  ;;  %v1877_v16 = vsel %vm1876_vm1, %v2791_v55, %v2792_v19  ;;  %v894_v21 = vsel %vm891_vm15, %v3909_v27, %v3933_v23  ;;  %v902_v27 = vmul.f32 %v893_v11, %v3574_v35  ;;  %v2807_v54 = vunpack.i.h.bf16 %v4047_v39 }
 0x16c   : > { %2969 = vrot.lane.b32.xlu1 %v2968_v28, %s3152_s30  ;;  %v945_v28 = vmul.f32 0.0, %v3964_v31 }
 0x16e   : > { %v4064_v13 = vpop.permute.xlu0 %2809  ;;  %3014 = vrot.lane.b32.xlu0 %v3013_v46, %s3127_s7  ;;  %v832_v46 = vmul.f32 0.0, %v3876_v0  ;;  %v984_v0 = vmul.f32 %v975_v38, %v3574_v35  ;;  %v1770_v34 = vrot.slane %v945_v28, 4  ;;  %v2817_v28 = vunpack.i.h.bf16 %v4050_v40 }
 0x16f   : > { %v4067_v1 = vpop.permute.xlu1 %2824  ;;  %v2811_v57 = vunpack.i.l.bf16 %v4064_v13  ;;  %v2816_v38 = vunpack.i.l.bf16 %v4050_v40 }
 0x170   : > { %2979 = vrot.lane.b32.xlu1 %v2978_v8, %s3130_s14  ;;  %v3008_v48 = vpack.i.bf16 %v832_v46, %v835_v9  ;;  %v2097_v7 = vsel %vm1791_vm12, %v984_v0, %v1854_v37  ;;  %v2827_v26 = vunpack.i.h.bf16 %v4067_v1  ;;  %v2826_v5 = vunpack.i.l.bf16 %v4067_v1 }
 0x171   : > { %v2099_v60 = vsel %vm1791_vm12, %v986_v32, %v2811_v57  ;;  %v903_v1 = vmul.f32 %v894_v21, %v3591_v58 }
 0x172   : > { %v4073_v2 = vpop.permute.xlu0 %1904  ;;  %3024 = vrot.lane.b32.xlu0 %v3023_v20, %s3154_s17  ;;  %v1855_v20 = vsel %vm823_vm13, %v2787_v24, %v2811_v57  ;;  %v943_v24 = vmul.f32 %v934_v49, %v3574_v35  ;;  %v1961_v9 = vsel %vm659_vm9, %v2826_v5, %v2827_v26 }
 0x173   : > { %v4076_v17 = vpop.permute.xlu1 %2834  ;;  %v2098_v10 = vsel %vm1791_vm12, %v985_v30, %v1855_v20  ;;  %v974_v30 = vsel %vm973_vm0, %v3975_v12, %v3957_v4  ;;  %v1910_v41 = vsel %vm1906_vm4, %v2807_v54, %v4073_v2  ;;  %vm1781_vm0 = vcmask 392192  }
 0x174   : > { %2989 = vrot.lane.b32.xlu1 %v2988_v44, %s3153_s18  ;;  %v3058_v37 = vpack.i.bf16 %v2099_v60, %v2098_v10 }
 0x176   : > { %v4088_v22 = vpop.permute.xlu0 %2819  ;;  %3034 = vrot.lane.b32.xlu0 %v3033_v53, %s3155_s29  ;;  %v2100_v53 = vsel %vm1791_vm12, %v1877_v16, %v1907_v6  ;;  %v1768_v16 = vrot.slane %v943_v24, 4  ;;  %v2781_v24 = vunpack.i.l.bf16 %v3968_v14 }
 0x177   : > { %v4093_v51 = vpop.permute.xlu1 %2844  ;;  %v2821_v56 = vunpack.i.l.bf16 %v4088_v22 }
 0x178   : > { %2999 = vrot.lane.b32.xlu1 %v2998_v63, %s3130_s14  ;;  %v3048_v63 = vpack.i.bf16 %v2100_v53, %v2097_v7  ;;  %v2847_v0 = vunpack.i.h.bf16 %v4093_v51 }
 0x179   : > { %v1933_v49 = vsel %vm1931_vm14, %v2817_v28, %v2821_v56 }
 0x17a   : > { %v4112_v36 = vpop.permute.xlu0 %2829  ;;  %1701 = vrot.lane.b32.xlu0 %v836_v61, %s3128_s8  ;;  %v944_v61 = vmul.f32 %v935_v42, %v3591_v58  ;;  %v2782_v42 = vunpack.i.h.bf16 %v3968_v14 }
 0x17b   : > { %v4119_v8 = vpop.permute.xlu1 %1929  ;;  %v2831_v44 = vunpack.i.l.bf16 %v4112_v36 }
 0x17c   : > { %1676 = vrot.lane.b32.xlu1 %v1667_v52, %s3153_s18  ;;  %v1769_v32 = vrot.slane %v944_v61, 4  ;;  %v1853_v53 = vsel %vm823_vm13, %v2782_v42, %v2786_v3  ;;  %v2806_v3 = vunpack.i.l.bf16 %v4047_v39  ;;  %v904_v39 = vmul.f32 0.0, %v3933_v23 }
 0x17d   : > { %v1962_v25 = vsel %vm659_vm9, %v2827_v26, %v2831_v44 }
 0x17e   : > { %v4139_v59 = vpop.permute.xlu0 %2839  ;;  %1779 = vrot.lane.b32.xlu0 %v1770_v34, %s3155_s29  ;;  %v3028_v34 = vpack.i.bf16 %v903_v1, %v902_v27  ;;  %v2106_v6 = vsel %vm1791_vm12, %v1933_v49, %v1962_v25  ;;  %v3038_v10 = vpack.i.bf16 %v1769_v32, %v1768_v16  ;;  %v983_v27 = vmul.f32 %v974_v30, %v3601_v62 }
 0x17f   : > { %v4150_v31 = vpop.permute.xlu1 %1983  ;;  %v2842_v18 = vunpack.i.h.bf16 %v4139_v59  ;;  %v2841_v40 = vunpack.i.l.bf16 %v4139_v59  ;;  %v982_v1 = vmul.f32 %v3975_v12, %v3578_v45  ;;  %v1909_v49 = vsel %vm1906_vm4, %v2806_v3, %v2807_v54 }
 0x180   : > { %3009 = vrot.lane.b32.xlu1 %v3008_v48, %s3128_s8  ;;  %s3156_s8 = smov 47   ;;  %v2837_v48 = vunpack.i.h.bf16 %v4076_v17  ;;  %v2096_v25 = vsel %vm1791_vm12, %v983_v27, %v1853_v53  ;;  %v2822_v53 = vunpack.i.h.bf16 %v4088_v22  ;;  %v2104_v27 = vsel %vm1791_vm12, %v4034_v47, %v4073_v2 }
 0x181   : > { %v1987_v26 = vsel %vm618_vm7, %v2841_v40, %v2842_v18 }
 0x182   : > { %v2850_v46 = vpop.permute.xlu0 %2849  ;;  %3049 = vrot.lane.b32.xlu0 %v3048_v63, %s3156_s8  ;;  %v1986_v21 = vsel %vm618_vm7, %v2837_v48, %v2841_v40 }
 0x183   : > { %v2852_v57 = vunpack.i.h.bf16 %v2850_v46  ;;  %v2851_v52 = vunpack.i.l.bf16 %v2850_v46  ;;  %v4168_v55 = vpop.permute.xlu1 %2854  ;;  %v2797_v46 = vunpack.i.h.bf16 %v4022_v15 }
 0x184   : > { %3019 = vrot.lane.b32.xlu1 %v4095_v50, %s3127_s7  ;;  %v1932_v50 = vsel %vm1931_vm14, %v2816_v38, %v2817_v28  ;;  %v1988_v38 = vsel %vm618_vm7, %v2842_v18, %v4150_v31 }
 0x185   : > { %v2015_v11 = vsel %vm577_vm8, %v2847_v0, %v2851_v52  ;;  %v2016_v20 = vsel %vm577_vm8, %v2851_v52, %v2852_v57  ;;  %v2105_v59 = vsel %vm1791_vm12, %v1932_v50, %v1961_v9  ;;  %v2796_v9 = vunpack.i.l.bf16 %v4022_v15 }
 0x186   : > { %v4184_v7 = vpop.permute.xlu0 %1959  ;;  %3059 = vrot.lane.b32.xlu0 %v3058_v37, %s3156_s8  ;;  %v3068_v5 = vpack.i.bf16 %v2106_v6, %v2105_v59  ;;  %v2111_v4 = vsel %vm1791_vm12, %v1986_v21, %v2015_v11  ;;  %v2112_v63 = vsel %vm1791_vm12, %v1987_v26, %v2016_v20  ;;  %v1908_v15 = vsel %vm1906_vm4, %v2802_v43, %v2806_v3 }
 0x187   : > { %v4201_v60 = vpop.permute.xlu1 %2864  ;;  %v3078_v14 = vpack.i.bf16 %v2112_v63, %v2111_v4  ;;  %v1878_v6 = vsel %vm1876_vm1, %v2792_v19, %v2796_v9  ;;  %v1879_v11 = vsel %vm1876_vm1, %v2796_v9, %v2797_v46  ;;  %v2832_v19 = vunpack.i.h.bf16 %v4112_v36 }
 0x188   : > { %3029 = vrot.lane.b32.xlu1 %v3028_v34, %s3154_s17  ;;  %v2101_v50 = vsel %vm1791_vm12, %v1878_v6, %v1908_v15  ;;  %v1880_v16 = vsel %vm1876_vm1, %v2797_v46, %v4034_v47  ;;  %v2846_v4 = vunpack.i.l.bf16 %v4093_v51  ;;  %v1934_v47 = vsel %vm1931_vm14, %v2821_v56, %v2822_v53 }
 0x189   : > { %v1963_v54 = vsel %vm659_vm9, %v2831_v44, %v2832_v19  ;;  %v1964_v44 = vsel %vm659_vm9, %v2832_v19, %v4184_v7  ;;  %v1935_v51 = vsel %vm1931_vm14, %v2822_v53, %v4119_v8  ;;  %vm1432_vm1 = vcmask 1031168  }
 0x18a   : > { %v2013_v61 = vpop.permute.xlu0 %2012  ;;  %3069 = vrot.lane.b32.xlu0 %v3068_v5, %s3156_s8  ;;  %v2107_v2 = vsel %vm1791_vm12, %v1934_v47, %v1963_v54  ;;  %v2108_v9 = vsel %vm1791_vm12, %v1935_v51, %v1964_v44  ;;  %vm2205_vm14 = vcmask 384000  }
 0x18b   : > { %v2017_v28 = vsel %vm577_vm8, %v2852_v57, %v2013_v61  ;;  %v2114_v52 = vsel %vm1791_vm12, %v4150_v31, %v2013_v61  ;;  %v1852_v57 = vsel %vm823_vm13, %v2781_v24, %v2782_v42  ;;  %v4228_v40 = vpop.permute.xlu1 %2874  ;;  %v2102_v42 = vsel %vm1791_vm12, %v1879_v11, %v1909_v49 }
 0x18c   : > { %3039 = vrot.lane.b32.xlu1 %v3038_v10, %s3155_s29  ;;  %v2113_v12 = vsel %vm1791_vm12, %v1988_v38, %v2017_v28  ;;  %v2095_v18 = vsel %vm1791_vm12, %v982_v1, %v1852_v57  ;;  %v2877_v29 = vunpack.i.h.bf16 %v4228_v40  ;;  %v2876_v43 = vunpack.i.l.bf16 %v4228_v40 }
 0x18d   : > { %v3088_v34 = vpack.i.bf16 %v2114_v52, %v2113_v12  ;;  %v3043_v23 = vpack.i.bf16 %v2096_v25, %v2095_v18  ;;  %v3053_v5 = vpack.i.bf16 %v2102_v42, %v2101_v50  ;;  %v2103_v24 = vsel %vm1791_vm12, %v1880_v16, %v1910_v41 }
 0x18e   : > { %v4224_v37 = vpop.permute.xlu0 %2859  ;;  %3079 = vrot.lane.b32.xlu0 %v3078_v14, %s3156_s8  ;;  %v2091_v63 = vsel %vm454_vm3, %v2876_v43, %v2877_v29  ;;  %v2836_v1 = vunpack.i.l.bf16 %v4076_v17  ;;  %v3063_v28 = vpack.i.bf16 %v2104_v27, %v2103_v24  ;;  %v2014_v38 = vsel %vm577_vm8, %v2846_v4, %v2847_v0  ;;  %v4648_v27 = vld [vmem:[#allocation4_spill] sm:$0xff] }
 0x18f   : > { %v2862_v31 = vunpack.i.h.bf16 %v4224_v37  ;;  %v2861_v32 = vunpack.i.l.bf16 %v4224_v37  ;;  %v2037_v14 = vpop.permute.xlu1 %2036  ;;  %v2109_v17 = vsel %vm1791_vm12, %v4119_v8, %v4184_v7  ;;  %v2867_v0 = vunpack.i.h.bf16 %v4201_v60 }
 0x190   : > { %1749 = vrot.lane.b32.xlu1 %v904_v39, %s3154_s17  ;;  %v1985_v36 = vsel %vm618_vm7, %v2836_v1, %v2837_v48  ;;  %v2866_v48 = vunpack.i.l.bf16 %v4201_v60  ;;  %v2857_v57 = vunpack.i.h.bf16 %v4168_v55  ;;  %v2856_v37 = vunpack.i.l.bf16 %v4168_v55 }
 0x191   : > { %v2040_v21 = vsel %vm536_vm5, %v2861_v32, %v2862_v31  ;;  %v2110_v56 = vsel %vm1791_vm12, %v1985_v36, %v2014_v38  ;;  %v2041_v12 = vsel %vm536_vm5, %v2862_v31, %v2037_v14  ;;  %v3083_v15 = vpack.i.bf16 %v2109_v17, %v2108_v9 }
 0x192   : > { %v2870_v20 = vpop.permute.xlu0 %2869  ;;  %3089 = vrot.lane.b32.xlu0 %v3088_v34, %s3156_s8  ;;  %v3073_v46 = vpack.i.bf16 %v2110_v56, %v2107_v2  ;;  %v2067_v49 = vsel %vm495_vm6, %v2866_v48, %v2867_v0  ;;  %v2039_v34 = vsel %vm536_vm5, %v2857_v57, %v2861_v32  ;;  %v2038_v6 = vsel %vm536_vm5, %v2856_v37, %v2857_v57 }
 0x193   : > { %v2872_v30 = vunpack.i.h.bf16 %v2870_v20  ;;  %v2871_v59 = vunpack.i.l.bf16 %v2870_v20  ;;  %v2115_v43 = vsel %vm1791_vm12, %v2038_v6, %v2067_v49  ;;  %v2812_v1 = vunpack.i.h.bf16 %v4064_v13 }
 0x194   : > { %3044 = vrot.lane.b32.xlu1 %v3043_v23, %s3156_s8  ;;  %vm1515_vm5 = vcmask 965632   ;;  %vm1540_vm7 = vcmask 916480   ;;  %vm1570_vm8 = vcmask 908288  }
 0x195   : > { %v2069_v26 = vsel %vm495_vm6, %v2871_v59, %v2872_v30  ;;  %v2068_v18 = vsel %vm495_vm6, %v2867_v0, %v2871_v59 }
 0x196   : > { %v2117_v10 = vsel %vm1791_vm12, %v2040_v21, %v2069_v26  ;;  %v2880_v3 = vpop.permute.xlu0 %2879  ;;  %v2116_v55 = vsel %vm1791_vm12, %v2039_v34, %v2068_v18 }
 0x197   : > { %v3098_v61 = vpack.i.bf16 %v2091_v63, %v2117_v10  ;;  %v2882_v23 = vunpack.i.h.bf16 %v2880_v3  ;;  %v2881_v31 = vunpack.i.l.bf16 %v2880_v3  ;;  %v3093_v20 = vpack.i.bf16 %v2116_v55, %v2115_v43  ;;  %v4647_v10 = vld [vmem:[#allocation3_spill] sm:$0xff] }
 0x198   : > { %3054 = vrot.lane.b32.xlu1 %v3053_v5, %s3156_s8  ;;  %v340_v24 = vmul.f32 0.0, %v4647_v10 }
 0x199   : > { %3099 = vrot.lane.b32.xlu0 %v3098_v61, %s3156_s8  ;;  %v2092_v50 = vsel %vm454_vm3, %v2877_v29, %v2881_v31  ;;  %v2093_v32 = vsel %vm454_vm3, %v2881_v31, %v2882_v23  ;;  %v4646_v29 = vld [vmem:[#allocation5_spill] sm:$0xff]  ;;  %v332_v61 = vsel %vm331_vm2, %v4647_v10, %v4648_v27 }
 0x19a   : > { %v334_v21 = vsel %vm331_vm2, %v4646_v29, %v3403_v33  ;;  %v333_v54 = vsel %vm331_vm2, %v4648_v27, %v4646_v29  ;;  %v341_v13 = vmul.f32 %v332_v61, %v3578_v45 }
 0x19b   : > { %v343_v3 = vmul.f32 %v334_v21, %v3574_v35  ;;  %v342_v2 = vmul.f32 %v333_v54, %v3601_v62 }
 0x19c   : > { %v4282_v25 = vpop.permute.xlu0 %2884  ;;  %3064 = vrot.lane.b32.xlu1 %v3063_v28, %s3156_s8 }
 0x19d   : > { %v2886_v22 = vunpack.i.l.bf16 %v4282_v25 }
 0x19f   : > { %v2070_v52 = vsel %vm495_vm6, %v2872_v30, %v2886_v22  ;;  %v2119_v39 = vsel %vm1791_vm12, %v2037_v14, %v2886_v22  ;;  %v3103_v30 = vpack.i.bf16 %v2093_v32, %v2092_v50 }
 0x1a0   : > { %v2118_v8 = vsel %vm1791_vm12, %v2041_v12, %v2070_v52  ;;  %3074 = vrot.lane.b32.xlu1 %v3073_v46, %s3156_s8  ;;  %v4303_v7 = vpop.permute.xlu0 %2894 }
 0x1a1   : > { %v3108_v60 = vpack.i.bf16 %v2119_v39, %v2118_v8  ;;  %v2897_v26 = vunpack.i.h.bf16 %v4303_v7  ;;  %v2896_v5 = vunpack.i.l.bf16 %v4303_v7 }
 0x1a3   : > { %3109 = vrot.lane.b32.xlu0 %v3108_v60, %s3156_s8  ;;  %v1409_v36 = vsel %vm823_vm13, %v2812_v1, %v2896_v5  ;;  %v1410_v44 = vsel %vm823_vm13, %v2896_v5, %v2897_v26 }
 0x1a4   : > { %3084 = vrot.lane.b32.xlu1 %v3083_v15, %s3156_s8  ;;  %v4311_v11 = vpop.permute.xlu0 %2904  ;;  %v1793_v45 = vsel %vm1791_vm12, %v341_v13, %v1409_v36  ;;  %v1794_v46 = vsel %vm1791_vm12, %v342_v2, %v1410_v44 }
 0x1a5   : > { %v2906_v14 = vunpack.i.l.bf16 %v4311_v11  ;;  %v2907_v62 = vunpack.i.h.bf16 %v4311_v11 }
 0x1a8   : > { %3094 = vrot.lane.b32.xlu1 %v3093_v20, %s3156_s8  ;;  %v4319_v42 = vpop.permute.xlu0 %2914 }
 0x1a9   : > { %v2917_v51 = vunpack.i.h.bf16 %v4319_v42  ;;  %v2916_v22 = vunpack.i.l.bf16 %v4319_v42 }
 0x1ac   : > { %3104 = vrot.lane.b32.xlu1 %v3103_v30, %s3156_s8  ;;  %v4322_v59 = vpop.permute.xlu0 %1430 }
 0x1ad   : > { %v1436_v32 = vsel %vm1432_vm1, %v2906_v14, %v4322_v59 }
 0x1b0   : > { %v4324_v41 = vpop.permute.xlu0 %2924 }
 0x1b1   : > { %v2927_v42 = vunpack.i.h.bf16 %v4324_v41  ;;  %v2926_v29 = vunpack.i.l.bf16 %v4324_v41 }
 0x1b2   : > { %v4326_v19 = vpop.permute.xlu1 %2889 }
 0x1b3   : > { %v2891_v16 = vunpack.i.l.bf16 %v4326_v19 }
 0x1b4   : > { %v4329_v40 = vpop.permute.xlu0 %2934 }
 0x1b5   : > { %v2094_v53 = vsel %vm454_vm3, %v2882_v23, %v2891_v16  ;;  %v2937_v23 = vunpack.i.h.bf16 %v4329_v40  ;;  %v2936_v31 = vunpack.i.l.bf16 %v4329_v40 }
 0x1b6   : > { %v3113_v4 = vpack.i.bf16 %v2891_v16, %v2094_v53  ;;  %v2900_v63 = vpop.permute.xlu1 %2899  ;;  %v344_v53 = vmul.f32 %v3403_v33, %v3591_v58  ;;  %v1487_v58 = vsel %vm700_vm10, %v2926_v29, %v2927_v42 }
 0x1b7   : > { %v2902_v28 = vunpack.i.h.bf16 %v2900_v63  ;;  %v2901_v38 = vunpack.i.l.bf16 %v2900_v63 }
 0x1b8   : > { %3114 = vrot.lane.b32.xlu1 %v3113_v4, %s3156_s8  ;;  %v4347_v47 = vpop.permute.xlu0 %2944 }
 0x1b9   : > { %v1434_v0 = vsel %vm1432_vm1, %v2901_v38, %v2902_v28  ;;  %v1435_v9 = vsel %vm1432_vm1, %v2902_v28, %v2906_v14  ;;  %v1433_v55 = vsel %vm1432_vm1, %v2907_v62, %v2901_v38  ;;  %v2947_v11 = vunpack.i.h.bf16 %v4347_v47 }
 0x1ba   : > { %v2910_v35 = vpop.permute.xlu1 %2909  ;;  %v2946_v43 = vunpack.i.l.bf16 %v4347_v47  ;;  %vm2458_vm1 = vcmask 1045504  }
 0x1bb   : > { %v2912_v56 = vunpack.i.h.bf16 %v2910_v35  ;;  %v2911_v17 = vunpack.i.l.bf16 %v2910_v35 }
 0x1bc   : > { %v4358_v48 = vpop.permute.xlu0 %2954  ;;  %v1542_v27 = vsel %vm1540_vm7, %v2946_v43, %v2947_v11 }
 0x1bd   : > { %v1462_v12 = vsel %vm741_vm11, %v2917_v51, %v2911_v17  ;;  %v1463_v52 = vsel %vm741_vm11, %v2911_v17, %v2912_v56  ;;  %v1464_v39 = vsel %vm741_vm11, %v2912_v56, %v2916_v22  ;;  %v2957_v57 = vunpack.i.h.bf16 %v4358_v48 }
 0x1be   : > { %v2956_v37 = vunpack.i.l.bf16 %v4358_v48  ;;  %v2920_v18 = vpop.permute.xlu1 %2919  ;;  %v1798_v8 = vsel %vm1791_vm12, %v1434_v0, %v1463_v52  ;;  %v1799_v7 = vsel %vm1791_vm12, %v1435_v9, %v1464_v39  ;;  %v1797_v40 = vsel %vm1791_vm12, %v1433_v55, %v1462_v12 }
 0x1bf   : > { %v2922_v60 = vunpack.i.h.bf16 %v2920_v18  ;;  %v2921_v15 = vunpack.i.l.bf16 %v2920_v18  ;;  %v2261_v49 = vpack.c.bf16 %v1798_v8, %v1793_v45  ;;  %v2262_v34 = vpack.c.bf16 %v1799_v7, %v1794_v46 }
 0x1c0   : > { %v4373_v6 = vpop.permute.xlu0 %1484  ;;  %v1572_v21 = vsel %vm1570_vm8, %v2956_v37, %v2957_v57 }
 0x1c1   : > { %v1408_v20 = vsel %vm823_vm13, %v2921_v15, %v2812_v1  ;;  %v1411_v50 = vsel %vm823_vm13, %v2897_v26, %v2922_v60  ;;  %2333 = vrot.lane.b32.xlu0 %v2261_v49, %s3136_s10  ;;  %2335 = vrot.lane.b32.xlu1 %v2262_v34, %s3136_s10  ;;  %v1796_v1 = vsel %vm1791_vm12, %v344_v53, %v2922_v60  ;;  %vm1751_vm13 = vcmask 441344  }
 0x1c2   : > { %v1461_v30 = vpop.permute.xlu1 %1460  ;;  %v1792_v16 = vsel %vm1791_vm12, %v340_v24, %v1408_v20  ;;  %v1795_v4 = vsel %vm1791_vm12, %v343_v3, %v1411_v50  ;;  %v1517_v24 = vsel %vm1515_vm5, %v2936_v31, %v2937_v23  ;;  %v1808_v33 = vsel %vm1791_vm12, %v1542_v27, %v1572_v21 }
 0x1c3   : > { %v1465_v26 = vsel %vm741_vm11, %v2916_v22, %v1461_v30  ;;  %v2260_v5 = vpack.c.bf16 %v1797_v40, %v1792_v16  ;;  %v1801_v10 = vsel %vm1791_vm12, %v4322_v59, %v1461_v30  ;;  %v1803_v59 = vsel %vm1791_vm12, %v1487_v58, %v1517_v24 }
 0x1c4   : > { %v1800_v63 = vsel %vm1791_vm12, %v1436_v32, %v1465_v26  ;;  %v1539_v41 = vpop.permute.xlu0 %1538  ;;  %v2264_v3 = vpack.c.bf16 %v1801_v10, %v1796_v1  ;;  %v2266_v38 = vpack.c.bf16 %v1808_v33, %v1803_v59  ;;  %vm1678_vm11 = vcmask 506880  }
 0x1c5   : > { %v2263_v61 = vpack.c.bf16 %v1800_v63, %v1795_v4  ;;  %2331 = vrot.lane.b32.xlu0 %v2260_v5, %s3136_s10  ;;  %v2887_v4 = vunpack.i.h.bf16 %v4282_v25  ;;  %v2892_v24 = vunpack.i.h.bf16 %v4326_v19 }
 0x1c6   : > { %v2930_v54 = vpop.permute.xlu1 %2929 }
 0x1c7   : > { %2337 = vrot.lane.b32.xlu1 %v2263_v61, %s3136_s10  ;;  %v2932_v22 = vunpack.i.h.bf16 %v2930_v54  ;;  %v2931_v56 = vunpack.i.l.bf16 %v2930_v54 }
 0x1c8   : > { %v4406_v28 = vpop.permute.xlu0 %2964 }
 0x1c9   : > { %2339 = vrot.lane.b32.xlu0 %v2264_v3, %s3136_s10  ;;  %v1486_v8 = vsel %vm700_vm10, %v2932_v22, %v2926_v29  ;;  %v1488_v7 = vsel %vm700_vm10, %v2927_v42, %v2931_v56  ;;  %v2966_v5 = vunpack.i.l.bf16 %v4406_v28 }
 0x1ca   : > { %v2940_v47 = vpop.permute.xlu1 %2939 }
 0x1cb   : > { %2343 = vrot.lane.b32.xlu1 %v2266_v38, %s3136_s10  ;;  %v2942_v44 = vunpack.i.h.bf16 %v2940_v47  ;;  %v2941_v13 = vunpack.i.l.bf16 %v2940_v47 }
 0x1cc   : > { %v4411_v2 = vpop.permute.xlu0 %2974 }
 0x1cd   : > { %v1516_v45 = vsel %vm1515_vm5, %v2942_v44, %v2936_v31  ;;  %v1518_v46 = vsel %vm1515_vm5, %v2937_v23, %v2941_v13  ;;  %v2976_v26 = vunpack.i.l.bf16 %v4411_v2  ;;  %v2977_v33 = vunpack.i.h.bf16 %v4411_v2 }
 0x1ce   : > { %v2950_v36 = vpop.permute.xlu1 %2949  ;;  %v1804_v34 = vsel %vm1791_vm12, %v1488_v7, %v1518_v46  ;;  %v1802_v23 = vsel %vm1791_vm12, %v1486_v8, %v1516_v45 }
 0x1cf   : > { %v2952_v35 = vunpack.i.h.bf16 %v2950_v36  ;;  %v2951_v51 = vunpack.i.l.bf16 %v2950_v36  ;;  %v1626_v27 = vsel %vm495_vm6, %v2887_v4, %v2976_v26 }
 0x1d0   : > { %v4413_v14 = vpop.permute.xlu0 %2984 }
 0x1d1   : > { %v1541_v12 = vsel %vm1540_vm7, %v2952_v35, %v2946_v43  ;;  %v1543_v52 = vsel %vm1540_vm7, %v2947_v11, %v2951_v51  ;;  %v1544_v20 = vsel %vm1540_vm7, %v2951_v51, %v1539_v41  ;;  %v2987_v63 = vunpack.i.h.bf16 %v4413_v14 }
 0x1d2   : > { %v2960_v17 = vpop.permute.xlu1 %2959  ;;  %v2986_v10 = vunpack.i.l.bf16 %v4413_v14  ;;  %v1627_v35 = vsel %vm495_vm6, %v2976_v26, %v2977_v33 }
 0x1d3   : > { %v2962_v62 = vunpack.i.h.bf16 %v2960_v17  ;;  %v2961_v0 = vunpack.i.l.bf16 %v2960_v17 }
 0x1d4   : > { %v4417_v9 = vpop.permute.xlu0 %2994  ;;  %v1680_v25 = vsel %vm1678_vm11, %v2986_v10, %v2987_v63 }
 0x1d5   : > { %v1571_v39 = vsel %vm1570_vm8, %v2962_v62, %v2956_v37  ;;  %v1573_v18 = vsel %vm1570_vm8, %v2957_v57, %v2961_v0  ;;  %v1489_v57 = vsel %vm700_vm10, %v2931_v56, %v4373_v6  ;;  %vm1595_vm10 = vcmask 900096  }
 0x1d6   : > { %v1514_v60 = vpop.permute.xlu1 %1513  ;;  %v1809_v15 = vsel %vm1791_vm12, %v1543_v52, %v1573_v18  ;;  %v1807_v49 = vsel %vm1791_vm12, %v1541_v12, %v1571_v39  ;;  %v2996_v3 = vunpack.i.l.bf16 %v4417_v9  ;;  %v2997_v38 = vunpack.i.h.bf16 %v4417_v9 }
 0x1d7   : > { %v2267_v37 = vpack.c.bf16 %v1809_v15, %v1804_v34  ;;  %v2265_v55 = vpack.c.bf16 %v1807_v49, %v1802_v23  ;;  %v1519_v48 = vsel %vm1515_vm5, %v2941_v13, %v1514_v60  ;;  %v1806_v43 = vsel %vm1791_vm12, %v4373_v6, %v1514_v60 }
 0x1d8   : > { %v4433_v31 = vpop.permute.xlu0 %1593  ;;  %v1805_v42 = vsel %vm1791_vm12, %v1489_v57, %v1519_v48  ;;  %v2967_v6 = vunpack.i.h.bf16 %v4406_v28  ;;  %v1625_v22 = vsel %vm495_vm6, %v2996_v3, %v2887_v4  ;;  %vm2454_vm5 = vcmask 883712  }
 0x1d9   : > { %2345 = vrot.lane.b32.xlu0 %v2267_v37, %s3136_s10  ;;  %2341 = vrot.lane.b32.xlu1 %v2265_v55, %s3136_s10 }
 0x1da   : > { %v1569_v11 = vpop.permute.xlu1 %1568  ;;  %v1597_v54 = vsel %vm1595_vm10, %v2966_v5, %v2967_v6 }
 0x1db   : > { %v1574_v50 = vsel %vm1570_vm8, %v2961_v0, %v1569_v11  ;;  %v1811_v32 = vsel %vm1791_vm12, %v1539_v41, %v1569_v11  ;;  %v1813_v36 = vsel %vm1791_vm12, %v1597_v54, %v1626_v27  ;;  %v1628_v0 = vsel %vm495_vm6, %v2977_v33, %v2997_v38 }
 0x1dc   : > { %v1810_v30 = vsel %vm1791_vm12, %v1544_v20, %v1574_v50  ;;  %v2269_v16 = vpack.c.bf16 %v1811_v32, %v1806_v43  ;;  %v4447_v40 = vpop.permute.xlu0 %3004 }
 0x1dd   : > { %v2268_v29 = vpack.c.bf16 %v1810_v30, %v1805_v42  ;;  %v3007_v48 = vunpack.i.h.bf16 %v4447_v40  ;;  %v3006_v57 = vunpack.i.l.bf16 %v4447_v40 }
 0x1de   : > { %v2970_v21 = vpop.permute.xlu1 %2969  ;;  %2349 = vrot.lane.b32.xlu1 %v2269_v16, %s3136_s10 }
 0x1df   : > { %2347 = vrot.lane.b32.xlu0 %v2268_v29, %s3136_s10  ;;  %v2971_v61 = vunpack.i.l.bf16 %v2970_v21  ;;  %v2972_v19 = vunpack.i.h.bf16 %v2970_v21 }
 0x1e0   : > { %v4454_v53 = vpop.permute.xlu0 %3014 }
 0x1e1   : > { %v1598_v13 = vsel %vm1595_vm10, %v2967_v6, %v2971_v61  ;;  %v1596_v45 = vsel %vm1595_vm10, %v2972_v19, %v2966_v5  ;;  %v1599_v7 = vsel %vm1595_vm10, %v2971_v61, %v4433_v31  ;;  %v3017_v60 = vunpack.i.h.bf16 %v4454_v53 }
 0x1e2   : > { %v2980_v41 = vpop.permute.xlu1 %2979  ;;  %v1814_v9 = vsel %vm1791_vm12, %v1598_v13, %v1627_v35  ;;  %v3016_v15 = vunpack.i.l.bf16 %v4454_v53  ;;  %v1812_v43 = vsel %vm1791_vm12, %v1596_v45, %v1625_v22  ;;  %v1815_v16 = vsel %vm1791_vm12, %v1599_v7, %v1628_v0 }
 0x1e3   : > { %v2981_v1 = vunpack.i.l.bf16 %v2980_v41  ;;  %v2982_v28 = vunpack.i.h.bf16 %v2980_v41  ;;  %v1816_v5 = vsel %vm1791_vm12, %v4433_v31, %v2997_v38 }
 0x1e4   : > { %v4463_v58 = vpop.permute.xlu0 %3024  ;;  %v1728_v21 = vsel %vm331_vm2, %v3016_v15, %v3017_v60 }
 0x1e5   : > { %v1650_v59 = vsel %vm454_vm3, %v2892_v24, %v2981_v1  ;;  %v1651_v56 = vsel %vm454_vm3, %v2981_v1, %v2982_v28  ;;  %v3027_v34 = vunpack.i.h.bf16 %v4463_v58  ;;  %v3026_v23 = vunpack.i.l.bf16 %v4463_v58 }
 0x1e6   : > { %v2990_v47 = vpop.permute.xlu1 %2989  ;;  %v1818_v44 = vsel %vm1791_vm12, %v1650_v59, %v1680_v25 }
 0x1e7   : > { %v2991_v2 = vunpack.i.l.bf16 %v2990_v47  ;;  %v2271_v14 = vpack.c.bf16 %v1818_v44, %v1813_v36  ;;  %v2992_v17 = vunpack.i.h.bf16 %v2990_v47  ;;  %v1752_v26 = vsel %vm1751_vm13, %v3026_v23, %v3027_v34 }
 0x1e8   : > { %v4473_v51 = vpop.permute.xlu0 %3034 }
 0x1e9   : > { %v1681_v62 = vsel %vm1678_vm11, %v2987_v63, %v2991_v2  ;;  %2353 = vrot.lane.b32.xlu0 %v2271_v14, %s3136_s10  ;;  %v3037_v52 = vunpack.i.h.bf16 %v4473_v51  ;;  %v3036_v39 = vunpack.i.l.bf16 %v4473_v51  ;;  %v1679_v37 = vsel %vm1678_vm11, %v2992_v17, %v2986_v10 }
 0x1ea   : > { %v3000_v46 = vpop.permute.xlu1 %2999  ;;  %v1819_v12 = vsel %vm1791_vm12, %v1651_v56, %v1681_v62 }
 0x1eb   : > { %v3002_v18 = vunpack.i.h.bf16 %v3000_v46  ;;  %v3001_v8 = vunpack.i.l.bf16 %v3000_v46  ;;  %v2272_v49 = vpack.c.bf16 %v1819_v12, %v1814_v9  ;;  %v1782_v50 = vsel %vm1781_vm0, %v3036_v39, %v3037_v52 }
 0x1ec   : > { %v1702_v53 = vpop.permute.xlu0 %1701  ;;  %v1828_v63 = vsel %vm1791_vm12, %v1752_v26, %v1782_v50  ;;  %v1827_v33 = vsel %vm1791_vm12, %v3026_v23, %v3036_v39 }
 0x1ed   : > { %v1649_v55 = vsel %vm454_vm3, %v3001_v8, %v2892_v24  ;;  %2355 = vrot.lane.b32.xlu1 %v2272_v49, %s3136_s10  ;;  %v1652_v32 = vsel %vm454_vm3, %v2982_v28, %v3002_v18  ;;  %vm4649_vm3 = vcmask 457728  }
 0x1ee   : > { %v1677_v11 = vpop.permute.xlu1 %1676  ;;  %v1817_v20 = vsel %vm1791_vm12, %v1649_v55, %v1679_v37  ;;  %v1704_v10 = vsel %vm4649_vm3, %v3006_v57, %v3007_v48  ;;  %vm4650_vm6 = vmmov %vm4649_vm3 }
 0x1ef   : > { %v1682_v42 = vsel %vm1678_vm11, %v2991_v2, %v1677_v11  ;;  %v2270_v30 = vpack.c.bf16 %v1817_v20, %v1812_v43  ;;  %v1821_v40 = vsel %vm1791_vm12, %v3002_v18, %v1677_v11  ;;  %v1823_v27 = vsel %vm1791_vm12, %v1704_v10, %v1728_v21  ;;  %vm4651_vm4 = vmmov %vm4649_vm3 }
 0x1f0   : > { %v1820_v29 = vsel %vm1791_vm12, %v1652_v32, %v1682_v42  ;;  %v2274_v41 = vpack.c.bf16 %v1821_v40, %v1816_v5  ;;  %v2276_v1 = vpack.c.bf16 %v1828_v63, %v1823_v27  ;;  %v1780_v58 = vpop.permute.xlu0 %1779 }
 0x1f1   : > { %v2273_v6 = vpack.c.bf16 %v1820_v29, %v1815_v16  ;;  %2351 = vrot.lane.b32.xlu0 %v2270_v30, %s3136_s10 }
 0x1f2   : > { %v3010_v4 = vpop.permute.xlu1 %3009 }
 0x1f3   : > { %v3012_v24 = vunpack.i.h.bf16 %v3010_v4  ;;  %2357 = vrot.lane.b32.xlu1 %v2273_v6, %s3136_s10  ;;  %v3011_v59 = vunpack.i.l.bf16 %v3010_v4 }
 0x1f4   : > { %v3050_v19 = vpop.permute.xlu0 %3049 }
 0x1f5   : > { %v1703_v61 = vsel %vm4650_vm6, %v3012_v24, %v3006_v57  ;;  %2359 = vrot.lane.b32.xlu0 %v2274_v41, %s3136_s10  ;;  %v1705_v35 = vsel %vm4651_vm4, %v3007_v48, %v3011_v59  ;;  %v3052_v11 = vunpack.i.h.bf16 %v3050_v19  ;;  %v3051_v43 = vunpack.i.l.bf16 %v3050_v19 }
 0x1f6   : > { %v3020_v54 = vpop.permute.xlu1 %3019  ;;  %v1822_v31 = vsel %vm1791_vm12, %v1703_v61, %v3016_v15 }
 0x1f7   : > { %2363 = vrot.lane.b32.xlu1 %v2276_v1, %s3136_s10  ;;  %v2275_v25 = vpack.c.bf16 %v1827_v33, %v1822_v31  ;;  %v3021_v28 = vunpack.i.l.bf16 %v3020_v54  ;;  %v3022_v47 = vunpack.i.h.bf16 %v3020_v54 }
 0x1f8   : > { %v3060_v18 = vpop.permute.xlu0 %3059 }
 0x1f9   : > { %v1729_v44 = vsel %vm331_vm2, %v3017_v60, %v3021_v28  ;;  %v1730_v17 = vsel %vm331_vm2, %v3021_v28, %v3022_v47  ;;  %v1826_v8 = vsel %vm1791_vm12, %v1702_v53, %v3022_v47  ;;  %vm4652_vm2 = vmmov %vm4649_vm3  ;;  %v3061_v32 = vunpack.i.l.bf16 %v3060_v18 }
 0x1fa   : > { %v3030_v3 = vpop.permute.xlu1 %3029  ;;  %v1824_v0 = vsel %vm1791_vm12, %v1705_v35, %v1729_v44  ;;  %v1706_v60 = vsel %vm4652_vm2, %v3011_v59, %v1702_v53  ;;  %v3062_v53 = vunpack.i.h.bf16 %v3060_v18 }
 0x1fb   : > { %2361 = vrot.lane.b32.xlu1 %v2275_v25, %s3136_s10  ;;  %v3031_v38 = vunpack.i.l.bf16 %v3030_v3  ;;  %v3032_v13 = vunpack.i.h.bf16 %v3030_v3  ;;  %v2208_v63 = vsel %vm2205_vm14, %v3051_v43, %v3061_v32 }
 0x1fc   : > { %v3070_v48 = vpop.permute.xlu0 %3069  ;;  %v2209_v25 = vsel %vm2205_vm14, %v3061_v32, %v3062_v53 }
 0x1fd   : > { %v1753_v51 = vsel %vm1751_vm13, %v3027_v34, %v3031_v38  ;;  %v1754_v46 = vsel %vm1751_vm13, %v3031_v38, %v3032_v13  ;;  %v1825_v34 = vsel %vm1791_vm12, %v1706_v60, %v1730_v17  ;;  %v3072_v10 = vunpack.i.h.bf16 %v3070_v48 }
 0x1fe   : > { %v3040_v36 = vpop.permute.xlu1 %3039  ;;  %v3071_v41 = vunpack.i.l.bf16 %v3070_v48 }
 0x1ff   : > { %v3042_v2 = vunpack.i.h.bf16 %v3040_v36  ;;  %v3041_v14 = vunpack.i.l.bf16 %v3040_v36 }
 0x200   : > { %v3080_v4 = vpop.permute.xlu0 %3079  ;;  %v2214_v3 = vsel %vm2205_vm14, %v3071_v41, %v3072_v10 }
 0x201   : > { %v1783_v22 = vsel %vm1781_vm0, %v3037_v52, %v3041_v14  ;;  %v1784_v56 = vsel %vm1781_vm0, %v3041_v14, %v3042_v2  ;;  %v1785_v12 = vsel %vm1781_vm0, %v3042_v2, %v1780_v58  ;;  %v3081_v54 = vunpack.i.l.bf16 %v3080_v4 }
 0x202   : > { %v1750_v62 = vpop.permute.xlu1 %1749  ;;  %v1829_v45 = vsel %vm1791_vm12, %v1753_v51, %v1783_v22  ;;  %v1830_v7 = vsel %vm1791_vm12, %v1754_v46, %v1784_v56  ;;  %v3082_v28 = vunpack.i.h.bf16 %v3080_v4 }
 0x203   : > { %v1755_v9 = vsel %vm1751_vm13, %v3032_v13, %v1750_v62  ;;  %v2277_v39 = vpack.c.bf16 %v1829_v45, %v1824_v0  ;;  %v2278_v23 = vpack.c.bf16 %v1830_v7, %v1825_v34 }
 0x204   : > { %v1831_v52 = vsel %vm1791_vm12, %v1755_v9, %v1785_v12  ;;  %v3090_v38 = vpop.permute.xlu0 %3089  ;;  %v2219_v14 = vsel %vm2205_vm14, %v3081_v54, %v3082_v28 }
 0x205   : > { %v2279_v15 = vpack.c.bf16 %v1831_v52, %v1826_v8  ;;  %2365 = vrot.lane.b32.xlu0 %v2277_v39, %s3136_s10  ;;  %v3092_v35 = vunpack.i.h.bf16 %v3090_v38  ;;  %v3091_v51 = vunpack.i.l.bf16 %v3090_v38 }
 0x206   : > { %v3045_v49 = vpop.permute.xlu1 %3044 }
 0x207   : > { %2369 = vrot.lane.b32.xlu1 %v2279_v15, %s3136_s10  ;;  %v3047_v37 = vunpack.i.h.bf16 %v3045_v49  ;;  %v3046_v55 = vunpack.i.l.bf16 %v3045_v49  ;;  %v2220_v46 = vsel %vm2205_vm14, %v3082_v28, %v3091_v51  ;;  %v2221_v9 = vsel %vm2205_vm14, %v3091_v51, %v3092_v35 }
 0x209   : > { %2367 = vrot.lane.b32.xlu0 %v2278_v23, %s3136_s10  ;;  %v2206_v42 = vsel %vm2205_vm14, %v3046_v55, %v3047_v37  ;;  %v2207_v30 = vsel %vm2205_vm14, %v3047_v37, %v3051_v43  ;;  %v2280_v27 = vpack.c.bf16 %v3052_v11, %v3046_v55 }
 0x20a   : > { %v3055_v57 = vpop.permute.xlu1 %3054 }
 0x20b   : > { %v3057_v20 = vunpack.i.h.bf16 %v3055_v57  ;;  %v3056_v50 = vunpack.i.l.bf16 %v3055_v57  ;;  %v3100_v45 = vpop.permute.xlu0 %3099 }
 0x20c   : > { %v3102_v7 = vunpack.i.h.bf16 %v3100_v45  ;;  %v3101_v55 = vunpack.i.l.bf16 %v3100_v45 }
 0x20d   : > { %v2210_v16 = vsel %vm2205_vm14, %v3052_v11, %v3056_v50  ;;  %v2211_v29 = vsel %vm2205_vm14, %v3056_v50, %v3057_v20 }
 0x20e   : > { %v2281_v40 = vpack.c.bf16 %v2210_v16, %v2206_v42  ;;  %v2282_v21 = vpack.c.bf16 %v2211_v29, %v2207_v30  ;;  %v3065_v26 = vpop.permute.xlu1 %3064 }
 0x20f   : > { %v3067_v6 = vunpack.i.h.bf16 %v3065_v26  ;;  %v3066_v5 = vunpack.i.l.bf16 %v3065_v26 }
 0x210   : > { %2373 = vrot.lane.b32.xlu0 %v2281_v40, %s3136_s10  ;;  %2375 = vrot.lane.b32.xlu1 %v2282_v21, %s3136_s10 }
 0x211   : > { %v2212_v24 = vsel %vm2205_vm14, %v3057_v20, %v3066_v5  ;;  %v2213_v31 = vsel %vm2205_vm14, %v3066_v5, %v3067_v6 }
 0x212   : > { %v2283_v61 = vpack.c.bf16 %v2212_v24, %v2208_v63  ;;  %v3075_v1 = vpop.permute.xlu1 %3074  ;;  %v2284_v19 = vpack.c.bf16 %v2213_v31, %v2209_v25 }
 0x213   : > { %v3077_v33 = vunpack.i.h.bf16 %v3075_v1  ;;  %v3076_v58 = vunpack.i.l.bf16 %v3075_v1 }
 0x214   : > { %2371 = vrot.lane.b32.xlu0 %v2280_v27, %s3136_s10  ;;  %2377 = vrot.lane.b32.xlu1 %v2283_v61, %s3136_s10 }
 0x215   : > { %v2218_v59 = vsel %vm2205_vm14, %v3077_v33, %v3081_v54  ;;  %v2215_v44 = vsel %vm2205_vm14, %v3072_v10, %v3076_v58  ;;  %v2285_v22 = vpack.c.bf16 %v3077_v33, %v3071_v41  ;;  %v3110_v11 = vpop.permute.xlu0 %3109 }
 0x216   : > { %v2286_v47 = vpack.c.bf16 %v2218_v59, %v2214_v3  ;;  %v3085_v36 = vpop.permute.xlu1 %3084  ;;  %v2287_v56 = vpack.c.bf16 %v2219_v14, %v2215_v44  ;;  %v3112_v20 = vunpack.i.h.bf16 %v3110_v11  ;;  %v3111_v50 = vunpack.i.l.bf16 %v3110_v11 }
 0x217   : > { %v3087_v13 = vunpack.i.h.bf16 %v3085_v36  ;;  %v3086_v2 = vunpack.i.l.bf16 %v3085_v36 }
 0x218   : > { %2379 = vrot.lane.b32.xlu0 %v2284_v19, %s3136_s10  ;;  %2383 = vrot.lane.b32.xlu1 %v2286_v47, %s3136_s10  ;;  %v2224_v16 = vsel %vm2205_vm14, %v3101_v55, %v3111_v50  ;;  %v2225_v29 = vsel %vm2205_vm14, %v3111_v50, %v3112_v20 }
 0x219   : > { %v2216_v62 = vsel %vm2205_vm14, %v3076_v58, %v3086_v2  ;;  %v2217_v0 = vsel %vm2205_vm14, %v3086_v2, %v3087_v13 }
 0x21a   : > { %v3095_v17 = vpop.permute.xlu1 %3094  ;;  %v2288_v18 = vpack.c.bf16 %v2220_v46, %v2216_v62  ;;  %v2289_v8 = vpack.c.bf16 %v2221_v9, %v2217_v0 }
 0x21b   : > { %v3097_v12 = vunpack.i.h.bf16 %v3095_v17  ;;  %v3096_v39 = vunpack.i.l.bf16 %v3095_v17 }
 0x21c   : > { %2385 = vrot.lane.b32.xlu0 %v2287_v56, %s3136_s10  ;;  %2381 = vrot.lane.b32.xlu1 %v2285_v22, %s3136_s10 }
 0x21d   : > { %v2222_v49 = vsel %vm2205_vm14, %v3096_v39, %v3097_v12  ;;  %v2290_v23 = vpack.c.bf16 %v3102_v7, %v3096_v39  ;;  %v2223_v57 = vsel %vm2205_vm14, %v3097_v12, %v3101_v55 }
 0x21e   : > { %v3105_v52 = vpop.permute.xlu1 %3104 }
 0x21f   : > { %v3107_v60 = vunpack.i.h.bf16 %v3105_v52  ;;  %v3106_v15 = vunpack.i.l.bf16 %v3105_v52 }
 0x220   : > { %2387 = vrot.lane.b32.xlu0 %v2288_v18, %s3136_s10  ;;  %2389 = vrot.lane.b32.xlu1 %v2289_v8, %s3136_s10 }
 0x221   : > { %v2226_v34 = vsel %vm2205_vm14, %v3102_v7, %v3106_v15  ;;  %v2227_v48 = vsel %vm2205_vm14, %v3106_v15, %v3107_v60 }
 0x222   : > { %v2291_v37 = vpack.c.bf16 %v2226_v34, %v2222_v49  ;;  %v2292_v43 = vpack.c.bf16 %v2227_v48, %v2223_v57 }
 0x224   : > { %2391 = vrot.lane.b32.xlu0 %v2290_v23, %s3136_s10  ;;  %2393 = vrot.lane.b32.xlu1 %v2291_v37, %s3136_s10 }
 0x228   : > { %2395 = vrot.lane.b32.xlu0 %v2292_v43, %s3136_s10 }
 0x22a   : > { %v3115_v32 = vpop.permute.xlu1 %3114 }
 0x22b   : > { %v3117_v42 = vunpack.i.h.bf16 %v3115_v32  ;;  %v3116_v30 = vunpack.i.l.bf16 %v3115_v32 }
 0x22d   : > { %v2228_v40 = vsel %vm2205_vm14, %v3107_v60, %v3116_v30  ;;  %v2229_v21 = vsel %vm2205_vm14, %v3116_v30, %v3117_v42 }
 0x22e   : > { %v2293_v26 = vpack.c.bf16 %v2228_v40, %v2224_v16  ;;  %v2294_v6 = vpack.c.bf16 %v2229_v21, %v2225_v29  ;;  %v2295_v40 = vld [vmem:[%s4633_s3] sm:$0x3] }
 0x230   : > { %2399 = vrot.lane.b32.xlu0 %v2294_v6, %s3136_s10  ;;  %2397 = vrot.lane.b32.xlu1 %v2293_v26, %s3136_s10 }
 0x233   : > { %v2334_v5 = vpop.permute.xlu0 %2333  ;;  %v2336_v53 = vpop.permute.xlu1 %2335 }
 0x234   : > { %v2403_v4 = vsel %vm659_vm9, %v2334_v5, %v2336_v53 }
 0x235   : > { %2471 = vmatprep.subr.bf16.mxu0 %v2403_v4  ;;  %v3157_v4 = vmov 1983009808  }
 0x237   : > { %v2332_v63 = vpop.permute.xlu0 %2331 }
 0x238   : > { %v2402_v10 = vsel %vm659_vm9, %v2332_v63, %v2334_v5  ;;  %v2564_v63 = vunpack.c.l.s4 %v3157_v4 }
 0x239   : > { %2472 = vmatpush1.bf16.msra.mxu0 %v2402_v10  ;;  %v2338_v41 = vpop.permute.xlu1 %2337 }
 0x23a   : > { %v2404_v61 = vsel %vm659_vm9, %v2336_v53, %v2338_v41 }
 0x23b   : > { %v2340_v24 = vpop.permute.xlu0 %2339 }
 0x23c   : > { %v2405_v27 = vsel %vm659_vm9, %v2338_v41, %v2340_v24 }
 0x23d   : > { %2512 = vmatprep.subr.bf16.mxu1 %v2405_v27  ;;  %v2344_v1 = vpop.permute.xlu1 %2343 }
 0x23e   : > { %2513 = vmatpush1.bf16.msra.mxu1 %v2404_v61 }
 0x24b   : > { %v2346_v54 = vpop.permute.xlu0 %2345  ;;  %v2342_v31 = vpop.permute.xlu1 %2341 }
 0x24c   : > { %v2407_v33 = vsel %vm659_vm9, %v2344_v1, %v2346_v54  ;;  %v2406_v58 = vsel %vm659_vm9, %v2342_v31, %v2344_v1 }
 0x24d   : > { %2473 = vmatprep.subr.bf16.mxu0 %v2407_v33 }
 0x24e   : > { %2474 = vmatpush1.bf16.msra.mxu0 %v2406_v58  ;;  %v2565_v58 = vunpack.c.0.s8 %v2564_v63 }
 0x250   : > { %v2350_v25 = vpop.permute.xlu1 %2349 }
 0x251   : > { %v2348_v3 = vpop.permute.xlu0 %2347 }
 0x252   : > { %v2409_v28 = vsel %vm659_vm9, %v2348_v3, %v2350_v25  ;;  %v2408_v59 = vsel %vm659_vm9, %v2346_v54, %v2348_v3 }
 0x253   : > { %2514 = vmatprep.subr.bf16.mxu1 %v2409_v28 }
 0x254   : > { %2515 = vmatpush1.bf16.msra.mxu1 %v2408_v59 }
 0x25b   : > { %v2354_v38 = vpop.permute.xlu0 %2353 }
 0x25f   : > { %v2356_v19 = vpop.permute.xlu1 %2355 }
 0x260   : > { %v2411_v47 = vsel %vm659_vm9, %v2354_v38, %v2356_v19 }
 0x261   : > { %2475 = vmatprep.subr.bf16.mxu0 %v2411_v47 }
 0x263   : > { %v2352_v36 = vpop.permute.xlu0 %2351 }
 0x264   : > { %v2410_v44 = vsel %vm659_vm9, %v2352_v36, %v2354_v38  ;;  %v4653_v38 = vld [vmem:[#allocation2_spill] sm:$0xff] }
 0x265   : > { %2476 = vmatpush1.bf16.msra.mxu0 %v2410_v44  ;;  %v2358_v13 = vpop.permute.xlu1 %2357 }
 0x266   : > { %v2412_v35 = vsel %vm659_vm9, %v2356_v19, %v2358_v13  ;;  %v2568_v19 = vsub.s32 %v2565_v58, %v4653_v38 }
 0x267   : > { %v2360_v2 = vpop.permute.xlu0 %2359 }
 0x268   : > { %v2413_v14 = vsel %vm659_vm9, %v2358_v13, %v2360_v2 }
 0x269   : > { %2516 = vmatprep.subr.bf16.mxu1 %v2413_v14  ;;  %v2364_v51 = vpop.permute.xlu1 %2363 }
 0x26a   : > { %2517 = vmatpush1.bf16.msra.mxu1 %v2412_v35 }
 0x26d   : > { %v2362_v22 = vpop.permute.xlu1 %2361 }
 0x26e   : > { %v2414_v62 = vsel %vm659_vm9, %v2362_v22, %v2364_v51 }
 0x277   : > { %v2366_v56 = vpop.permute.xlu0 %2365 }
 0x278   : > { %v2415_v17 = vsel %vm659_vm9, %v2364_v51, %v2366_v56 }
 0x279   : > { %2477 = vmatprep.subr.bf16.mxu0 %v2415_v17  ;;  %v2370_v0 = vpop.permute.xlu1 %2369 }
 0x27a   : > { %2478 = vmatpush1.bf16.msra.mxu0 %v2414_v62 }
 0x27b   : > { %v2368_v45 = vpop.permute.xlu0 %2367 }
 0x27c   : > { %v2417_v46 = vsel %vm659_vm9, %v2368_v45, %v2370_v0  ;;  %v2416_v9 = vsel %vm659_vm9, %v2366_v56, %v2368_v45 }
 0x27d   : > { %2518 = vmatprep.subr.bf16.mxu1 %v2417_v46 }
 0x27e   : > { %2519 = vmatpush1.bf16.msra.mxu1 %v2416_v9 }
 0x282   : > { %v2374_v12 = vpop.permute.xlu0 %2373  ;;  %v2376_v39 = vpop.permute.xlu1 %2375 }
 0x283   : > { %v2419_v18 = vsel %vm659_vm9, %v2374_v12, %v2376_v39 }
 0x284   : > { %2479 = vmatprep.subr.bf16.mxu0 %v2419_v18 }
 0x286   : > { %v2372_v8 = vpop.permute.xlu0 %2371  ;;  %v2378_v52 = vpop.permute.xlu1 %2377 }
 0x287   : > { %v2418_v7 = vsel %vm659_vm9, %v2372_v8, %v2374_v12  ;;  %v2420_v34 = vsel %vm659_vm9, %v2376_v39, %v2378_v52 }
 0x288   : > { %2480 = vmatpush1.bf16.msra.mxu0 %v2418_v7 }
 0x28a   : > { %v2380_v60 = vpop.permute.xlu0 %2379  ;;  %v2384_v15 = vpop.permute.xlu1 %2383 }
 0x28b   : > { %v2421_v49 = vsel %vm659_vm9, %v2378_v52, %v2380_v60 }
 0x28c   : > { %2520 = vmatprep.subr.bf16.mxu1 %v2421_v49 }
 0x28d   : > { %2521 = vmatpush1.bf16.msra.mxu1 %v2420_v34 }
 0x28e   : > { %v2386_v23 = vpop.permute.xlu0 %2385  ;;  %v2382_v37 = vpop.permute.xlu1 %2381 }
 0x28f   : > { %v2423_v55 = vsel %vm659_vm9, %v2384_v15, %v2386_v23  ;;  %v2422_v48 = vsel %vm659_vm9, %v2382_v37, %v2384_v15 }
 0x290   : > { %2481 = vmatprep.subr.bf16.mxu0 %v2423_v55 }
 0x291   : > { %2482 = vmatpush1.bf16.msra.mxu0 %v2422_v48 }
 0x292   : > { %v2388_v57 = vpop.permute.xlu0 %2387  ;;  %v2390_v11 = vpop.permute.xlu1 %2389 }
 0x293   : > { %v2425_v43 = vsel %vm659_vm9, %v2388_v57, %v2390_v11  ;;  %v2424_v20 = vsel %vm659_vm9, %v2386_v23, %v2388_v57 }
 0x294   : > { %2522 = vmatprep.subr.bf16.mxu1 %v2425_v43 }
 0x295   : > { %2523 = vmatpush1.bf16.msra.mxu1 %v2424_v20 }
 0x296   : > { %v2392_v50 = vpop.permute.xlu0 %2391  ;;  %v2394_v32 = vpop.permute.xlu1 %2393 }
 0x297   : > { %v2426_v42 = vsel %vm659_vm9, %v2392_v50, %v2394_v32 }
 0x298   : > { %v2460_v29 = vsel %vm2458_vm1, %v2426_v42, 0 }
 0x29a   : > { %v2396_v30 = vpop.permute.xlu0 %2395 }
 0x29b   : > { %v2427_v16 = vsel %vm659_vm9, %v2394_v32, %v2396_v30 }
 0x29c   : > { %2727 = vmatprep.subr.msk.bf16.mxu0 %vm2458_vm1, %v2427_v16 }
 0x29d   : > { %2484 = vmatpush1.bf16.msra.mxu0 %v2460_v29 }
 0x2a0   : > { %2728 = vmatmul.mubr.msk.bf16.vlgmr.msra.gmra.mrb[0].mxu0 %vm2454_vm5, %v2295_v40 }
 0x2a2   : > { %v2400_v21 = vpop.permute.xlu0 %2399  ;;  %v2398_v26 = vpop.permute.xlu1 %2397 }
 0x2a3   : > { %v2428_v6 = vsel %vm659_vm9, %v2396_v30, %v2398_v26  ;;  %v2429_v5 = vsel %vm659_vm9, %v2398_v26, %v2400_v21  ;;  %vm2603_vm9 = vcmask 11264  }
 0x2a4   : > { %2729 = vmatprep.subr.msk.bf16.mxu1 %vm2458_vm1, %v2429_v5  ;;  %v2466_v53 = vsel %vm2458_vm1, %v2428_v6, 0 }
 0x2a5   : > { %2525 = vmatpush1.bf16.msra.mxu1 %v2466_v53 }
 0x2a8   : > { %2730 = vmatmul.mubr.msk.bf16.vlgmr.msra.gmra.mrb[0].mxu1 %vm2454_vm5, %v2295_v40 }
 0x373   : > { %v2505_v10 = vpop.f32.mrb[0].mxu0 }
 0x374   : > { %v2580_v41 = vsel %vm1791_vm12, %v2505_v10, 0.0  ;;  %v2589_v24 = vmul.f32 %v2505_v10, %v2505_v10  ;;  %v2507_v27 = vpop.f32.mrb[1].mxu0 }
 0x375   : > { %v2731_v61 = vpack.c.bf16 %v2507_v27, %v2505_v10  ;;  %v2581_v1 = vsel %vm1791_vm12, %v2507_v27, 0.0  ;;  %v2590_v54 = vmul.f32 %v2507_v27, %v2507_v27  ;;  %v2509_v31 = vpop.f32.mrb[2].mxu0 }
 0x376   : > { %v2593_v33 = vsel %vm1791_vm12, %v2589_v24, 0.0  ;;  %v2582_v25 = vadd.f32 %v2581_v1, %v2580_v41  ;;  %v2510_v3 = vpop.f32.mrb[3].mxu0 }
 0x377   : > { %v2594_v28 = vsel %vm1791_vm12, %v2590_v54, 0.0  ;;  %v2569_v56 = vrot.slane %v2731_v61, %v2568_v19 }
 0x378   : > { %v2595_v59 = vadd.f32 %v2594_v28, %v2593_v33 }
 0x37b   : > { %v2546_v47 = vpop.f32.mrb[0].mxu1 }
 0x37c   : > { %v2583_v36 = vsel %vm1791_vm12, %v2546_v47, 0.0  ;;  %v2591_v44 = vmul.f32 %v2546_v47, %v2546_v47  ;;  %v2548_v13 = vpop.f32.mrb[1].mxu1 }
 0x37d   : > { %v2584_v2 = vadd.f32 %v2583_v36, %v2582_v25  ;;  %v2732_v14 = vpack.c.bf16 %v2548_v13, %v2546_v47  ;;  %v2585_v35 = vsel %vm1791_vm12, %v2548_v13, 0.0  ;;  %v2592_v51 = vmul.f32 %v2548_v13, %v2548_v13  ;;  %v2550_v22 = vpop.f32.mrb[2].mxu1 }
 0x37e   : > { %v2596_v17 = vsel %vm1791_vm12, %v2591_v44, 0.0  ;;  %v2551_v62 = vpop.f32.mrb[3].mxu1 }
 0x37f   : > { %v2576_v0 = vrot.slane %v2732_v14, %v2568_v19  ;;  %v2586_v45 = vadd.f32 %v2585_v35, %v2584_v2  ;;  %v2597_v46 = vadd.f32 %v2596_v17, %v2595_v59  ;;  %v2598_v9 = vsel %vm1791_vm12, %v2592_v51, 0.0 }
 0x381   : > { %v2577_v12 = vcombine.low %v2569_v56, %v2576_v0  ;;  %2587 = vadd.xlane.f32.xlu1 %v2586_v45  ;;  %v2599_v39 = vadd.f32 %v2598_v9, %v2597_v46 }
 0x383   : > { %2579 = vst [vmem:[%s258_s12] sm:$0xff] %v2577_v12  ;;  %2600 = vadd.xlane.f32.xlu0 %v2599_v39 }
 0x40e   : > { %v2588_v18 = vpop.xlane.xlu1 %2587 }
 0x410   : > { %v2601_v8 = vpop.xlane.xlu0 %2600 }
 0x411   : > { %v2602_v52 = vsel %vm891_vm15, %v2588_v18, %v2601_v8 }
 0x412   : > { %2604 = vst.msk [vmem:[%s262_s23] sm:$0xf] %vm2603_vm9, %v2602_v52 }
 0x413 PF: > { %s17_s21 = sadd.s32 1, %s3124_s21  }
 0x414   : > { %p14_p4 = scmp.ge.s32.totalorder %s17_s21, 4  }
 0x416   :  { %16 = sbr.rel (!%p14_p4) target bundleno = 1 (0x1), region = 108 }

</bundles_post_ra>
